<compile_context>
chip_gen: v6e
topology: v6e:2x2x1
jax: 0.10.0
libtpu: 0.0.40
codegen_flags: <defaults>
</compile_context>

<pallas_src>
import functools

import jax
import jax.numpy as jnp
from jax.experimental import pallas as pl
from jax.experimental.pallas import tpu as pltpu


def _leaky(x, slope=0.2):
    return jnp.where(x >= 0, x, slope * x)


def _round_up(n, m):
    return ((n + m - 1) // m) * m


# --------------------------------------------------------------------------
# Pallas kernel (all lanes grouped G points wide, k neighbors on sublanes):
#   h   = leaky( nbr @ kron(I_G, [[Wq],[I_D]]) + c )      (xyz2feature + residual)
#   h1  = leaky( h  @ kron(I_G, w1) + b1 )                (mlp block 1, BN folded)
#   h2  = leaky( h1 @ kron(I_G, w2/k) + b2/k )            (mlp block 2, mean folded)
#   out = sum over the k sublane rows of each point-group (128-lane-dense store)
# --------------------------------------------------------------------------
def lpfa1_kernel(nbr_ref, c_ref, wnb_ref, w1_ref, b1_ref, w2_ref, b2_ref,
                 out_ref, *, k):
    nbr = nbr_ref[...]                                   # (tm_a*k, G*(3+D)) bf16
    tm = nbr.shape[0]
    tm_a = tm // k
    gd = c_ref.shape[-1]                                 # G*D

    # layer 0: neighbor part on the MXU (f32 acc) + f32 per-point term + LeakyReLU
    h = jnp.dot(nbr, wnb_ref[...], preferred_element_type=jnp.float32)   # (tm, G*D)
    cb = jnp.broadcast_to(c_ref[...][:, None, :], (tm_a, k, gd)).reshape(tm, gd)
    h = _leaky(h + cb)

    # mlp block 1 (1x1 conv + BN folded) + LeakyReLU
    h1 = _leaky(jnp.dot(h.astype(jnp.bfloat16), w1_ref[...],
                        preferred_element_type=jnp.float32) + b1_ref[...])

    # mlp block 2 (1x1 conv + BN folded, 1/k of the mean folded) + LeakyReLU
    h2 = _leaky(jnp.dot(h1.astype(jnp.bfloat16), w2_ref[...],
                        preferred_element_type=jnp.float32) + b2_ref[...])

    # mean over the k neighbors (1/k already folded): free reshape + sublane sum,
    # result row is already 128-lane dense.
    gout = h2.shape[-1]
    out_ref[...] = jnp.sum(h2.reshape(tm_a, k, gout), axis=1)


def lpfa1_pallas(nbr, c, wnb, w1, b1, w2, b2, *, k, tm_a_target=512):
    gin = nbr.shape[-1]                    # G*(3+D)
    A, gd = c.shape                        # A = B*N/G point-groups, gd = G*D
    gout = w1.shape[-1]                    # G*OUT
    assert nbr.shape[0] == A * k

    # ---- tile / grid selection (big tiles; even grid for v7x megacore) ------
    tm_a = min(tm_a_target, _round_up(A, 8))
    n_tiles = pl.cdiv(A, tm_a)
    if n_tiles > 1 and n_tiles % 2:
        n_tiles += 1
        tm_a = _round_up(pl.cdiv(A, n_tiles), 8)
        n_tiles = pl.cdiv(A, tm_a)
    A_pad = n_tiles * tm_a
    if A_pad != A:
        # pad whole point-groups at the END; their garbage outputs are sliced off
        nbr = jnp.pad(nbr, ((0, (A_pad - A) * k), (0, 0)))
        c = jnp.pad(c, ((0, A_pad - A), (0, 0)))

    full = lambda a: pl.BlockSpec(a.shape, lambda i: (0,) * a.ndim)

    out = pl.pallas_call(
        functools.partial(lpfa1_kernel, k=k),
        out_shape=jax.ShapeDtypeStruct((A_pad, gout), jnp.float32),
        grid_spec=pltpu.PrefetchScalarGridSpec(
            num_scalar_prefetch=0,
            grid=(n_tiles,),
            in_specs=[
                pl.BlockSpec((tm_a * k, gin), lambda i: (i, 0)),   # neighbor rows
                pl.BlockSpec((tm_a, gd), lambda i: (i, 0)),        # per-point term
                full(wnb), full(w1), full(b1), full(w2), full(b2),
            ],
            out_specs=pl.BlockSpec((tm_a, gout), lambda i: (i, 0)),
        ),
        compiler_params=pltpu.CompilerParams(
            dimension_semantics=("parallel",)),
    )(nbr, c, wnb, w1, b1, w2, b2)
    return out[:A]                                       # (A, G*OUT) f32


# --------------------------------------------------------------------------
# JAX glue: knn, parameter folding, grouped gather, per-point term
# --------------------------------------------------------------------------
def knn_idx(xyz, k):
    # Matches the PyTorch knn(): topk(k+1) then keep the first k indices
    # (this intentionally keeps the self index, exactly like the reference).
    inner = -2.0 * jnp.einsum('bcn,bcm->bnm', xyz, xyz)
    xx = jnp.sum(xyz ** 2, axis=1, keepdims=True)                # (B,1,N)
    pd = -xx - inner - jnp.transpose(xx, (0, 2, 1))              # (B,N,N)
    _, idx = jax.lax.top_k(pd, k + 1)
    return idx[:, :, :k]                                         # (B,N,k)


def fold_bn(w, gamma, beta, mean, var, eps=1e-5):
    # w: (cin, cout) 1x1-conv weight; eval-mode BN over cout folded in.
    scale = gamma / jnp.sqrt(var + eps)
    return w * scale[None, :], beta - mean * scale


def choose_group(out_ch, n_points):
    g = max(1, 128 // out_ch)          # points packed per 128-lane row
    while g > 1 and n_points % g:
        g //= 2
    return g


def prepare_params(params, D, k, G):
    """Fold BN + 1/k, split the first conv into neighbor/center parts and build
    block-diagonal kron(I_G, .) bf16 weights for G-point lane grouping."""
    wxyz, bxyz = fold_bn(params['wxyz'], *params['bn0'])         # (9,D), (D,)
    w1, b1 = fold_bn(params['w1'], *params['bn1'])               # (D,OUT), (OUT,)
    w2, b2 = fold_bn(params['w2'], *params['bn2'])               # (OUT,OUT), (OUT,)
    w2 = w2 / k                                                  # mean over k folded
    b2 = b2 / k                                                  # (leaky is pos.-homog.)

    # pf9 = [p, q, q-p]:  pf9 @ Wxyz = q @ (W[3:6]+W[6:9]) + p @ (W[0:3]-W[6:9])
    w_q = wxyz[3:6] + wxyz[6:9]                                  # neighbor-xyz part
    w_p = wxyz[0:3] - wxyz[6:9]                                  # center-xyz part
    # neighbor slab is [q_xyz | q_feat]; "+ fd" contributes q_feat through an
    # identity block (the -p_feat half lives in the f32 per-point term).
    w_nb = jnp.concatenate([w_q, jnp.eye(D, dtype=w_q.dtype)], axis=0)   # (3+D, D)

    eye_g = jnp.eye(G, dtype=jnp.float32)
    wnb_blk = jnp.kron(eye_g, w_nb).astype(jnp.bfloat16)         # (G*(3+D), G*D)
    w1_blk = jnp.kron(eye_g, w1).astype(jnp.bfloat16)            # (G*D,     G*OUT)
    w2_blk = jnp.kron(eye_g, w2).astype(jnp.bfloat16)            # (G*OUT,   G*OUT)
    b1_t = jnp.tile(b1, G)[None, :].astype(jnp.float32)          # (1, G*OUT)
    b2_t = jnp.tile(b2, G)[None, :].astype(jnp.float32)
    return w_p, bxyz, wnb_blk, w1_blk, b1_t, w2_blk, b2_t


def prepare_neighbors(x, xyz, idx, G):
    """Gather raw [xyz | feat] rows of the k neighbors, grouped G points per row:
       row = (batch, point-group, neighbor j), lanes = G x (3+D)."""
    B, D, N = x.shape
    k = idx.shape[-1]
    xyz_t = jnp.transpose(xyz, (0, 2, 1))                        # (B,N,3)
    x_t = jnp.transpose(x, (0, 2, 1))                            # (B,N,D)
    # bf16 BEFORE the gather so the gather output feeds the kernel directly
    table = jnp.concatenate([xyz_t, x_t], axis=-1).astype(jnp.bfloat16)
    table = table.reshape(B * N, 3 + D)
    idx_g = idx.reshape(B, N // G, G, k).transpose(0, 1, 3, 2)   # (B, N//G, k, G)
    idx_flat = (idx_g + jnp.arange(B)[:, None, None, None] * N).reshape(-1)
    return table[idx_flat].reshape(B * (N // G) * k, G * (3 + D))


def prepare_point_term(x, xyz, w_p, bxyz, G):
    """Per-point (k-invariant) half of layer 0, kept in f32:
         c = p_xyz @ (Wxyz[0:3]-Wxyz[6:9]) - p_feat + b_xyz."""
    B, D, N = x.shape
    xyz_t = jnp.transpose(xyz, (0, 2, 1))
    x_t = jnp.transpose(x, (0, 2, 1))
    c = (jnp.dot(xyz_t, w_p, precision=jax.lax.Precision.HIGHEST)
         + bxyz[None, None, :] - x_t)                            # (B,N,D) f32
    return c.reshape(B * (N // G), G * D)


@functools.partial(jax.jit, static_argnames=('k', 'tm_a_target'))
def lpfa1_forward(x, xyz, params, *, k, tm_a_target=512):
    B, D, N = x.shape
    OUT = params['w1'].shape[1]
    G = choose_group(OUT, N)

    idx = knn_idx(xyz, k)                                        # (B,N,k)   — XLA
    w_p, bxyz, wnb, w1, b1, w2, b2 = prepare_params(params, D, k, G)
    nbr = prepare_neighbors(x, xyz, idx, G)                      # (B*N//G*k, G*(3+D)) bf16
    c = prepare_point_term(x, xyz, w_p, bxyz, G)                 # (B*N//G,   G*D)    f32

    pooled = lpfa1_pallas(nbr, c, wnb, w1, b1, w2, b2,
                          k=k, tm_a_target=tm_a_target)          # (B*N//G, G*OUT)
    out = pooled.reshape(B, N, OUT)                              # un-group (free reshape)
    # TODO(synk): emit a channels-major layout directly from the kernel (or keep
    # channels-last downstream) to save this small final transpose pass.
    return jnp.transpose(out, (0, 2, 1))                         # (B, OUT, N)


# --------------------------------------------------------------------------
# References
# --------------------------------------------------------------------------
def ref_kernel_math(nbr, c, wnb, w1, b1, w2, b2, k):
    """Pure-JAX mirror of the exact kernel arithmetic on identical inputs."""
    f32 = jnp.float32
    A, gd = c.shape
    h = nbr.astype(f32) @ wnb.astype(f32)                        # (A*k, G*D)
    h = _leaky(h.reshape(A, k, gd) + c[:, None, :]).reshape(A * k, gd)
    h1 = _leaky(h.astype(jnp.bfloat16).astype(f32) @ w1.astype(f32) + b1)
    h2 = _leaky(h1.astype(jnp.bfloat16).astype(f32) @ w2.astype(f32) + b2)
    return jnp.sum(h2.reshape(A, k, -1), axis=1)                 # (A, G*OUT)


def ref_module_f32(x, xyz, params, k):
    """Pure-f32 reference of the original PyTorch LPFA1 (eval-mode BN)."""
    B, D, N = x.shape
    hi = jax.lax.Precision.HIGHEST
    idx = knn_idx(xyz, k)
    idx_flat = (idx + jnp.arange(B)[:, None, None] * N).reshape(-1)
    xyz_t = jnp.transpose(xyz, (0, 2, 1))
    x_t = jnp.transpose(x, (0, 2, 1))
    q = xyz_t.reshape(B * N, 3)[idx_flat].reshape(B, N, k, 3)
    p = jnp.broadcast_to(xyz_t[:, :, None, :], (B, N, k, 3))
    pf9 = jnp.concatenate([p, q, q - p], axis=-1)                # (B,N,k,9)
    qf = x_t.reshape(B * N, D)[idx_flat].reshape(B, N, k, D)
    fd = qf - x_t[:, :, None, :]                                 # (B,N,k,D)

    wxyz, bxyz = fold_bn(params['wxyz'], *params['bn0'])
    w1, b1 = fold_bn(params['w1'], *params['bn1'])
    w2, b2 = fold_bn(params['w2'], *params['bn2'])
    h = _leaky(jnp.dot(pf9, wxyz, precision=hi) + bxyz + fd)
    h1 = _leaky(jnp.dot(h, w1, precision=hi) + b1)
    h2 = _leaky(jnp.dot(h1, w2, precision=hi) + b2)
    out = jnp.mean(h2, axis=2)                                   # (B,N,OUT)
    return jnp.transpose(out, (0, 2, 1))


# --------------------------------------------------------------------------
if __name__ == "__main__":
    B, N = 2, 256          # batch, num_points
    D = 8                  # in_channel (= num_dims of x, needed for the residual)
    OUT = 16               # out_channel
    K = 8                  # neighbors

    key = jax.random.PRNGKey(0)
    kx, kxyz, kw0, kw1, kw2, kg = jax.random.split(key, 6)
    x = jax.random.normal(kx, (B, D, N), dtype=jnp.float32)
    xyz = jax.random.normal(kxyz, (B, 3, N), dtype=jnp.float32)

    params = {
        'wxyz': jax.random.normal(kw0, (9, D), dtype=jnp.float32) * 0.1,
        'w1':   jax.random.normal(kw1, (D, OUT), dtype=jnp.float32) * 0.1,
        'w2':   jax.random.normal(kw2, (OUT, OUT), dtype=jnp.float32) * 0.1,
        # BN = (gamma, beta, running_mean, running_var), eval mode
        'bn0': (jnp.ones((D,)) + 0.05 * jax.random.normal(kg, (D,)),
                jnp.zeros((D,)), jnp.zeros((D,)), jnp.ones((D,))),
        'bn1': (jnp.ones((OUT,)), jnp.zeros((OUT,)),
                jnp.zeros((OUT,)), jnp.ones((OUT,))),
        'bn2': (jnp.ones((OUT,)), jnp.zeros((OUT,)),
                jnp.zeros((OUT,)), jnp.ones((OUT,))),
    }

    out = jax.block_until_ready(lpfa1_forward(x, xyz, params, k=K))
    assert out.shape == (B, OUT, N), out.shape

    # 1) exact-arithmetic check: kernel vs a pure-JAX mirror on identical inputs
    G = choose_group(OUT, N)
    idx = knn_idx(xyz, K)
    w_p, bxyz, wnb, w1b, b1t, w2b, b2t = prepare_params(params, D, K, G)
    nbr = prepare_neighbors(x, xyz, idx, G)
    c = prepare_point_term(x, xyz, w_p, bxyz, G)
    out_k = lpfa1_pallas(nbr, c, wnb, w1b, b1t, w2b, b2t, k=K)
    ref_k = ref_kernel_math(nbr, c, wnb, w1b, b1t, w2b, b2t, K)
    err_k = float(jnp.max(jnp.abs(out_k - ref_k)))
    assert jnp.allclose(out_k, ref_k, atol=2e-3, rtol=2e-3), err_k

    # 2) semantic sanity vs a pure-f32 reference of the original module
    #    (loose tolerance: the neighbor path runs in bf16 on the MXU)
    ref = ref_module_f32(x, xyz, params, K)
    err = float(jnp.max(jnp.abs(out - ref)))
    assert jnp.allclose(out, ref, atol=1e-1, rtol=1e-1), err

    print("KERNEL_OK")
</pallas_src>

<mosaic_0001>
module attributes {stable_mosaic.version = 11 : i64} {
  func.func @lpfa1_kernel(%arg0: i32, %arg1: memref<512x88xbf16, #tpu.memory_space<vmem>>, %arg2: memref<64x64xf32, #tpu.memory_space<vmem>>, %arg3: memref<88x64xbf16, #tpu.memory_space<vmem>>, %arg4: memref<64x128xbf16, #tpu.memory_space<vmem>>, %arg5: memref<1x128xf32, #tpu.memory_space<vmem>>, %arg6: memref<128x128xbf16, #tpu.memory_space<vmem>>, %arg7: memref<1x128xf32, #tpu.memory_space<vmem>>, %arg8: memref<64x128xf32, #tpu.memory_space<vmem>>) attributes {dimension_semantics = [#tpu.dimension_semantics<parallel>], iteration_bounds = array<i64: 1>, scalar_prefetch = 0 : i64, scratch_operands = 0 : i64, tpu.core_type = #tpu.core_type<tc>, window_params = [{transform_indices = @transform_0, window_bounds = array<i64: 512, 88>}, {transform_indices = @transform_1, window_bounds = array<i64: 64, 64>}, {pipeline_mode = #tpu.pipeline_mode<synchronous>, transform_indices = @transform_2, window_bounds = array<i64: 88, 64>}, {pipeline_mode = #tpu.pipeline_mode<synchronous>, transform_indices = @transform_3, window_bounds = array<i64: 64, 128>}, {pipeline_mode = #tpu.pipeline_mode<synchronous>, transform_indices = @transform_4, window_bounds = array<i64: 1, 128>}, {pipeline_mode = #tpu.pipeline_mode<synchronous>, transform_indices = @transform_5, window_bounds = array<i64: 128, 128>}, {pipeline_mode = #tpu.pipeline_mode<synchronous>, transform_indices = @transform_6, window_bounds = array<i64: 1, 128>}, {transform_indices = @transform_7, window_bounds = array<i64: 64, 128>}]} {
    %c0 = arith.constant 0 : index
    %c0_0 = arith.constant 0 : index
    %0 = vector.load %arg1[%c0, %c0_0] : memref<512x88xbf16, #tpu.memory_space<vmem>>, vector<512x88xbf16>
    %c0_1 = arith.constant 0 : index
    %c0_2 = arith.constant 0 : index
    %1 = vector.load %arg3[%c0_1, %c0_2] : memref<88x64xbf16, #tpu.memory_space<vmem>>, vector<88x64xbf16>
    %cst = arith.constant dense<0.000000e+00> : vector<512x64xf32>
    %2 = tpu.matmul %0, %1, %cst {dimension_numbers = #tpu.dot_dimension_numbers<[1], [0], [0], [1], [0, 0, 1, 1], [], []>} : vector<512x88xbf16>, vector<88x64xbf16>, vector<512x64xf32> -> vector<512x64xf32>
    %c0_3 = arith.constant 0 : index
    %c0_4 = arith.constant 0 : index
    %3 = vector.load %arg2[%c0_3, %c0_4] : memref<64x64xf32, #tpu.memory_space<vmem>>, vector<64x64xf32>
    %4 = vector.shape_cast %3 : vector<64x64xf32> to vector<64x1x64xf32>
    %5 = vector.shape_cast %4 : vector<64x1x64xf32> to vector<64x1x64xf32>
    %6 = vector.broadcast %5 : vector<64x1x64xf32> to vector<64x8x64xf32>
    %7 = vector.shape_cast %6 : vector<64x8x64xf32> to vector<512x64xf32>
    %8 = arith.addf %2, %7 : vector<512x64xf32>
    %cst_5 = arith.constant 0.000000e+00 : f32
    %9 = vector.broadcast %cst_5 : f32 to vector<512x64xf32>
    %10 = arith.cmpf oge, %8, %9 : vector<512x64xf32>
    %cst_6 = arith.constant 2.000000e-01 : f32
    %11 = vector.broadcast %cst_6 : f32 to vector<512x64xf32>
    %12 = arith.mulf %11, %8 : vector<512x64xf32>
    %13 = arith.select %10, %8, %12 : vector<512x64xi1>, vector<512x64xf32>
    %14 = arith.truncf %13 : vector<512x64xf32> to vector<512x64xbf16>
    %c0_7 = arith.constant 0 : index
    %c0_8 = arith.constant 0 : index
    %15 = vector.load %arg4[%c0_7, %c0_8] : memref<64x128xbf16, #tpu.memory_space<vmem>>, vector<64x128xbf16>
    %cst_9 = arith.constant dense<0.000000e+00> : vector<512x128xf32>
    %16 = tpu.matmul %14, %15, %cst_9 {dimension_numbers = #tpu.dot_dimension_numbers<[1], [0], [0], [1], [0, 0, 1, 1], [], []>} : vector<512x64xbf16>, vector<64x128xbf16>, vector<512x128xf32> -> vector<512x128xf32>
    %c0_10 = arith.constant 0 : index
    %c0_11 = arith.constant 0 : index
    %17 = vector.load %arg5[%c0_10, %c0_11] : memref<1x128xf32, #tpu.memory_space<vmem>>, vector<1x128xf32>
    %18 = vector.broadcast %17 : vector<1x128xf32> to vector<512x128xf32>
    %19 = arith.addf %16, %18 : vector<512x128xf32>
    %cst_12 = arith.constant 0.000000e+00 : f32
    %20 = vector.broadcast %cst_12 : f32 to vector<512x128xf32>
    %21 = arith.cmpf oge, %19, %20 : vector<512x128xf32>
    %cst_13 = arith.constant 2.000000e-01 : f32
    %22 = vector.broadcast %cst_13 : f32 to vector<512x128xf32>
    %23 = arith.mulf %22, %19 : vector<512x128xf32>
    %24 = arith.select %21, %19, %23 : vector<512x128xi1>, vector<512x128xf32>
    %25 = arith.truncf %24 : vector<512x128xf32> to vector<512x128xbf16>
    %c0_14 = arith.constant 0 : index
    %c0_15 = arith.constant 0 : index
    %26 = vector.load %arg6[%c0_14, %c0_15] : memref<128x128xbf16, #tpu.memory_space<vmem>>, vector<128x128xbf16>
    %cst_16 = arith.constant dense<0.000000e+00> : vector<512x128xf32>
    %27 = tpu.matmul %25, %26, %cst_16 {dimension_numbers = #tpu.dot_dimension_numbers<[1], [0], [0], [1], [0, 0, 1, 1], [], []>} : vector<512x128xbf16>, vector<128x128xbf16>, vector<512x128xf32> -> vector<512x128xf32>
    %c0_17 = arith.constant 0 : index
    %c0_18 = arith.constant 0 : index
    %28 = vector.load %arg7[%c0_17, %c0_18] : memref<1x128xf32, #tpu.memory_space<vmem>>, vector<1x128xf32>
    %29 = vector.broadcast %28 : vector<1x128xf32> to vector<512x128xf32>
    %30 = arith.addf %27, %29 : vector<512x128xf32>
    %cst_19 = arith.constant 0.000000e+00 : f32
    %31 = vector.broadcast %cst_19 : f32 to vector<512x128xf32>
    %32 = arith.cmpf oge, %30, %31 : vector<512x128xf32>
    %cst_20 = arith.constant 2.000000e-01 : f32
    %33 = vector.broadcast %cst_20 : f32 to vector<512x128xf32>
    %34 = arith.mulf %33, %30 : vector<512x128xf32>
    %35 = arith.select %32, %30, %34 : vector<512x128xi1>, vector<512x128xf32>
    %36 = vector.shape_cast %35 : vector<512x128xf32> to vector<64x8x128xf32>
    %cst_21 = arith.constant dense<0.000000e+00> : vector<64x128xf32>
    %37 = vector.multi_reduction <add>, %36, %cst_21 [1] : vector<64x8x128xf32> to vector<64x128xf32>
    %c0_22 = arith.constant 0 : index
    %c0_23 = arith.constant 0 : index
    %38 = vector.load %arg8[%c0_22, %c0_23] : memref<64x128xf32, #tpu.memory_space<vmem>>, vector<64x128xf32>
    tpu.vector_store %arg8[%c0_22, %c0_23], %37 {strides = array<i32>} : memref<64x128xf32, #tpu.memory_space<vmem>>, vector<64x128xf32>,
    return
  }
  func.func @transform_0(%arg0: i32) -> (i32, i32) {
    %c0_i32 = arith.constant 0 : i32
    %c0_i32_0 = arith.constant 0 : i32
    return %arg0, %c0_i32 : i32, i32
  }
  func.func @transform_1(%arg0: i32) -> (i32, i32) {
    %c0_i32 = arith.constant 0 : i32
    %c0_i32_0 = arith.constant 0 : i32
    return %arg0, %c0_i32 : i32, i32
  }
  func.func @transform_2(%arg0: i32) -> (i32, i32) {
    %c0_i32 = arith.constant 0 : i32
    %c0_i32_0 = arith.constant 0 : i32
    %c0_i32_1 = arith.constant 0 : i32
    return %c0_i32, %c0_i32_0 : i32, i32
  }
  func.func @transform_3(%arg0: i32) -> (i32, i32) {
    %c0_i32 = arith.constant 0 : i32
    %c0_i32_0 = arith.constant 0 : i32
    %c0_i32_1 = arith.constant 0 : i32
    return %c0_i32, %c0_i32_0 : i32, i32
  }
  func.func @transform_4(%arg0: i32) -> (i32, i32) {
    %c0_i32 = arith.constant 0 : i32
    %c0_i32_0 = arith.constant 0 : i32
    %c0_i32_1 = arith.constant 0 : i32
    return %c0_i32, %c0_i32_0 : i32, i32
  }
  func.func @transform_5(%arg0: i32) -> (i32, i32) {
    %c0_i32 = arith.constant 0 : i32
    %c0_i32_0 = arith.constant 0 : i32
    %c0_i32_1 = arith.constant 0 : i32
    return %c0_i32, %c0_i32_0 : i32, i32
  }
  func.func @transform_6(%arg0: i32) -> (i32, i32) {
    %c0_i32 = arith.constant 0 : i32
    %c0_i32_0 = arith.constant 0 : i32
    %c0_i32_1 = arith.constant 0 : i32
    return %c0_i32, %c0_i32_0 : i32, i32
  }
  func.func @transform_7(%arg0: i32) -> (i32, i32) {
    %c0_i32 = arith.constant 0 : i32
    %c0_i32_0 = arith.constant 0 : i32
    return %arg0, %c0_i32 : i32, i32
  }
}

</mosaic_0001>

<bundles_post_ra>
// kernel: neg.5
= control target key start
LH: loop header
LB: loop body
LE: loop exit
PB: predicated region body
PF: predicated region fallthrough
CT: control target
= control target key end

     0   :  { %s40_s0 = inlined_call_operand.vmem [shape: f32[2,256], index: 0, kind: input, shape index: {}]   ;;  %s41_s1 = inlined_call_operand.vmem [shape: f32[2,256], index: 1, kind: output, shape index: {}]  }
   0x1   :  { %v2_v0 = vld [vmem:[%s40_s0] sm:$0x3]  ;;  %v16_v1 = vld [vmem:[%s40_s0 + $0x2] sm:$0x3] }
   0x2   :  { %v5_v2 = vxor.u32 2147483648, %v2_v0  ;;  %v12_v3 = vxor.u32 2147483648, %v16_v1 }
   0x4   :  { %7 = vst [vmem:[%s41_s1] sm:$0x3] %v5_v2  ;;  %17 = vst [vmem:[%s41_s1 + $0x2] sm:$0x3] %v12_v3 }

// kernel: tile.13
= control target key start
LH: loop header
LB: loop body
LE: loop exit
PB: predicated region body
PF: predicated region fallthrough
CT: control target
= control target key end

     0   :  { %s22_s0 = inlined_call_operand.vmem [shape: f32[16], index: 0, kind: input, shape index: {}]   ;;  %s23_s1 = inlined_call_operand.vmem [shape: f32[8,16], index: 1, kind: output, shape index: {}]  }
   0x1   :  { %v4_v0 = vld [vmem:[%s22_s0] ss:$0 sm:$0xff] }
   0x2   :  { %5 = vst [vmem:[%s23_s1] sm:$0xff] %v4_v0 }

// kernel: tile.14
= control target key start
LH: loop header
LB: loop body
LE: loop exit
PB: predicated region body
PF: predicated region fallthrough
CT: control target
= control target key end

     0   :  { %s69_s10 = smov 112   ;;  %s70_s11 = smov 80   ;;  %vm3_vm0 = vcmask 130048   ;;  %vm9_vm1 = vcmask 1048448   ;;  %vm15_vm2 = vcmask 917248   ;;  %vm21_vm3 = vcmask 786048   ;;  %s113_s0 = inlined_call_operand.vmem [shape: f32[8,16], index: 0, kind: input, shape index: {}]   ;;  %s114_s1 = inlined_call_operand.vmem [shape: f32[1,128], index: 1, kind: output, shape index: {}]  }
   0x1   :  { %v55_v0 = vld [vmem:[%s113_s0 + $0x7] sm:$0x1]   ;;  %v57_v1 = vld [vmem:[%s113_s0 + $0x5] sm:$0x1]   ;;  %v56_v2 = vld [vmem:[%s113_s0 + $0x6] sm:$0x1]  }
   0x2   :  { %7 = vrot.lane.b32.xlu0 %v55_v0, %s69_s10  ;;  %19 = vrot.lane.b32.xlu1 %v57_v1, %s70_s11  ;;  %v58_v3 = vld [vmem:[%s113_s0 + $0x4] sm:$0x1]   ;;  %v2_v4 = vld [vmem:[%s113_s0] sm:$0x1]   ;;  %s71_s18 = smov 96   ;;  %s72_s19 = smov 64  }
   0x3   :  { %4 = vst.msk [vmem:[#allocation0] sm:$0x1] %vm3_vm0, %v2_v4   ;;  %v59_v5 = vld [vmem:[%s113_s0 + $0x3] sm:$0x1]   ;;  %v60_v6 = vld [vmem:[%s113_s0 + $0x2] sm:$0x1]  }
   0x4   :  { %s73_s24 = smov 48   ;;  %s74_s25 = smov 32   ;;  %v61_v7 = vld [vmem:[%s113_s0 + $0x1] sm:$0x1]   ;;  %vm27_vm4 = vcmask 654848   ;;  %vm33_vm5 = vcmask 523648  }
   0x5   :  { %s75_s0 = smov 16   ;;  %vm39_vm6 = vcmask 392448   ;;  %vm45_vm7 = vcmask 261248  }
   0x6   :  { %13 = vrot.lane.b32.xlu0 %v56_v2, %s71_s18  ;;  %25 = vrot.lane.b32.xlu1 %v58_v3, %s72_s19 }
   0xa   :  { %31 = vrot.lane.b32.xlu0 %v59_v5, %s73_s24  ;;  %37 = vrot.lane.b32.xlu1 %v60_v6, %s74_s25 }
   0xe   :  { %43 = vrot.lane.b32.xlu0 %v61_v7, %s75_s0 }
  0x74   :  { %v8_v8 = vpop.permute.xlu0 %7   ;;  %v20_v9 = vpop.permute.xlu1 %19  }
  0x75   :  { %10 = vst.msk [vmem:[#allocation0] sm:$0x1] %vm9_vm1, %v8_v8  }
  0x78   :  { %v14_v10 = vpop.permute.xlu0 %13   ;;  %v26_v11 = vpop.permute.xlu1 %25  }
  0x79   :  { %16 = vst.msk [vmem:[#allocation0] sm:$0x1] %vm15_vm2, %v14_v10  }
  0x7a   :  { %22 = vst.msk [vmem:[#allocation0] sm:$0x1] %vm21_vm3, %v20_v9  }
  0x7b   :  { %28 = vst.msk [vmem:[#allocation0] sm:$0x1] %vm27_vm4, %v26_v11  }
  0x7c   :  { %v32_v12 = vpop.permute.xlu0 %31   ;;  %v38_v13 = vpop.permute.xlu1 %37  }
  0x7d   :  { %34 = vst.msk [vmem:[#allocation0] sm:$0x1] %vm33_vm5, %v32_v12  }
  0x7e   :  { %40 = vst.msk [vmem:[#allocation0] sm:$0x1] %vm39_vm6, %v38_v13  }
  0x80   :  { %v44_v14 = vpop.permute.xlu0 %43  }
  0x81   :  { %46 = vst.msk [vmem:[#allocation0] sm:$0x1] %vm45_vm7, %v44_v14  }
  0x88   :  { %v51_v15 = vld [vmem:[#allocation0] sm:$0x1] }
  0x89   :  { %54 = vst [vmem:[%s114_s1] sm:$0x1] %v51_v15 }

// kernel: lpfa1_forward.1
= control target key start
LH: loop header
LB: loop body
LE: loop exit
PB: predicated region body
PF: predicated region fallthrough
CT: control target
= control target key end

     0   :  { %vm1120_vm0 = vcmask 1043456   ;;  %vm1023_vm1 = vcmask 719872   ;;  %v3896_v43 = vmov 1966171168   ;;  %v122_v45 = vlaneseq  ;;  %s4678_s2 = inlined_call_operand.vmem [shape: bf16[88,64], index: 2, kind: input, shape index: {}]   ;;  %s4679_s0 = inlined_call_operand.vmem [shape: bf16[512,88], index: 0, kind: input, shape index: {}]   ;;  %s4680_s3 = inlined_call_operand.vmem [shape: bf16[64,128], index: 3, kind: input, shape index: {}]   ;;  %s4681_s1 = inlined_call_operand.vmem [shape: f32[64,64], index: 1, kind: input, shape index: {}]   ;;  %s4682_s5 = inlined_call_operand.vmem [shape: bf16[128,128], index: 5, kind: input, shape index: {}]   ;;  %s4683_s4 = inlined_call_operand.vmem [shape: f32[1,128], index: 4, kind: input, shape index: {}]   ;;  %s4684_s6 = inlined_call_operand.vmem [shape: f32[1,128], index: 6, kind: input, shape index: {}]   ;;  %s4685_s7 = inlined_call_operand.vmem [shape: f32[64,128], index: 7, kind: output, shape index: {}]  }
   0x1   :  { %v3837_v0 = vld [vmem:[%s4678_s2 + $0x28] ss:$0 sps:$4 sm:$0xff]   ;;  %v3838_v1 = vld [vmem:[%s4678_s2 + $0x20] sm:$0xff]   ;;  %v3839_v3 = vld [vmem:[%s4678_s2 + $0x18] sm:$0xff]   ;;  %v120_v44 = vunpack.c.l.s4 %v3896_v43  ;;  %vm1676_vm6 = vcmask 523264  }
   0x2   :  { %3835 = vmatprep.subr.msk.bf16.mxu0 %vm1120_vm0, %v3837_v0  ;;  %v1122_v2 = vsel %vm1120_vm0, %v3837_v0, 0  ;;  %v3843_v4 = vld [vmem:[%s4679_s0] sm:$0xff]   ;;  %v3840_v5 = vld [vmem:[%s4678_s2 + $0x10] sm:$0xff]   ;;  %v3841_v6 = vld [vmem:[%s4678_s2 + $0x8] sm:$0xff]   ;;  %v123_v47 = vshrl.u32 %v122_v45, 7 }
   0x3   :  { %3600 = vmatpush3.bf16.msra.mxu0 %v1122_v2  ;;  %3611 = vmatprep.mubr.msk.bf16.mxu0 %vm1023_vm1, %v3843_v4  ;;  %v3842_v7 = vld [vmem:[%s4678_s2] sm:$0xff]   ;;  %v3844_v8 = vld [vmem:[%s4679_s0 + $0x8] sm:$0xff]   ;;  %v3845_v9 = vld [vmem:[%s4679_s0 + $0x10] sm:$0xff]   ;;  %v121_v46 = vunpack.c.0.s8 %v120_v44 }
   0x4   :  { %3601 = vmatprep.subr.bf16.mxu0 %v3838_v1  ;;  %v3863_v10 = vld [vmem:[%s4680_s3 + $0x18] sm:$0xff]   ;;  %v3847_v12 = vld [vmem:[%s4679_s0 + $0x20] sm:$0xff]   ;;  %v3872_v13 = vld [vmem:[%s4680_s3 + $0x10] sm:$0xff]   ;;  %v4104_v57 = vsub.s32 0, %v123_v47 }
   0x5   :  { %3827 = vmatprep.subr.bf16.mxu1 %v3863_v10  ;;  %v3846_v11 = vld [vmem:[%s4679_s0 + $0x18] sm:$0xff]   ;;  %v3848_v14 = vld [vmem:[%s4679_s0 + $0x28] sm:$0xff]   ;;  %v3849_v15 = vld [vmem:[%s4679_s0 + $0x30] sm:$0xff]   ;;  %v4095_v48 = vsub.s32 %v121_v46, %v123_v47 }
   0x6   :  { %3831 = vmatpush3.bf16.msra.mxu1 %v3863_v10  ;;  %v3877_v16 = vld [vmem:[%s4680_s3 + $0x8] sm:$0xff]   ;;  %v3878_v17 = vld [vmem:[%s4680_s3] sm:$0xff]   ;;  %v3850_v18 = vld [vmem:[%s4679_s0 + $0x38] sm:$0xff]  }
   0x7   :  { %3602 = vmatpush3.bf16.msra.mxu0 %v3838_v1  ;;  %3828 = vmatprep.subr.bf16.mxu1 %v3872_v13  ;;  %v3851_v19 = vld [vmem:[%s4679_s0 + $0x40] sm:$0xff]   ;;  %v3852_v20 = vld [vmem:[%s4679_s0 + $0x48] sm:$0xff]   ;;  %v3853_v21 = vld [vmem:[%s4679_s0 + $0x50] sm:$0xff]  }
   0x8   :  { %3603 = vmatprep.subr.bf16.mxu0 %v3839_v3  ;;  %v3854_v22 = vld [vmem:[%s4679_s0 + $0x58] sm:$0xff]   ;;  %v3855_v23 = vld [vmem:[%s4679_s0 + $0x60] sm:$0xff]   ;;  %v3856_v24 = vld [vmem:[%s4679_s0 + $0x68] sm:$0xff]  }
   0x9   :  { %v3857_v25 = vld [vmem:[%s4679_s0 + $0x70] sm:$0xff]   ;;  %v3858_v26 = vld [vmem:[%s4679_s0 + $0x78] sm:$0xff]   ;;  %v3859_v27 = vld [vmem:[%s4679_s0 + $0x80] sm:$0xff]  }
   0xa   :  { %3832 = vmatpush3.bf16.msra.mxu1 %v3872_v13  ;;  %v3860_v28 = vld [vmem:[%s4679_s0 + $0x88] sm:$0xff]   ;;  %v3861_v29 = vld [vmem:[%s4679_s0 + $0x90] sm:$0xff]   ;;  %v3862_v30 = vld [vmem:[%s4679_s0 + $0x98] sm:$0xff]  }
   0xb   :  { %3604 = vmatpush3.bf16.msra.mxu0 %v3839_v3  ;;  %3829 = vmatprep.subr.bf16.mxu1 %v3877_v16  ;;  %v3864_v31 = vld [vmem:[%s4679_s0 + $0xa0] sm:$0xff]   ;;  %v3865_v32 = vld [vmem:[%s4679_s0 + $0xa8] sm:$0xff]   ;;  %v3866_v33 = vld [vmem:[%s4679_s0 + $0xb0] sm:$0xff]  }
   0xc   :  { %3605 = vmatprep.subr.bf16.mxu0 %v3840_v5  ;;  %v3867_v34 = vld [vmem:[%s4679_s0 + $0xb8] sm:$0xff]   ;;  %v3868_v35 = vld [vmem:[%s4679_s0 + $0xc0] sm:$0xff]   ;;  %v3869_v36 = vld [vmem:[%s4679_s0 + $0xc8] sm:$0xff]  }
   0xd   :  { %v3870_v37 = vld [vmem:[%s4679_s0 + $0xd0] sm:$0xff]   ;;  %v3871_v38 = vld [vmem:[%s4679_s0 + $0xd8] sm:$0xff]   ;;  %v3873_v39 = vld [vmem:[%s4679_s0 + $0xe0] sm:$0xff]  }
   0xe   :  { %3833 = vmatpush3.bf16.msra.mxu1 %v3877_v16  ;;  %v3874_v40 = vld [vmem:[%s4679_s0 + $0xe8] sm:$0xff]   ;;  %v3875_v41 = vld [vmem:[%s4679_s0 + $0xf0] sm:$0xff]   ;;  %v3876_v42 = vld [vmem:[%s4679_s0 + $0xf8] sm:$0xff]  }
   0xf   :  { %3606 = vmatpush3.bf16.msra.mxu0 %v3840_v5  ;;  %3830 = vmatprep.subr.bf16.mxu1 %v3878_v17  ;;  %v102_v49 = vld [vmem:[%s4681_s1] sm:$0xff]  ;;  %v103_v63 = vld [vmem:[%s4681_s1 + $0x8] sm:$0xff]  ;;  %v104_v44 = vld [vmem:[%s4681_s1 + $0x10] sm:$0xff] }
  0x10   :  { %3607 = vmatprep.subr.bf16.mxu0 %v3841_v6  ;;  %v125_v50 = vrot.slane %v102_v49, %v4095_v48  ;;  %v118_v52 = vcombine.high %v102_v49, %v102_v49 }
  0x12   :  { %3834 = vmatpush3.bf16.msra.mxu1 %v3878_v17  ;;  %v133_v51 = vcombine.high %v125_v50, %v125_v50  ;;  %v141_v53 = vrot.slane %v125_v50, %v4095_v48  ;;  %v132_v55 = vrot.slane %v118_v52, %v4095_v48 }
  0x13   :  { %3608 = vmatpush3.bf16.msra.mxu0 %v3841_v6  ;;  %v174_v6 = vrot.slane %v103_v63, %v4095_v48 }
  0x14   :  { %3609 = vmatprep.subr.bf16.mxu0 %v3842_v7  ;;  %v155_v54 = vrot.slane %v133_v51, %v4095_v48  ;;  %v163_v56 = vcombine.high %v141_v53, %v141_v53  ;;  %v134_v58 = vcombine.high %v132_v55, %v132_v55  ;;  %v148_v60 = vrot.slane %v132_v55, %v4095_v48 }
  0x15   :  { %v513_v62 = vrot.slane %v141_v53, %v4104_v57 }
  0x16   :  { %v165_v59 = vcombine.high %v155_v54, %v155_v54  ;;  %v521_v61 = vrot.slane %v163_v56, %v4104_v57  ;;  %v162_v1 = vrot.slane %v134_v58, %v4095_v48  ;;  %v164_v3 = vcombine.high %v148_v60, %v148_v60 }
  0x17   :  { %3610 = vmatpush3.bf16.msra.mxu0 %v3842_v7 }
  0x18   :  { %3675 = vmatprep.subr.bf16.mxu0 %v3863_v10  ;;  %v525_v2 = vrot.slane %v165_v59, %v4104_v57 }
  0x1a   :  { %3612 = vmatmul.mubr.msk.bf16.vlgmr.msra.gmra.mxu0 %vm1023_vm1, %v3844_v8  ;;  %v517_v8 = vrot.slane %v155_v54, %v4104_v57 }
  0x1b   :  { %3615 = vmatprep.mubr.msk.bf16.mxu0 %vm1023_vm1, %v3845_v9  ;;  %3676 = vmatpush3.bf16.msra.mxu0 %v3863_v10  ;;  %v166_v10 = vcombine.high %v162_v1, %v162_v1 }
  0x1c   :  { %3677 = vmatprep.subr.bf16.mxu0 %v3872_v13 }
  0x1f   :  { %3678 = vmatpush3.bf16.msra.mxu0 %v3872_v13  ;;  %v537_v13 = vrot.slane %v164_v3, %v4104_v57 }
  0x20   :  { %3679 = vmatprep.subr.bf16.mxu0 %v3877_v16 }
  0x22   :  { %3616 = vmatmul.mubr.msk.bf16.gmra.mxu0 %vm1023_vm1, %v3846_v11  ;;  %v182_v11 = vcombine.high %v174_v6, %v174_v6 }
  0x23   :  { %3619 = vmatprep.mubr.msk.bf16.mxu0 %vm1023_vm1, %v3847_v12  ;;  %3680 = vmatpush3.bf16.msra.mxu0 %v3877_v16  ;;  %v529_v16 = vrot.slane %v148_v60, %v4104_v57 }
  0x24   :  { %3681 = vmatprep.subr.bf16.mxu0 %v3878_v17 }
  0x27   :  { %3682 = vmatpush3.bf16.msra.mxu0 %v3878_v17  ;;  %v167_v17 = vcombine.high %v103_v63, %v103_v63 }
  0x2a   :  { %3620 = vmatmul.mubr.msk.bf16.gmra.mxu0 %vm1023_vm1, %v3848_v14 }
  0x2b   :  { %3623 = vmatprep.mubr.msk.bf16.mxu0 %vm1023_vm1, %v3849_v15 }
  0x32   :  { %3624 = vmatmul.mubr.msk.bf16.gmra.mxu0 %vm1023_vm1, %v3850_v18 }
  0x33   :  { %3627 = vmatprep.mubr.msk.bf16.mxu0 %vm1023_vm1, %v3851_v19 }
  0x3a   :  { %3628 = vmatmul.mubr.msk.bf16.gmra.mxu0 %vm1023_vm1, %v3852_v20 }
  0x3b   :  { %3631 = vmatprep.mubr.msk.bf16.mxu0 %vm1023_vm1, %v3853_v21 }
  0x42   :  { %3632 = vmatmul.mubr.msk.bf16.gmra.mxu0 %vm1023_vm1, %v3854_v22  ;;  %v541_v22 = vrot.slane %v166_v10, %v4104_v57 }
  0x43   :  { %3635 = vmatprep.mubr.msk.bf16.mxu0 %vm1023_vm1, %v3855_v23  ;;  %v190_v23 = vrot.slane %v174_v6, %v4095_v48 }
  0x45   :  { %v545_v47 = vrot.slane %v190_v23, %v4104_v57 }
  0x4a   :  { %3636 = vmatmul.mubr.msk.bf16.gmra.mxu0 %vm1023_vm1, %v3856_v24  ;;  %v4121_v24 = vrot.slane %v182_v11, %v4095_v48 }
  0x4b   :  { %3639 = vmatprep.mubr.msk.bf16.mxu0 %vm1023_vm1, %v3857_v25  ;;  %v4126_v25 = vld [vmem:[%s4682_s5 + $0x38] sm:$0xff]  }
  0x4c   :  { %3747 = vmatprep.subr.bf16.mxu1 %v4126_v25  ;;  %v549_v60 = vrot.slane %v4121_v24, %v4104_v57 }
  0x52   :  { %3640 = vmatmul.mubr.msk.bf16.gmra.mxu0 %vm1023_vm1, %v3858_v26 }
  0x53   :  { %3643 = vmatprep.mubr.msk.bf16.mxu0 %vm1023_vm1, %v3859_v27 }
  0x5a   :  { %3644 = vmatmul.mubr.msk.bf16.gmra.mxu0 %vm1023_vm1, %v3860_v28 }
  0x5b   :  { %3647 = vmatprep.mubr.msk.bf16.mxu0 %vm1023_vm1, %v3861_v29 }
  0x62   :  { %3648 = vmatmul.mubr.msk.bf16.gmra.mxu0 %vm1023_vm1, %v3862_v30  ;;  %v533_v30 = vrot.slane %v162_v1, %v4104_v57 }
  0x63   :  { %3651 = vmatprep.mubr.msk.bf16.mxu0 %vm1023_vm1, %v3864_v31  ;;  %v181_v31 = vrot.slane %v167_v17, %v4095_v48 }
  0x65   :  { %v183_v43 = vcombine.high %v181_v31, %v181_v31  ;;  %v197_v49 = vrot.slane %v181_v31, %v4095_v48 }
  0x67   :  { %v211_v56 = vrot.slane %v183_v43, %v4095_v48  ;;  %v213_v1 = vcombine.high %v197_v49, %v197_v49  ;;  %v561_v11 = vrot.slane %v197_v49, %v4104_v57 }
  0x6a   :  { %3652 = vmatmul.mubr.msk.bf16.gmra.mxu0 %vm1023_vm1, %v3865_v32 }
  0x6b   :  { %3655 = vmatprep.mubr.msk.bf16.mxu0 %vm1023_vm1, %v3866_v33 }
  0x72   :  { %3656 = vmatmul.mubr.msk.bf16.gmra.mxu0 %vm1023_vm1, %v3867_v34 }
  0x73   :  { %3659 = vmatprep.mubr.msk.bf16.mxu0 %vm1023_vm1, %v3868_v35 }
  0x7a   :  { %3660 = vmatmul.mubr.msk.bf16.gmra.mxu0 %vm1023_vm1, %v3869_v36 }
  0x7b   :  { %3663 = vmatprep.mubr.msk.bf16.mxu0 %vm1023_vm1, %v3870_v37 }
  0x82   :  { %3664 = vmatmul.mubr.msk.bf16.gmra.mxu0 %vm1023_vm1, %v3871_v38  ;;  %v212_v38 = vcombine.high %v190_v23, %v190_v23 }
  0x83   :  { %3667 = vmatprep.mubr.msk.bf16.mxu0 %vm1023_vm1, %v3873_v39  ;;  %v214_v39 = vcombine.high %v4121_v24, %v4121_v24 }
  0x84   :  { %v553_v52 = vrot.slane %v212_v38, %v4104_v57 }
  0x85   :  { %v557_v54 = vrot.slane %v214_v39, %v4104_v57 }
  0x8a   :  { %3668 = vmatmul.mubr.msk.bf16.gmra.mxu0 %vm1023_vm1, %v3874_v40 }
  0x8b   :  { %3671 = vmatprep.mubr.msk.bf16.mxu0 %vm1023_vm1, %v3875_v41 }
  0x92   :  { %3672 = vmatmul.mubr.msk.bf16.gmra.mxu0 %vm1023_vm1, %v3876_v42 }
  0xda   :  { %v3613_v0 = vpop.f32.mrf.mxu0 }
  0xdb   :  { %v1167_v4 = vadd.f32 %v3613_v0, %v521_v61  ;;  %v223_v61 = vrot.slane %v104_v44, %v4095_v48 }
  0xdc   :  { %v1158_v5 = vpop.f32.mrf.mxu0 }
  0xdd   :  { %v1159_v7 = vadd.f32 %v1158_v5, %v513_v62  ;;  %v1479_v14 = vmul.f32 0.2, %v1167_v4  ;;  %vm1415_vm4 = vcmp.ge.f32.partialorder %v1167_v4, 0.0  ;;  %v231_v6 = vcombine.high %v223_v61, %v223_v61 }
  0xde   :  { %v3614_v9 = vpop.f32.mrf.mxu0 }
  0xdf   :  { %v1170_v12 = vadd.f32 %v3614_v9, %v525_v2  ;;  %v1477_v18 = vmul.f32 0.2, %v1159_v7  ;;  %vm1413_vm3 = vcmp.ge.f32.partialorder %v1159_v7, 0.0  ;;  %v1543_v35 = vsel %vm1415_vm4, %v1167_v4, %v1479_v14 }
  0xe0   :  { %v1161_v15 = vpop.f32.mrf.mxu0  ;;  %v215_v9 = vcombine.high %v211_v56, %v211_v56 }
  0xe1   :  { %vm1416_vm2 = vcmp.ge.f32.partialorder %v1170_v12, 0.0  ;;  %v1480_v19 = vmul.f32 0.2, %v1170_v12  ;;  %v1162_v20 = vadd.f32 %v1161_v15, %v517_v8  ;;  %v1541_v32 = vsel %vm1413_vm3, %v1159_v7, %v1477_v18 }
  0xe2   :  { %v3617_v21 = vpop.f32.mrf.mxu0  ;;  %v569_v18 = vrot.slane %v213_v1, %v4104_v57 }
  0xe3   :  { %vm1414_vm5 = vcmp.ge.f32.partialorder %v1162_v20, 0.0  ;;  %v1478_v26 = vmul.f32 0.2, %v1162_v20  ;;  %v1183_v27 = vadd.f32 %v3617_v21, %v537_v13  ;;  %v1544_v28 = vsel %vm1416_vm2, %v1170_v12, %v1480_v19 }
  0xe4   :  { %v1174_v29 = vpop.f32.mrf.mxu0  ;;  %v1606_v40 = vpack.c.bf16 %v1544_v28, %v1543_v35  ;;  %v239_v12 = vrot.slane %v223_v61, %v4095_v48  ;;  %v216_v13 = vcombine.high %v104_v44, %v104_v44 }
  0xe5   :  { %v1542_v33 = vsel %vm1414_vm5, %v1162_v20, %v1478_v26  ;;  %v1175_v34 = vadd.f32 %v1174_v29, %v529_v16  ;;  %v1483_v41 = vmul.f32 0.2, %v1183_v27  ;;  %vm1419_vm9 = vcmp.ge.f32.partialorder %v1183_v27, 0.0 }
  0xe6   :  { %v1605_v36 = vpack.c.bf16 %v1542_v33, %v1541_v32  ;;  %v3618_v37 = vpop.f32.mrf.mxu0  ;;  %v4153_v20 = vrot.slane %v231_v6, %v4095_v48  ;;  %v565_v26 = vrot.slane %v211_v56, %v4104_v57  ;;  %v261_v31 = vcombine.high %v239_v12, %v239_v12 }
  0xe7   :  { %v1186_v42 = vadd.f32 %v3618_v37, %v541_v22  ;;  %v1481_v45 = vmul.f32 0.2, %v1175_v34  ;;  %vm1417_vm7 = vcmp.ge.f32.partialorder %v1175_v34, 0.0  ;;  %v1547_v2 = vsel %vm1419_vm9, %v1183_v27, %v1483_v41 }
  0xe8   :  { %v1177_v46 = vpop.f32.mrf.mxu0  ;;  %3683 = vmatprep.mubr.msk.bf16.mxu0 %vm1676_vm6, %v1605_v36  ;;  %v573_v22 = vrot.slane %v215_v9, %v4104_v57  ;;  %v230_v27 = vrot.slane %v216_v13, %v4095_v48  ;;  %v263_v36 = vcombine.high %v4153_v20, %v4153_v20  ;;  %v577_v41 = vrot.slane %v239_v12, %v4104_v57 }
  0xe9   :  { %vm1420_vm8 = vcmp.ge.f32.partialorder %v1186_v42, 0.0  ;;  %v1484_v50 = vmul.f32 0.2, %v1186_v42  ;;  %v1178_v51 = vadd.f32 %v1177_v46, %v533_v30  ;;  %3684 = vmatmul.mubr.msk.bf16.vlgmr.msra.gmra.mxu0 %vm1676_vm6, %v1606_v40  ;;  %v1545_v62 = vsel %vm1417_vm7, %v1175_v34, %v1481_v45  ;;  %v105_v46 = vld [vmem:[%s4681_s1 + $0x18] sm:$0xff] }
  0xea   :  { %v3621_v53 = vpop.f32.mrf.mxu0  ;;  %v232_v39 = vcombine.high %v230_v27, %v230_v27  ;;  %v585_v49 = vrot.slane %v261_v31, %v4104_v57  ;;  %v581_v56 = vrot.slane %v4153_v20, %v4104_v57 }
  0xeb   :  { %vm1418_vm10 = vcmp.ge.f32.partialorder %v1178_v51, 0.0  ;;  %v1482_v55 = vmul.f32 0.2, %v1178_v51  ;;  %v1548_v58 = vsel %vm1420_vm8, %v1186_v42, %v1484_v50  ;;  %v1199_v4 = vadd.f32 %v3621_v53, %v553_v52 }
  0xec   :  { %v1190_v59 = vpop.f32.mrf.mxu0  ;;  %v1608_v7 = vpack.c.bf16 %v1548_v58, %v1547_v2  ;;  %v246_v42 = vrot.slane %v230_v27, %v4095_v48  ;;  %v260_v53 = vrot.slane %v232_v39, %v4095_v48  ;;  %v272_v58 = vrot.slane %v105_v46, %v4095_v48 }
  0xed   :  { %v1546_v63 = vsel %vm1418_vm10, %v1178_v51, %v1482_v55  ;;  %v1191_v0 = vadd.f32 %v1190_v59, %v545_v47  ;;  %v1487_v17 = vmul.f32 0.2, %v1199_v4  ;;  %vm1423_vm13 = vcmp.ge.f32.partialorder %v1199_v4, 0.0 }
  0xee   :  { %v1607_v3 = vpack.c.bf16 %v1546_v63, %v1545_v62  ;;  %v3622_v5 = vpop.f32.mrf.mxu0  ;;  %v589_v51 = vrot.slane %v263_v36, %v4104_v57  ;;  %v262_v62 = vcombine.high %v246_v42, %v246_v42  ;;  %v264_v6 = vcombine.high %v260_v53, %v260_v53 }
  0xef   :  { %v1202_v8 = vadd.f32 %v3622_v5, %v557_v54  ;;  %v1485_v14 = vmul.f32 0.2, %v1191_v0  ;;  %vm1421_vm12 = vcmp.ge.f32.partialorder %v1191_v0, 0.0  ;;  %v1551_v32 = vsel %vm1423_vm13, %v1199_v4, %v1487_v17 }
  0xf0   :  { %v1193_v10 = vpop.f32.mrf.mxu0  ;;  %3687 = vmatprep.mubr.msk.bf16.mxu0 %vm1676_vm6, %v1607_v3  ;;  %v280_v3 = vcombine.high %v272_v58, %v272_v58  ;;  %v288_v9 = vrot.slane %v272_v58, %v4095_v48 }
  0xf1   :  { %vm1424_vm11 = vcmp.ge.f32.partialorder %v1202_v8, 0.0  ;;  %v1488_v15 = vmul.f32 0.2, %v1202_v8  ;;  %v1194_v16 = vadd.f32 %v1193_v10, %v549_v60  ;;  %3688 = vmatmul.mubr.msk.bf16.gmra.mxu0 %vm1676_vm6, %v1608_v7  ;;  %v1549_v28 = vsel %vm1421_vm12, %v1191_v0, %v1485_v14 }
  0xf2   :  { %v3625_v19 = vpop.f32.mrf.mxu0  ;;  %v265_v10 = vcombine.high %v105_v46, %v105_v46  ;;  %v4179_v17 = vrot.slane %v280_v3, %v4095_v48 }
  0xf3   :  { %vm1422_vm14 = vcmp.ge.f32.partialorder %v1194_v16, 0.0  ;;  %v1486_v21 = vmul.f32 0.2, %v1194_v16  ;;  %v1552_v23 = vsel %vm1424_vm11, %v1202_v8, %v1488_v15  ;;  %v1215_v34 = vadd.f32 %v3625_v19, %v569_v18 }
  0xf4   :  { %v1206_v24 = vpop.f32.mrf.mxu0  ;;  %v1610_v37 = vpack.c.bf16 %v1552_v23, %v1551_v32  ;;  %v593_v8 = vrot.slane %v246_v42, %v4104_v57  ;;  %v601_v15 = vrot.slane %v262_v62, %v4104_v57  ;;  %v605_v19 = vrot.slane %v264_v6, %v4104_v57 }
  0xf5   :  { %v1550_v29 = vsel %vm1422_vm14, %v1194_v16, %v1486_v21  ;;  %v1207_v30 = vadd.f32 %v1206_v24, %v561_v11  ;;  %v1491_v47 = vmul.f32 0.2, %v1215_v34  ;;  %vm1427_vm1 = vcmp.ge.f32.partialorder %v1215_v34, 0.0 }
  0xf6   :  { %v1609_v33 = vpack.c.bf16 %v1550_v29, %v1549_v28  ;;  %v3626_v35 = vpop.f32.mrf.mxu0  ;;  %v279_v23 = vrot.slane %v265_v10, %v4095_v48  ;;  %v310_v28 = vcombine.high %v288_v9, %v288_v9 }
  0xf7   :  { %v1218_v38 = vadd.f32 %v3626_v35, %v573_v22  ;;  %v1489_v43 = vmul.f32 0.2, %v1207_v30  ;;  %vm1425_vm0 = vcmp.ge.f32.partialorder %v1207_v30, 0.0  ;;  %v1555_v63 = vsel %vm1427_vm1, %v1215_v34, %v1491_v47 }
  0xf8   :  { %v1209_v40 = vpop.f32.mrf.mxu0  ;;  %3691 = vmatprep.mubr.msk.bf16.mxu0 %vm1676_vm6, %v1609_v33  ;;  %v597_v22 = vrot.slane %v260_v53, %v4104_v57  ;;  %v312_v33 = vcombine.high %v4179_v17, %v4179_v17  ;;  %v281_v36 = vcombine.high %v279_v23, %v279_v23  ;;  %v295_v39 = vrot.slane %v279_v23, %v4095_v48 }
  0xf9   :  { %vm1428_vm15 = vcmp.ge.f32.partialorder %v1218_v38, 0.0  ;;  %v1492_v44 = vmul.f32 0.2, %v1218_v38  ;;  %v1210_v45 = vadd.f32 %v1209_v40, %v565_v26  ;;  %3692 = vmatmul.mubr.msk.bf16.gmra.mxu0 %vm1676_vm6, %v1610_v37  ;;  %v1553_v59 = vsel %vm1425_vm0, %v1207_v30, %v1489_v43  ;;  %v106_v43 = vld [vmem:[%s4681_s1 + $0x20] sm:$0xff] }
  0xfa   :  { %v3629_v50 = vpop.f32.mrf.mxu0  ;;  %v621_v47 = vrot.slane %v312_v33, %v4104_v57  ;;  %v613_v53 = vrot.slane %v4179_v17, %v4104_v57 }
  0xfb   :  { %vm1426_vm2 = vcmp.ge.f32.partialorder %v1210_v45, 0.0  ;;  %v1490_v52 = vmul.f32 0.2, %v1210_v45  ;;  %v1556_v54 = vsel %vm1428_vm15, %v1218_v38, %v1492_v44  ;;  %v1231_v1 = vadd.f32 %v3629_v50, %v585_v49 }
  0xfc   :  { %v1222_v55 = vpop.f32.mrf.mxu0  ;;  %v1612_v4 = vpack.c.bf16 %v1556_v54, %v1555_v63  ;;  %v609_v38 = vrot.slane %v288_v9, %v4104_v57  ;;  %v309_v50 = vrot.slane %v281_v36, %v4095_v48  ;;  %v321_v54 = vrot.slane %v106_v43, %v4095_v48 }
  0xfd   :  { %v1554_v60 = vsel %vm1426_vm2, %v1210_v45, %v1490_v52  ;;  %v1223_v61 = vadd.f32 %v1222_v55, %v577_v41  ;;  %v1495_v14 = vmul.f32 0.2, %v1231_v1  ;;  %vm1431_vm5 = vcmp.ge.f32.partialorder %v1231_v1, 0.0 }
  0xfe   :  { %v1611_v0 = vpack.c.bf16 %v1554_v60, %v1553_v59  ;;  %v3630_v2 = vpop.f32.mrf.mxu0  ;;  %v617_v45 = vrot.slane %v310_v28, %v4104_v57  ;;  %v311_v59 = vcombine.high %v295_v39, %v295_v39  ;;  %v313_v3 = vcombine.high %v309_v50, %v309_v50 }
  0xff   :  { %v1234_v5 = vadd.f32 %v3630_v2, %v589_v51  ;;  %v1493_v11 = vmul.f32 0.2, %v1223_v61  ;;  %vm1429_vm4 = vcmp.ge.f32.partialorder %v1223_v61, 0.0  ;;  %v1559_v29 = vsel %vm1431_vm5, %v1231_v1, %v1495_v14 }
 0x100   :  { %v1225_v7 = vpop.f32.mrf.mxu0  ;;  %3695 = vmatprep.mubr.msk.bf16.mxu0 %vm1676_vm6, %v1611_v0  ;;  %v329_v0 = vcombine.high %v321_v54, %v321_v54  ;;  %v337_v6 = vrot.slane %v321_v54, %v4095_v48 }
 0x101   :  { %vm1432_vm3 = vcmp.ge.f32.partialorder %v1234_v5, 0.0  ;;  %v1496_v12 = vmul.f32 0.2, %v1234_v5  ;;  %v1226_v13 = vadd.f32 %v1225_v7, %v581_v56  ;;  %3696 = vmatmul.mubr.msk.bf16.gmra.mxu0 %vm1676_vm6, %v1612_v4  ;;  %v1557_v24 = vsel %vm1429_vm4, %v1223_v61, %v1493_v11 }
 0x102   :  { %v3633_v16 = vpop.f32.mrf.mxu0  ;;  %v314_v7 = vcombine.high %v106_v43, %v106_v43  ;;  %v4205_v14 = vrot.slane %v329_v0, %v4095_v48 }
 0x103   :  { %vm1430_vm7 = vcmp.ge.f32.partialorder %v1226_v13, 0.0  ;;  %v1494_v18 = vmul.f32 0.2, %v1226_v13  ;;  %v1560_v20 = vsel %vm1432_vm3, %v1234_v5, %v1496_v12  ;;  %v1247_v31 = vadd.f32 %v3633_v16, %v601_v15 }
 0x104   :  { %v1238_v21 = vpop.f32.mrf.mxu0  ;;  %v1614_v34 = vpack.c.bf16 %v1560_v20, %v1559_v29  ;;  %v625_v5 = vrot.slane %v295_v39, %v4104_v57  ;;  %v633_v12 = vrot.slane %v311_v59, %v4104_v57  ;;  %v637_v16 = vrot.slane %v313_v3, %v4104_v57 }
 0x105   :  { %v1558_v26 = vsel %vm1430_vm7, %v1226_v13, %v1494_v18  ;;  %v1239_v27 = vadd.f32 %v1238_v21, %v593_v8  ;;  %v1499_v44 = vmul.f32 0.2, %v1247_v31  ;;  %vm1435_vm10 = vcmp.ge.f32.partialorder %v1247_v31, 0.0 }
 0x106   :  { %v1613_v30 = vpack.c.bf16 %v1558_v26, %v1557_v24  ;;  %v3634_v32 = vpop.f32.mrf.mxu0  ;;  %v328_v20 = vrot.slane %v314_v7, %v4095_v48  ;;  %v359_v24 = vcombine.high %v337_v6, %v337_v6 }
 0x107   :  { %v1250_v35 = vadd.f32 %v3634_v32, %v605_v19  ;;  %v1497_v40 = vmul.f32 0.2, %v1239_v27  ;;  %vm1433_vm9 = vcmp.ge.f32.partialorder %v1239_v27, 0.0  ;;  %v1563_v60 = vsel %vm1435_vm10, %v1247_v31, %v1499_v44 }
 0x108   :  { %v1241_v37 = vpop.f32.mrf.mxu0  ;;  %3699 = vmatprep.mubr.msk.bf16.mxu0 %vm1676_vm6, %v1613_v30  ;;  %v629_v19 = vrot.slane %v309_v50, %v4104_v57  ;;  %v361_v30 = vcombine.high %v4205_v14, %v4205_v14  ;;  %v330_v33 = vcombine.high %v328_v20, %v328_v20  ;;  %v344_v36 = vrot.slane %v328_v20, %v4095_v48 }
 0x109   :  { %vm1436_vm8 = vcmp.ge.f32.partialorder %v1250_v35, 0.0  ;;  %v1500_v41 = vmul.f32 0.2, %v1250_v35  ;;  %v1242_v42 = vadd.f32 %v1241_v37, %v597_v22  ;;  %3700 = vmatmul.mubr.msk.bf16.gmra.mxu0 %vm1676_vm6, %v1614_v34  ;;  %v1561_v55 = vsel %vm1433_vm9, %v1239_v27, %v1497_v40  ;;  %v107_v40 = vld [vmem:[%s4681_s1 + $0x28] sm:$0xff] }
 0x10a   :  { %v3637_v46 = vpop.f32.mrf.mxu0  ;;  %v653_v44 = vrot.slane %v361_v30, %v4104_v57  ;;  %v645_v50 = vrot.slane %v4205_v14, %v4104_v57  ;;  %v657_v3 = vrot.slane %v344_v36, %v4104_v57 }
 0x10b   :  { %vm1434_vm11 = vcmp.ge.f32.partialorder %v1242_v42, 0.0  ;;  %v1498_v49 = vmul.f32 0.2, %v1242_v42  ;;  %v1564_v51 = vsel %vm1436_vm8, %v1250_v35, %v1500_v41  ;;  %v1263_v62 = vadd.f32 %v3637_v46, %v617_v45 }
 0x10c   :  { %v1254_v52 = vpop.f32.mrf.mxu0  ;;  %v1616_v1 = vpack.c.bf16 %v1564_v51, %v1563_v60  ;;  %v641_v35 = vrot.slane %v337_v6, %v4104_v57  ;;  %v4222_v46 = vrot.slane %v330_v33, %v4095_v48  ;;  %v370_v51 = vrot.slane %v107_v40, %v4095_v48 }
 0x10d   :  { %v1562_v56 = vsel %vm1434_vm11, %v1242_v42, %v1498_v49  ;;  %v1255_v58 = vadd.f32 %v1254_v52, %v609_v38  ;;  %v1503_v11 = vmul.f32 0.2, %v1263_v62  ;;  %vm1439_vm14 = vcmp.ge.f32.partialorder %v1263_v62, 0.0 }
 0x10e   :  { %v1615_v61 = vpack.c.bf16 %v1562_v56, %v1561_v55  ;;  %v3638_v63 = vpop.f32.mrf.mxu0  ;;  %v649_v42 = vrot.slane %v359_v24, %v4104_v57  ;;  %v360_v55 = vcombine.high %v344_v36, %v344_v36  ;;  %v362_v0 = vcombine.high %v4222_v46, %v4222_v46 }
 0x10f   :  { %v1266_v2 = vadd.f32 %v3638_v63, %v621_v47  ;;  %v1501_v8 = vmul.f32 0.2, %v1255_v58  ;;  %vm1437_vm13 = vcmp.ge.f32.partialorder %v1255_v58, 0.0  ;;  %v1567_v26 = vsel %vm1439_vm14, %v1263_v62, %v1503_v11 }
 0x110   :  { %v1257_v4 = vpop.f32.mrf.mxu0  ;;  %3703 = vmatprep.mubr.msk.bf16.mxu0 %vm1676_vm6, %v1615_v61  ;;  %v378_v61 = vcombine.high %v370_v51, %v370_v51  ;;  %v669_v14 = vrot.slane %v362_v0, %v4104_v57 }
 0x111   :  { %vm1440_vm12 = vcmp.ge.f32.partialorder %v1266_v2, 0.0  ;;  %v1504_v9 = vmul.f32 0.2, %v1266_v2  ;;  %v1258_v10 = vadd.f32 %v1257_v4, %v613_v53  ;;  %3704 = vmatmul.mubr.msk.bf16.gmra.mxu0 %vm1676_vm6, %v1616_v1  ;;  %v1565_v21 = vsel %vm1437_vm13, %v1255_v58, %v1501_v8  ;;  %v3888_v1 = vld [vmem:[%s4682_s5 + $0x30] sm:$0xff]  }
 0x112   :  { %v3641_v13 = vpop.f32.mrf.mxu0  ;;  %v4235_v4 = vrot.slane %v370_v51, %v4095_v48 }
 0x113   :  { %vm1438_vm15 = vcmp.ge.f32.partialorder %v1258_v10, 0.0  ;;  %v1502_v15 = vmul.f32 0.2, %v1258_v10  ;;  %v1568_v17 = vsel %vm1440_vm12, %v1266_v2, %v1504_v9  ;;  %v1279_v28 = vadd.f32 %v3641_v13, %v633_v12 }
 0x114   :  { %v1270_v18 = vpop.f32.mrf.mxu0  ;;  %v1618_v31 = vpack.c.bf16 %v1568_v17, %v1567_v26  ;;  %v4240_v12 = vrot.slane %v378_v61, %v4095_v48 }
 0x115   :  { %v1566_v22 = vsel %vm1438_vm15, %v1258_v10, %v1502_v15  ;;  %v1271_v23 = vadd.f32 %v1270_v18, %v625_v5  ;;  %v1507_v41 = vmul.f32 0.2, %v1279_v28  ;;  %vm1443_vm2 = vcmp.ge.f32.partialorder %v1279_v28, 0.0  ;;  %v3889_v15 = vld [vmem:[%s4682_s5 + $0x28] sm:$0xff]  }
 0x116   :  { %v1617_v27 = vpack.c.bf16 %v1566_v22, %v1565_v21  ;;  %v3642_v29 = vpop.f32.mrf.mxu0  ;;  %v363_v5 = vcombine.high %v107_v40, %v107_v40  ;;  %v665_v10 = vrot.slane %v360_v55, %v4104_v57  ;;  %v661_v18 = vrot.slane %v4222_v46, %v4104_v57  ;;  %v3891_v46 = vld [vmem:[%s4682_s5 + $0x18] sm:$0xff]  }
 0x117   :  { %v1282_v32 = vadd.f32 %v3642_v29, %v637_v16  ;;  %v1505_v37 = vmul.f32 0.2, %v1271_v23  ;;  %vm1441_vm1 = vcmp.ge.f32.partialorder %v1271_v23, 0.0  ;;  %v1571_v56 = vsel %vm1443_vm2, %v1279_v28, %v1507_v41 }
 0x118   :  { %v1273_v34 = vpop.f32.mrf.mxu0  ;;  %3707 = vmatprep.mubr.msk.bf16.mxu0 %vm1676_vm6, %v1617_v27  ;;  %v408_v22 = vcombine.high %v4235_v4, %v4235_v4  ;;  %v410_v28 = vcombine.high %v4240_v12, %v4240_v12 }
 0x119   :  { %vm1444_vm0 = vcmp.ge.f32.partialorder %v1282_v32, 0.0  ;;  %v1508_v38 = vmul.f32 0.2, %v1282_v32  ;;  %v1274_v39 = vadd.f32 %v1273_v34, %v629_v19  ;;  %3708 = vmatmul.mubr.msk.bf16.gmra.mxu0 %vm1676_vm6, %v1618_v31  ;;  %v1569_v53 = vsel %vm1441_vm1, %v1271_v23, %v1505_v37 }
 0x11a   :  { %v3645_v43 = vpop.f32.mrf.mxu0  ;;  %v377_v19 = vrot.slane %v363_v5, %v4095_v48  ;;  %v673_v34 = vrot.slane %v4235_v4, %v4104_v57  ;;  %v681_v41 = vrot.slane %v408_v22, %v4104_v57 }
 0x11b   :  { %v1506_v45 = vmul.f32 0.2, %v1274_v39  ;;  %vm1442_vm3 = vcmp.ge.f32.partialorder %v1274_v39, 0.0  ;;  %v1572_v47 = vsel %vm1444_vm0, %v1282_v32, %v1508_v38  ;;  %v1295_v58 = vadd.f32 %v3645_v43, %v649_v42  ;;  %v3890_v32 = vld [vmem:[%s4682_s5 + $0x20] sm:$0xff]  }
 0x11c   :  { %v1286_v49 = vpop.f32.mrf.mxu0  ;;  %v1620_v62 = vpack.c.bf16 %v1572_v47, %v1571_v56  ;;  %v379_v31 = vcombine.high %v377_v19, %v377_v19  ;;  %v685_v43 = vrot.slane %v410_v28, %v4104_v57 }
 0x11d   :  { %v1287_v52 = vadd.f32 %v1286_v49, %v641_v35  ;;  %v1570_v54 = vsel %vm1442_vm3, %v1274_v39, %v1506_v45  ;;  %v1511_v9 = vmul.f32 0.2, %v1295_v58  ;;  %vm1447_vm7 = vcmp.ge.f32.partialorder %v1295_v58, 0.0  ;;  %v108_v39 = vld [vmem:[%s4681_s1 + $0x30] sm:$0xff] }
 0x11e   :  { %v3646_v59 = vpop.f32.mrf.mxu0  ;;  %v1619_v60 = vpack.c.bf16 %v1570_v54, %v1569_v53  ;;  %v4262_v35 = vrot.slane %v377_v19, %v4095_v48  ;;  %v4271_v45 = vrot.slane %v379_v31, %v4095_v48  ;;  %v419_v51 = vrot.slane %v108_v39, %v4095_v48 }
 0x11f   :  { %v1298_v63 = vadd.f32 %v3646_v59, %v653_v44  ;;  %v1509_v6 = vmul.f32 0.2, %v1287_v52  ;;  %vm1445_vm5 = vcmp.ge.f32.partialorder %v1287_v52, 0.0  ;;  %v1575_v23 = vsel %vm1447_vm7, %v1295_v58, %v1511_v9 }
 0x120   :  { %v1289_v2 = vpop.f32.mrf.mxu0  ;;  %3711 = vmatprep.mubr.msk.bf16.mxu1 %vm1676_vm6, %v1619_v60  ;;  %v409_v55 = vcombine.high %v4262_v35, %v4262_v35  ;;  %v427_v61 = vcombine.high %v419_v51, %v419_v51  ;;  %v411_v0 = vcombine.high %v4271_v45, %v4271_v45  ;;  %v4291_v4 = vrot.slane %v419_v51, %v4095_v48 }
 0x121   :  { %vm1448_vm4 = vcmp.ge.f32.partialorder %v1298_v63, 0.0  ;;  %v1512_v7 = vmul.f32 0.2, %v1298_v63  ;;  %v1290_v8 = vadd.f32 %v1289_v2, %v645_v50  ;;  %3712 = vmatmul.mubr.msk.bf16.vlgmr.msra.gmra.mxu1 %vm1676_vm6, %v1620_v62  ;;  %v1573_v20 = vsel %vm1445_vm5, %v1287_v52, %v1509_v6 }
 0x122   :  { %v3649_v11 = vpop.f32.mrf.mxu0  ;;  %3748 = vmatpush3.bf16.msra.mxu1 %v4126_v25  ;;  %v677_v50 = vrot.slane %v4240_v12, %v4104_v57  ;;  %v412_v5 = vcombine.high %v108_v39, %v108_v39  ;;  %v4296_v12 = vrot.slane %v427_v61, %v4095_v48  ;;  %v457_v22 = vcombine.high %v4291_v4, %v4291_v4  ;;  %v109_v39 = vld [vmem:[%s4681_s1 + $0x38] sm:$0xff] }
 0x123   :  { %vm1446_vm8 = vcmp.ge.f32.partialorder %v1290_v8, 0.0  ;;  %v1510_v13 = vmul.f32 0.2, %v1290_v8  ;;  %3749 = vmatprep.subr.bf16.mxu1 %v3888_v1  ;;  %v1576_v16 = vsel %vm1448_vm4, %v1298_v63, %v1512_v7  ;;  %v1311_v26 = vadd.f32 %v3649_v11, %v665_v10 }
 0x124   :  { %v1302_v17 = vpop.f32.mrf.mxu0  ;;  %v1622_v29 = vpack.c.bf16 %v1576_v16, %v1575_v23  ;;  %v697_v10 = vrot.slane %v409_v55, %v4104_v57  ;;  %v426_v19 = vrot.slane %v412_v5, %v4095_v48  ;;  %v459_v28 = vcombine.high %v4296_v12, %v4296_v12 }
 0x125   :  { %v1574_v25 = vsel %vm1446_vm8, %v1290_v8, %v1510_v13  ;;  %v1303_v21 = vadd.f32 %v1302_v17, %v657_v3  ;;  %v1515_v40 = vmul.f32 0.2, %v1311_v26  ;;  %vm1451_vm11 = vcmp.ge.f32.partialorder %v1311_v26, 0.0 }
 0x126   :  { %v1621_v24 = vpack.c.bf16 %v1574_v25, %v1573_v20  ;;  %v3650_v27 = vpop.f32.mrf.mxu0  ;;  %3750 = vmatpush3.bf16.msra.mxu1 %v3888_v1  ;;  %v3892_v1 = vld [vmem:[%s4682_s5 + $0x10] sm:$0xff]   ;;  %v689_v3 = vrot.slane %v4262_v35, %v4104_v57  ;;  %v428_v31 = vcombine.high %v426_v19, %v426_v19  ;;  %v442_v35 = vrot.slane %v426_v19, %v4095_v48 }
 0x127   :  { %v1314_v30 = vadd.f32 %v3650_v27, %v669_v14  ;;  %3751 = vmatprep.subr.bf16.mxu1 %v3889_v15  ;;  %v1513_v36 = vmul.f32 0.2, %v1303_v21  ;;  %vm1449_vm10 = vcmp.ge.f32.partialorder %v1303_v21, 0.0  ;;  %v1579_v56 = vsel %vm1451_vm11, %v1311_v26, %v1515_v40 }
 0x128   :  { %v1305_v33 = vpop.f32.mrf.mxu0  ;;  %3715 = vmatprep.mubr.msk.bf16.mxu1 %vm1676_vm6, %v1621_v24  ;;  %v701_v14 = vrot.slane %v411_v0, %v4104_v57 }
 0x129   :  { %vm1452_vm9 = vcmp.ge.f32.partialorder %v1314_v30, 0.0  ;;  %v1516_v37 = vmul.f32 0.2, %v1314_v30  ;;  %v1306_v38 = vadd.f32 %v1305_v33, %v661_v18  ;;  %3716 = vmatmul.mubr.msk.bf16.gmra.mxu1 %vm1676_vm6, %v1622_v29  ;;  %v1577_v52 = vsel %vm1449_vm10, %v1303_v21, %v1513_v36 }
 0x12a   :  { %v3653_v42 = vpop.f32.mrf.mxu0  ;;  %3752 = vmatpush3.bf16.msra.mxu1 %v3889_v15  ;;  %v3893_v15 = vld [vmem:[%s4682_s5 + $0x8] sm:$0xff]   ;;  %v693_v18 = vrot.slane %v4271_v45, %v4104_v57  ;;  %v456_v45 = vrot.slane %v428_v31, %v4095_v48 }
 0x12b   :  { %vm1450_vm12 = vcmp.ge.f32.partialorder %v1306_v38, 0.0  ;;  %v1514_v44 = vmul.f32 0.2, %v1306_v38  ;;  %3753 = vmatprep.subr.bf16.mxu1 %v3890_v32  ;;  %v1580_v47 = vsel %vm1452_vm9, %v1314_v30, %v1516_v37  ;;  %v1327_v59 = vadd.f32 %v3653_v42, %v681_v41 }
 0x12c   :  { %v1318_v49 = vpop.f32.mrf.mxu0  ;;  %v1624_v62 = vpack.c.bf16 %v1580_v47, %v1579_v56  ;;  %v713_v41 = vrot.slane %v457_v22, %v4104_v57 }
 0x12d   :  { %v1578_v53 = vsel %vm1450_vm12, %v1306_v38, %v1514_v44  ;;  %v1319_v54 = vadd.f32 %v1318_v49, %v673_v34  ;;  %v1519_v9 = vmul.f32 0.2, %v1327_v59  ;;  %vm1455_vm15 = vcmp.ge.f32.partialorder %v1327_v59, 0.0 }
 0x12e   :  { %v1623_v58 = vpack.c.bf16 %v1578_v53, %v1577_v52  ;;  %v3654_v60 = vpop.f32.mrf.mxu0  ;;  %3754 = vmatpush3.bf16.msra.mxu1 %v3890_v32  ;;  %v3894_v32 = vld [vmem:[%s4682_s5] sm:$0xff]   ;;  %v705_v34 = vrot.slane %v4291_v4, %v4104_v57  ;;  %v709_v49 = vrot.slane %v4296_v12, %v4104_v57 }
 0x12f   :  { %v1330_v63 = vadd.f32 %v3654_v60, %v685_v43  ;;  %3755 = vmatprep.subr.bf16.mxu1 %v3891_v46  ;;  %v1517_v6 = vmul.f32 0.2, %v1319_v54  ;;  %vm1453_vm14 = vcmp.ge.f32.partialorder %v1319_v54, 0.0  ;;  %v1583_v23 = vsel %vm1455_vm15, %v1327_v59, %v1519_v9 }
 0x130   :  { %v1321_v2 = vpop.f32.mrf.mxu0  ;;  %3719 = vmatprep.mubr.msk.bf16.mxu1 %vm1676_vm6, %v1623_v58  ;;  %v717_v43 = vrot.slane %v459_v28, %v4104_v57 }
 0x131   :  { %vm1456_vm13 = vcmp.ge.f32.partialorder %v1330_v63, 0.0  ;;  %v1520_v7 = vmul.f32 0.2, %v1330_v63  ;;  %v1322_v8 = vadd.f32 %v1321_v2, %v677_v50  ;;  %3720 = vmatmul.mubr.msk.bf16.gmra.mxu1 %vm1676_vm6, %v1624_v62  ;;  %v1581_v20 = vsel %vm1453_vm14, %v1319_v54, %v1517_v6 }
 0x132   :  { %v3657_v11 = vpop.f32.mrf.mxu0  ;;  %3756 = vmatpush3.bf16.msra.mxu1 %v3891_v46  ;;  %v468_v50 = vrot.slane %v109_v39, %v4095_v48  ;;  %v458_v54 = vcombine.high %v442_v35, %v442_v35 }
 0x133   :  { %vm1454_vm0 = vcmp.ge.f32.partialorder %v1322_v8, 0.0  ;;  %v1518_v13 = vmul.f32 0.2, %v1322_v8  ;;  %3757 = vmatprep.subr.bf16.mxu1 %v3892_v1  ;;  %v1584_v16 = vsel %vm1456_vm13, %v1330_v63, %v1520_v7  ;;  %v1343_v26 = vadd.f32 %v3657_v11, %v697_v10 }
 0x134   :  { %v1334_v17 = vpop.f32.mrf.mxu0  ;;  %v1626_v29 = vpack.c.bf16 %v1584_v16, %v1583_v23  ;;  %v476_v60 = vcombine.high %v468_v50, %v468_v50  ;;  %v460_v63 = vcombine.high %v456_v45, %v456_v45  ;;  %v484_v2 = vrot.slane %v468_v50, %v4095_v48 }
 0x135   :  { %v1582_v25 = vsel %vm1454_vm0, %v1322_v8, %v1518_v13  ;;  %v1335_v21 = vadd.f32 %v1334_v17, %v689_v3  ;;  %v1523_v40 = vmul.f32 0.2, %v1343_v26  ;;  %vm1459_vm3 = vcmp.ge.f32.partialorder %v1343_v26, 0.0 }
 0x136   :  { %v1625_v24 = vpack.c.bf16 %v1582_v25, %v1581_v20  ;;  %v3658_v27 = vpop.f32.mrf.mxu0  ;;  %3758 = vmatpush3.bf16.msra.mxu1 %v3892_v1  ;;  %v721_v1 = vrot.slane %v442_v35, %v4104_v57  ;;  %v461_v3 = vcombine.high %v109_v39, %v109_v39  ;;  %v729_v8 = vrot.slane %v458_v54, %v4104_v57 }
 0x137   :  { %v1346_v30 = vadd.f32 %v3658_v27, %v701_v14  ;;  %3759 = vmatprep.subr.bf16.mxu1 %v3893_v15  ;;  %v1521_v36 = vmul.f32 0.2, %v1335_v21  ;;  %vm1457_vm2 = vcmp.ge.f32.partialorder %v1335_v21, 0.0  ;;  %v1587_v55 = vsel %vm1459_vm3, %v1343_v26, %v1523_v40 }
 0x138   :  { %v1337_v33 = vpop.f32.mrf.mxu0  ;;  %3723 = vmatprep.mubr.msk.bf16.mxu1 %vm1676_vm6, %v1625_v24  ;;  %v498_v10 = vrot.slane %v476_v60, %v4095_v48  ;;  %v733_v12 = vrot.slane %v460_v63, %v4104_v57  ;;  %v506_v16 = vcombine.high %v484_v2, %v484_v2  ;;  %v475_v20 = vrot.slane %v461_v3, %v4095_v48 }
 0x139   :  { %vm1460_vm1 = vcmp.ge.f32.partialorder %v1346_v30, 0.0  ;;  %v1524_v37 = vmul.f32 0.2, %v1346_v30  ;;  %v1338_v38 = vadd.f32 %v1337_v33, %v693_v18  ;;  %3724 = vmatmul.mubr.msk.bf16.gmra.mxu1 %vm1676_vm6, %v1626_v29  ;;  %v1585_v51 = vsel %vm1457_vm2, %v1335_v21, %v1521_v36 }
 0x13a   :  { %v3661_v42 = vpop.f32.mrf.mxu0  ;;  %3760 = vmatpush3.bf16.msra.mxu1 %v3893_v15  ;;  %v725_v15 = vrot.slane %v456_v45, %v4104_v57  ;;  %v508_v24 = vcombine.high %v498_v10, %v498_v10  ;;  %v477_v28 = vcombine.high %v475_v20, %v475_v20  ;;  %v737_v31 = vrot.slane %v484_v2, %v4104_v57 }
 0x13b   :  { %vm1458_vm4 = vcmp.ge.f32.partialorder %v1338_v38, 0.0  ;;  %v1522_v44 = vmul.f32 0.2, %v1338_v38  ;;  %3761 = vmatprep.subr.bf16.mxu1 %v3894_v32  ;;  %v1588_v46 = vsel %vm1460_vm1, %v1346_v30, %v1524_v37  ;;  %v1359_v58 = vadd.f32 %v3661_v42, %v713_v41 }
 0x13c   :  { %v1350_v47 = vpop.f32.mrf.mxu0  ;;  %v1628_v61 = vpack.c.bf16 %v1588_v46, %v1587_v55  ;;  %v745_v30 = vrot.slane %v506_v16, %v4104_v57  ;;  %v749_v37 = vrot.slane %v508_v24, %v4104_v57  ;;  %v505_v40 = vrot.slane %v477_v28, %v4095_v48 }
 0x13d   :  { %v1586_v52 = vsel %vm1458_vm4, %v1338_v38, %v1522_v44  ;;  %v1351_v53 = vadd.f32 %v1350_v47, %v705_v34  ;;  %v1527_v7 = vmul.f32 0.2, %v1359_v58  ;;  %vm1463_vm8 = vcmp.ge.f32.partialorder %v1359_v58, 0.0 }
 0x13e   :  { %v1627_v56 = vpack.c.bf16 %v1586_v52, %v1585_v51  ;;  %v3662_v59 = vpop.f32.mrf.mxu0  ;;  %3762 = vmatpush3.bf16.msra.mxu1 %v3894_v32  ;;  %v491_v38 = vrot.slane %v475_v20, %v4095_v48  ;;  %v741_v46 = vrot.slane %v498_v10, %v4104_v57  ;;  %v509_v55 = vcombine.high %v505_v40, %v505_v40 }
 0x13f   :  { %v1362_v62 = vadd.f32 %v3662_v59, %v717_v43  ;;  %v1525_v4 = vmul.f32 0.2, %v1351_v53  ;;  %vm1461_vm7 = vcmp.ge.f32.partialorder %v1351_v53, 0.0  ;;  %v1591_v25 = vsel %vm1463_vm8, %v1359_v58, %v1527_v7 }
 0x140   :  { %v1353_v0 = vpop.f32.mrf.mxu0  ;;  %3727 = vmatprep.mubr.msk.bf16.mxu1 %vm1676_vm6, %v1627_v56  ;;  %v507_v52 = vcombine.high %v491_v38, %v491_v38  ;;  %v753_v48 = vrot.slane %v491_v38, %v4104_v57  ;;  %v757_v7 = vrot.slane %v505_v40, %v4104_v57 }
 0x141   :  { %vm1464_vm5 = vcmp.ge.f32.partialorder %v1362_v62, 0.0  ;;  %v1528_v5 = vmul.f32 0.2, %v1362_v62  ;;  %v1354_v6 = vadd.f32 %v1353_v0, %v709_v49  ;;  %3728 = vmatmul.mubr.msk.bf16.gmra.mxu1 %vm1676_vm6, %v1628_v61  ;;  %v1589_v17 = vsel %vm1461_vm7, %v1351_v53, %v1525_v4 }
 0x142   :  { %v3665_v9 = vpop.f32.mrf.mxu0 }
 0x143   :  { %vm1462_vm9 = vcmp.ge.f32.partialorder %v1354_v6, 0.0  ;;  %v1526_v11 = vmul.f32 0.2, %v1354_v6  ;;  %v1592_v13 = vsel %vm1464_vm5, %v1362_v62, %v1528_v5  ;;  %v1375_v22 = vadd.f32 %v3665_v9, %v729_v8 }
 0x144   :  { %v1366_v14 = vpop.f32.mrf.mxu0  ;;  %v1630_v26 = vpack.c.bf16 %v1592_v13, %v1591_v25  ;;  %v761_v62 = vrot.slane %v507_v52, %v4104_v57 }
 0x145   :  { %v1590_v18 = vsel %vm1462_vm9, %v1354_v6, %v1526_v11  ;;  %v1367_v19 = vadd.f32 %v1366_v14, %v721_v1  ;;  %v1531_v35 = vmul.f32 0.2, %v1375_v22  ;;  %vm1467_vm12 = vcmp.ge.f32.partialorder %v1375_v22, 0.0 }
 0x146   :  { %v1629_v21 = vpack.c.bf16 %v1590_v18, %v1589_v17  ;;  %v3666_v23 = vpop.f32.mrf.mxu0  ;;  %v765_v1 = vrot.slane %v509_v55, %v4104_v57 }
 0x147   :  { %v1378_v27 = vadd.f32 %v3666_v23, %v733_v12  ;;  %v1529_v32 = vmul.f32 0.2, %v1367_v19  ;;  %vm1465_vm11 = vcmp.ge.f32.partialorder %v1367_v19, 0.0  ;;  %v1595_v47 = vsel %vm1467_vm12, %v1375_v22, %v1531_v35 }
 0x148   :  { %v1369_v29 = vpop.f32.mrf.mxu0  ;;  %3731 = vmatprep.mubr.msk.bf16.mxu1 %vm1676_vm6, %v1629_v21 }
 0x149   :  { %vm1468_vm10 = vcmp.ge.f32.partialorder %v1378_v27, 0.0  ;;  %v1532_v33 = vmul.f32 0.2, %v1378_v27  ;;  %v1370_v34 = vadd.f32 %v1369_v29, %v725_v15  ;;  %3732 = vmatmul.mubr.msk.bf16.gmra.mxu1 %vm1676_vm6, %v1630_v26  ;;  %v1593_v43 = vsel %vm1465_vm11, %v1367_v19, %v1529_v32  ;;  %v4358_v26 = vld [vmem:[%s4683_s4] ss:$0 sm:$0xff] }
 0x14a   :  { %v3669_v36 = vpop.f32.mrf.mxu0 }
 0x14b   :  { %vm1466_vm13 = vcmp.ge.f32.partialorder %v1370_v34, 0.0  ;;  %v1530_v39 = vmul.f32 0.2, %v1370_v34  ;;  %v1596_v41 = vsel %vm1468_vm10, %v1378_v27, %v1532_v33  ;;  %v1391_v50 = vadd.f32 %v3669_v36, %v745_v30 }
 0x14c   :  { %v1382_v42 = vpop.f32.mrf.mxu0  ;;  %v1632_v53 = vpack.c.bf16 %v1596_v41, %v1595_v47 }
 0x14d   :  { %v1594_v44 = vsel %vm1466_vm13, %v1370_v34, %v1530_v39  ;;  %v1383_v45 = vadd.f32 %v1382_v42, %v737_v31  ;;  %v1535_v61 = vmul.f32 0.2, %v1391_v50  ;;  %vm1471_vm0 = vcmp.ge.f32.partialorder %v1391_v50, 0.0 }
 0x14e   :  { %v1631_v49 = vpack.c.bf16 %v1594_v44, %v1593_v43  ;;  %v3670_v51 = vpop.f32.mrf.mxu0 }
 0x14f   :  { %v1394_v54 = vadd.f32 %v3670_v51, %v749_v37  ;;  %v1533_v58 = vmul.f32 0.2, %v1383_v45  ;;  %vm1469_vm15 = vcmp.ge.f32.partialorder %v1383_v45, 0.0  ;;  %v1599_v8 = vsel %vm1471_vm0, %v1391_v50, %v1535_v61 }
 0x150   :  { %v1385_v56 = vpop.f32.mrf.mxu0  ;;  %3735 = vmatprep.mubr.msk.bf16.mxu1 %vm1676_vm6, %v1631_v49 }
 0x151   :  { %vm1472_vm14 = vcmp.ge.f32.partialorder %v1394_v54, 0.0  ;;  %v1536_v59 = vmul.f32 0.2, %v1394_v54  ;;  %v1386_v60 = vadd.f32 %v1385_v56, %v741_v46  ;;  %3736 = vmatmul.mubr.msk.bf16.gmra.mxu1 %vm1676_vm6, %v1632_v53  ;;  %v1597_v4 = vsel %vm1469_vm15, %v1383_v45, %v1533_v58 }
 0x152   :  { %v3673_v63 = vpop.f32.mrf.mxu0 }
 0x153   :  { %vm1470_vm1 = vcmp.ge.f32.partialorder %v1386_v60, 0.0  ;;  %v1534_v0 = vmul.f32 0.2, %v1386_v60  ;;  %v1600_v2 = vsel %vm1472_vm14, %v1394_v54, %v1536_v59  ;;  %v1407_v10 = vadd.f32 %v3673_v63, %v761_v62 }
 0x154   :  { %v1398_v3 = vpop.f32.mrf.mxu0  ;;  %v1634_v12 = vpack.c.bf16 %v1600_v2, %v1599_v8 }
 0x155   :  { %v1598_v5 = vsel %vm1470_vm1, %v1386_v60, %v1534_v0  ;;  %v1399_v6 = vadd.f32 %v1398_v3, %v753_v48  ;;  %v1539_v18 = vmul.f32 0.2, %v1407_v10  ;;  %vm1475_vm4 = vcmp.ge.f32.partialorder %v1407_v10, 0.0 }
 0x156   :  { %v1633_v9 = vpack.c.bf16 %v1598_v5, %v1597_v4  ;;  %v3674_v11 = vpop.f32.mrf.mxu0 }
 0x157   :  { %v1410_v13 = vadd.f32 %v3674_v11, %v765_v1  ;;  %v1537_v15 = vmul.f32 0.2, %v1399_v6  ;;  %vm1473_vm3 = vcmp.ge.f32.partialorder %v1399_v6, 0.0  ;;  %v1603_v21 = vsel %vm1475_vm4, %v1407_v10, %v1539_v18 }
 0x158   :  { %v1401_v14 = vpop.f32.mrf.mxu0  ;;  %3739 = vmatprep.mubr.msk.bf16.mxu1 %vm1676_vm6, %v1633_v9 }
 0x159   :  { %vm1476_vm2 = vcmp.ge.f32.partialorder %v1410_v13, 0.0  ;;  %v1540_v16 = vmul.f32 0.2, %v1410_v13  ;;  %v1402_v17 = vadd.f32 %v1401_v14, %v757_v7  ;;  %3740 = vmatmul.mubr.msk.bf16.gmra.mxu1 %vm1676_vm6, %v1634_v12  ;;  %v1601_v20 = vsel %vm1473_vm3, %v1399_v6, %v1537_v15 }
 0x15b   :  { %vm1474_vm5 = vcmp.ge.f32.partialorder %v1402_v17, 0.0  ;;  %v1538_v57 = vmul.f32 0.2, %v1402_v17  ;;  %v1604_v19 = vsel %vm1476_vm2, %v1410_v13, %v1540_v16 }
 0x15c   :  { %v1636_v23 = vpack.c.bf16 %v1604_v19, %v1603_v21 }
 0x15d   :  { %v1602_v25 = vsel %vm1474_vm5, %v1402_v17, %v1538_v57 }
 0x15e   :  { %v1635_v22 = vpack.c.bf16 %v1602_v25, %v1601_v20 }
 0x160   :  { %3743 = vmatprep.mubr.msk.bf16.mxu1 %vm1676_vm6, %v1635_v22 }
 0x161   :  { %3744 = vmatmul.mubr.msk.bf16.gmra.mxu1 %vm1676_vm6, %v1636_v23 }
 0x1a9   :  { %v3685_v24 = vpop.f32.mrf.mxu0 }
 0x1aa   :  { %v1816_v29 = vadd.f32 %v3685_v24, %v4358_v26 }
 0x1ab   :  { %v1807_v27 = vpop.f32.mrf.mxu0 }
 0x1ac   :  { %v1808_v28 = vadd.f32 %v4358_v26, %v1807_v27  ;;  %v2128_v36 = vmul.f32 0.2, %v1816_v29  ;;  %vm2064_vm8 = vcmp.ge.f32.partialorder %v1816_v29, 0.0 }
 0x1ad   :  { %v3686_v30 = vpop.f32.mrf.mxu0 }
 0x1ae   :  { %v1819_v31 = vadd.f32 %v3686_v30, %v4358_v26  ;;  %v2126_v33 = vmul.f32 0.2, %v1808_v28  ;;  %vm2062_vm6 = vcmp.ge.f32.partialorder %v1808_v28, 0.0  ;;  %v2192_v44 = vsel %vm2064_vm8, %v1816_v29, %v2128_v36 }
 0x1af   :  { %v1810_v32 = vpop.f32.mrf.mxu0 }
 0x1b0   :  { %vm2065_vm7 = vcmp.ge.f32.partialorder %v1819_v31, 0.0  ;;  %v2129_v34 = vmul.f32 0.2, %v1819_v31  ;;  %v1811_v35 = vadd.f32 %v4358_v26, %v1810_v32  ;;  %v2190_v42 = vsel %vm2062_vm6, %v1808_v28, %v2126_v33 }
 0x1b1   :  { %v3689_v37 = vpop.f32.mrf.mxu0 }
 0x1b2   :  { %vm2063_vm9 = vcmp.ge.f32.partialorder %v1811_v35, 0.0  ;;  %v2127_v38 = vmul.f32 0.2, %v1811_v35  ;;  %v2193_v39 = vsel %vm2065_vm7, %v1819_v31, %v2129_v34  ;;  %v1832_v45 = vadd.f32 %v3689_v37, %v4358_v26 }
 0x1b3   :  { %v1823_v40 = vpop.f32.mrf.mxu0  ;;  %v2255_v49 = vpack.c.bf16 %v2193_v39, %v2192_v44 }
 0x1b4   :  { %v1824_v41 = vadd.f32 %v4358_v26, %v1823_v40  ;;  %v2191_v43 = vsel %vm2063_vm9, %v1811_v35, %v2127_v38  ;;  %v2132_v55 = vmul.f32 0.2, %v1832_v45  ;;  %vm2068_vm12 = vcmp.ge.f32.partialorder %v1832_v45, 0.0 }
 0x1b5   :  { %v3690_v46 = vpop.f32.mrf.mxu0  ;;  %v2254_v47 = vpack.c.bf16 %v2191_v43, %v2190_v42 }
 0x1b6   :  { %v1835_v50 = vadd.f32 %v3690_v46, %v4358_v26  ;;  %v2130_v52 = vmul.f32 0.2, %v1824_v41  ;;  %vm2066_vm11 = vcmp.ge.f32.partialorder %v1824_v41, 0.0  ;;  %v2196_v2 = vsel %vm2068_vm12, %v1832_v45, %v2132_v55 }
 0x1b7   :  { %v1826_v51 = vpop.f32.mrf.mxu0  ;;  %3763 = vmatprep.mubr.bf16.mxu1 %v2254_v47 }
 0x1b8   :  { %vm2069_vm10 = vcmp.ge.f32.partialorder %v1835_v50, 0.0  ;;  %v2133_v53 = vmul.f32 0.2, %v1835_v50  ;;  %v1827_v54 = vadd.f32 %v4358_v26, %v1826_v51  ;;  %3764 = vmatmul.mubr.bf16.vlgmr.msra.gmra.mxu1 %v2255_v49  ;;  %v2194_v61 = vsel %vm2066_vm11, %v1824_v41, %v2130_v52 }
 0x1b9   :  { %v3693_v56 = vpop.f32.mrf.mxu0 }
 0x1ba   :  { %vm2067_vm13 = vcmp.ge.f32.partialorder %v1827_v54, 0.0  ;;  %v2131_v48 = vmul.f32 0.2, %v1827_v54  ;;  %v2197_v59 = vsel %vm2069_vm10, %v1835_v50, %v2133_v53  ;;  %v1848_v63 = vadd.f32 %v3693_v56, %v4358_v26 }
 0x1bb   :  { %v1839_v58 = vpop.f32.mrf.mxu0  ;;  %v2257_v4 = vpack.c.bf16 %v2197_v59, %v2196_v2 }
 0x1bc   :  { %v1840_v60 = vadd.f32 %v4358_v26, %v1839_v58  ;;  %v2195_v62 = vsel %vm2067_vm13, %v1827_v54, %v2131_v48  ;;  %v2136_v9 = vmul.f32 0.2, %v1848_v63  ;;  %vm2072_vm0 = vcmp.ge.f32.partialorder %v1848_v63, 0.0 }
 0x1bd   :  { %v3694_v0 = vpop.f32.mrf.mxu0  ;;  %v2256_v1 = vpack.c.bf16 %v2195_v62, %v2194_v61 }
 0x1be   :  { %v1851_v3 = vadd.f32 %v3694_v0, %v4358_v26  ;;  %v2134_v6 = vmul.f32 0.2, %v1840_v60  ;;  %vm2070_vm15 = vcmp.ge.f32.partialorder %v1840_v60, 0.0  ;;  %v2200_v19 = vsel %vm2072_vm0, %v1848_v63, %v2136_v9 }
 0x1bf   :  { %v1842_v5 = vpop.f32.mrf.mxu0  ;;  %3767 = vmatprep.mubr.bf16.mxu1 %v2256_v1 }
 0x1c0   :  { %vm2073_vm14 = vcmp.ge.f32.partialorder %v1851_v3, 0.0  ;;  %v2137_v7 = vmul.f32 0.2, %v1851_v3  ;;  %v1843_v8 = vadd.f32 %v4358_v26, %v1842_v5  ;;  %3768 = vmatmul.mubr.bf16.gmra.mxu1 %v2257_v4  ;;  %v2198_v15 = vsel %vm2070_vm15, %v1840_v60, %v2134_v6 }
 0x1c1   :  { %v3697_v10 = vpop.f32.mrf.mxu0 }
 0x1c2   :  { %vm2071_vm1 = vcmp.ge.f32.partialorder %v1843_v8, 0.0  ;;  %v2135_v11 = vmul.f32 0.2, %v1843_v8  ;;  %v2201_v13 = vsel %vm2073_vm14, %v1851_v3, %v2137_v7  ;;  %v1864_v17 = vadd.f32 %v3697_v10, %v4358_v26 }
 0x1c3   :  { %v1855_v12 = vpop.f32.mrf.mxu0  ;;  %v2259_v25 = vpack.c.bf16 %v2201_v13, %v2200_v19 }
 0x1c4   :  { %v1856_v14 = vadd.f32 %v4358_v26, %v1855_v12  ;;  %v2199_v16 = vsel %vm2071_vm1, %v1843_v8, %v2135_v11  ;;  %v2140_v27 = vmul.f32 0.2, %v1864_v17  ;;  %vm2076_vm4 = vcmp.ge.f32.partialorder %v1864_v17, 0.0 }
 0x1c5   :  { %v3698_v18 = vpop.f32.mrf.mxu0  ;;  %v2258_v57 = vpack.c.bf16 %v2199_v16, %v2198_v15 }
 0x1c6   :  { %v1867_v20 = vadd.f32 %v3698_v18, %v4358_v26  ;;  %v2138_v22 = vmul.f32 0.2, %v1856_v14  ;;  %vm2074_vm3 = vcmp.ge.f32.partialorder %v1856_v14, 0.0  ;;  %v2204_v38 = vsel %vm2076_vm4, %v1864_v17, %v2140_v27 }
 0x1c7   :  { %v1858_v21 = vpop.f32.mrf.mxu0  ;;  %3771 = vmatprep.mubr.bf16.mxu1 %v2258_v57 }
 0x1c8   :  { %vm2077_vm2 = vcmp.ge.f32.partialorder %v1867_v20, 0.0  ;;  %v2141_v23 = vmul.f32 0.2, %v1867_v20  ;;  %v1859_v24 = vadd.f32 %v4358_v26, %v1858_v21  ;;  %3772 = vmatmul.mubr.bf16.gmra.mxu1 %v2259_v25  ;;  %v2202_v33 = vsel %vm2074_vm3, %v1856_v14, %v2138_v22 }
 0x1c9   :  { %v3701_v28 = vpop.f32.mrf.mxu0 }
 0x1ca   :  { %vm2075_vm5 = vcmp.ge.f32.partialorder %v1859_v24, 0.0  ;;  %v2139_v29 = vmul.f32 0.2, %v1859_v24  ;;  %v2205_v31 = vsel %vm2077_vm2, %v1867_v20, %v2141_v23  ;;  %v1880_v35 = vadd.f32 %v3701_v28, %v4358_v26 }
 0x1cb   :  { %v1871_v30 = vpop.f32.mrf.mxu0  ;;  %v2261_v40 = vpack.c.bf16 %v2205_v31, %v2204_v38 }
 0x1cc   :  { %v1872_v32 = vadd.f32 %v4358_v26, %v1871_v30  ;;  %v2203_v34 = vsel %vm2075_vm5, %v1859_v24, %v2139_v29  ;;  %v2144_v45 = vmul.f32 0.2, %v1880_v35  ;;  %vm2080_vm8 = vcmp.ge.f32.partialorder %v1880_v35, 0.0 }
 0x1cd   :  { %v3702_v36 = vpop.f32.mrf.mxu0  ;;  %v2260_v37 = vpack.c.bf16 %v2203_v34, %v2202_v33 }
 0x1ce   :  { %v1883_v39 = vadd.f32 %v3702_v36, %v4358_v26  ;;  %v2142_v42 = vmul.f32 0.2, %v1872_v32  ;;  %vm2078_vm6 = vcmp.ge.f32.partialorder %v1872_v32, 0.0  ;;  %v2208_v48 = vsel %vm2080_vm8, %v1880_v35, %v2144_v45 }
 0x1cf   :  { %v1874_v41 = vpop.f32.mrf.mxu0  ;;  %3775 = vmatprep.mubr.bf16.mxu1 %v2260_v37 }
 0x1d0   :  { %vm2081_vm7 = vcmp.ge.f32.partialorder %v1883_v39, 0.0  ;;  %v2145_v43 = vmul.f32 0.2, %v1883_v39  ;;  %v1875_v44 = vadd.f32 %v4358_v26, %v1874_v41  ;;  %3776 = vmatmul.mubr.bf16.gmra.mxu1 %v2261_v40  ;;  %v2206_v52 = vsel %vm2078_vm6, %v1872_v32, %v2142_v42 }
 0x1d1   :  { %v3705_v46 = vpop.f32.mrf.mxu0 }
 0x1d2   :  { %vm2079_vm9 = vcmp.ge.f32.partialorder %v1875_v44, 0.0  ;;  %v2143_v47 = vmul.f32 0.2, %v1875_v44  ;;  %v2209_v50 = vsel %vm2081_vm7, %v1883_v39, %v2145_v43  ;;  %v1896_v54 = vadd.f32 %v3705_v46, %v4358_v26 }
 0x1d3   :  { %v1887_v49 = vpop.f32.mrf.mxu0  ;;  %v2263_v59 = vpack.c.bf16 %v2209_v50, %v2208_v48 }
 0x1d4   :  { %v1888_v51 = vadd.f32 %v4358_v26, %v1887_v49  ;;  %v2207_v53 = vsel %vm2079_vm9, %v1875_v44, %v2143_v47  ;;  %v2148_v0 = vmul.f32 0.2, %v1896_v54  ;;  %vm2084_vm12 = vcmp.ge.f32.partialorder %v1896_v54, 0.0 }
 0x1d5   :  { %v3706_v55 = vpop.f32.mrf.mxu0  ;;  %v2262_v56 = vpack.c.bf16 %v2207_v53, %v2206_v52 }
 0x1d6   :  { %v1899_v58 = vadd.f32 %v3706_v55, %v4358_v26  ;;  %v2146_v61 = vmul.f32 0.2, %v1888_v51  ;;  %vm2082_vm11 = vcmp.ge.f32.partialorder %v1888_v51, 0.0  ;;  %v2212_v11 = vsel %vm2084_vm12, %v1896_v54, %v2148_v0 }
 0x1d7   :  { %v1890_v60 = vpop.f32.mrf.mxu0  ;;  %3779 = vmatprep.mubr.bf16.mxu1 %v2262_v56 }
 0x1d8   :  { %vm2085_vm10 = vcmp.ge.f32.partialorder %v1899_v58, 0.0  ;;  %v2149_v62 = vmul.f32 0.2, %v1899_v58  ;;  %v1891_v63 = vadd.f32 %v4358_v26, %v1890_v60  ;;  %3780 = vmatmul.mubr.bf16.gmra.mxu1 %v2263_v59  ;;  %v2210_v6 = vsel %vm2082_vm11, %v1888_v51, %v2146_v61 }
 0x1d9   :  { %v3709_v1 = vpop.f32.mrf.mxu0 }
 0x1da   :  { %vm2083_vm13 = vcmp.ge.f32.partialorder %v1891_v63, 0.0  ;;  %v2147_v2 = vmul.f32 0.2, %v1891_v63  ;;  %v2213_v4 = vsel %vm2085_vm10, %v1899_v58, %v2149_v62  ;;  %v1912_v8 = vadd.f32 %v3709_v1, %v4358_v26 }
 0x1db   :  { %v1903_v3 = vpop.f32.mrf.mxu0  ;;  %v2265_v13 = vpack.c.bf16 %v2213_v4, %v2212_v11 }
 0x1dc   :  { %v1904_v5 = vadd.f32 %v4358_v26, %v1903_v3  ;;  %v2211_v7 = vsel %vm2083_vm13, %v1891_v63, %v2147_v2  ;;  %v2152_v18 = vmul.f32 0.2, %v1912_v8  ;;  %vm2088_vm0 = vcmp.ge.f32.partialorder %v1912_v8, 0.0 }
 0x1dd   :  { %v3710_v9 = vpop.f32.mrf.mxu0  ;;  %v2264_v10 = vpack.c.bf16 %v2211_v7, %v2210_v6 }
 0x1de   :  { %v1915_v12 = vadd.f32 %v3710_v9, %v4358_v26  ;;  %v2150_v15 = vmul.f32 0.2, %v1904_v5  ;;  %vm2086_vm15 = vcmp.ge.f32.partialorder %v1904_v5, 0.0  ;;  %v2216_v29 = vsel %vm2088_vm0, %v1912_v8, %v2152_v18 }
 0x1df   :  { %v1906_v14 = vpop.f32.mrf.mxu0  ;;  %3783 = vmatprep.mubr.bf16.mxu1 %v2264_v10 }
 0x1e0   :  { %vm2089_vm14 = vcmp.ge.f32.partialorder %v1915_v12, 0.0  ;;  %v2153_v16 = vmul.f32 0.2, %v1915_v12  ;;  %v1907_v17 = vadd.f32 %v4358_v26, %v1906_v14  ;;  %3784 = vmatmul.mubr.bf16.gmra.mxu1 %v2265_v13  ;;  %v2214_v22 = vsel %vm2086_vm15, %v1904_v5, %v2150_v15 }
 0x1e1   :  { %v3713_v57 = vpop.f32.mrf.mxu1 }
 0x1e2   :  { %vm2087_vm1 = vcmp.ge.f32.partialorder %v1907_v17, 0.0  ;;  %v2151_v19 = vmul.f32 0.2, %v1907_v17  ;;  %v2217_v25 = vsel %vm2089_vm14, %v1915_v12, %v2153_v16  ;;  %v1928_v24 = vadd.f32 %v3713_v57, %v4358_v26 }
 0x1e3   :  { %v1919_v20 = vpop.f32.mrf.mxu1  ;;  %v2267_v31 = vpack.c.bf16 %v2217_v25, %v2216_v29 }
 0x1e4   :  { %v1920_v21 = vadd.f32 %v4358_v26, %v1919_v20  ;;  %v2215_v23 = vsel %vm2087_vm1, %v1907_v17, %v2151_v19  ;;  %v2156_v36 = vmul.f32 0.2, %v1928_v24  ;;  %vm2092_vm4 = vcmp.ge.f32.partialorder %v1928_v24, 0.0 }
 0x1e5   :  { %v3714_v27 = vpop.f32.mrf.mxu1  ;;  %v2266_v28 = vpack.c.bf16 %v2215_v23, %v2214_v22 }
 0x1e6   :  { %v1931_v30 = vadd.f32 %v3714_v27, %v4358_v26  ;;  %v2154_v33 = vmul.f32 0.2, %v1920_v21  ;;  %vm2090_vm3 = vcmp.ge.f32.partialorder %v1920_v21, 0.0  ;;  %v2220_v47 = vsel %vm2092_vm4, %v1928_v24, %v2156_v36 }
 0x1e7   :  { %v1922_v32 = vpop.f32.mrf.mxu1  ;;  %3787 = vmatprep.mubr.bf16.mxu1 %v2266_v28 }
 0x1e8   :  { %vm2093_vm2 = vcmp.ge.f32.partialorder %v1931_v30, 0.0  ;;  %v2157_v34 = vmul.f32 0.2, %v1931_v30  ;;  %v1923_v35 = vadd.f32 %v4358_v26, %v1922_v32  ;;  %3788 = vmatmul.mubr.bf16.gmra.mxu1 %v2267_v31  ;;  %v2218_v42 = vsel %vm2090_vm3, %v1920_v21, %v2154_v33 }
 0x1e9   :  { %v3717_v37 = vpop.f32.mrf.mxu1 }
 0x1ea   :  { %vm2091_vm5 = vcmp.ge.f32.partialorder %v1923_v35, 0.0  ;;  %v2155_v38 = vmul.f32 0.2, %v1923_v35  ;;  %v2221_v40 = vsel %vm2093_vm2, %v1931_v30, %v2157_v34  ;;  %v1944_v44 = vadd.f32 %v3717_v37, %v4358_v26 }
 0x1eb   :  { %v1935_v39 = vpop.f32.mrf.mxu1  ;;  %v2269_v50 = vpack.c.bf16 %v2221_v40, %v2220_v47 }
 0x1ec   :  { %v1936_v41 = vadd.f32 %v4358_v26, %v1935_v39  ;;  %v2219_v43 = vsel %vm2091_vm5, %v1923_v35, %v2155_v38  ;;  %v2160_v55 = vmul.f32 0.2, %v1944_v44  ;;  %vm2096_vm8 = vcmp.ge.f32.partialorder %v1944_v44, 0.0 }
 0x1ed   :  { %v3718_v45 = vpop.f32.mrf.mxu1  ;;  %v2268_v46 = vpack.c.bf16 %v2219_v43, %v2218_v42 }
 0x1ee   :  { %v1947_v49 = vadd.f32 %v3718_v45, %v4358_v26  ;;  %v2158_v52 = vmul.f32 0.2, %v1936_v41  ;;  %vm2094_vm6 = vcmp.ge.f32.partialorder %v1936_v41, 0.0  ;;  %v2224_v2 = vsel %vm2096_vm8, %v1944_v44, %v2160_v55 }
 0x1ef   :  { %v1938_v51 = vpop.f32.mrf.mxu1  ;;  %3791 = vmatprep.mubr.bf16.mxu1 %v2268_v46 }
 0x1f0   :  { %vm2097_vm7 = vcmp.ge.f32.partialorder %v1947_v49, 0.0  ;;  %v2161_v53 = vmul.f32 0.2, %v1947_v49  ;;  %v1939_v54 = vadd.f32 %v4358_v26, %v1938_v51  ;;  %3792 = vmatmul.mubr.bf16.gmra.mxu1 %v2269_v50  ;;  %v2222_v61 = vsel %vm2094_vm6, %v1936_v41, %v2158_v52 }
 0x1f1   :  { %v3721_v56 = vpop.f32.mrf.mxu1 }
 0x1f2   :  { %vm2095_vm9 = vcmp.ge.f32.partialorder %v1939_v54, 0.0  ;;  %v2159_v48 = vmul.f32 0.2, %v1939_v54  ;;  %v2225_v59 = vsel %vm2097_vm7, %v1947_v49, %v2161_v53  ;;  %v1960_v63 = vadd.f32 %v3721_v56, %v4358_v26 }
 0x1f3   :  { %v1951_v58 = vpop.f32.mrf.mxu1  ;;  %v2271_v4 = vpack.c.bf16 %v2225_v59, %v2224_v2 }
 0x1f4   :  { %v1952_v60 = vadd.f32 %v4358_v26, %v1951_v58  ;;  %v2223_v62 = vsel %vm2095_vm9, %v1939_v54, %v2159_v48  ;;  %v2164_v9 = vmul.f32 0.2, %v1960_v63  ;;  %vm2100_vm12 = vcmp.ge.f32.partialorder %v1960_v63, 0.0 }
 0x1f5   :  { %v3722_v0 = vpop.f32.mrf.mxu1  ;;  %v2270_v1 = vpack.c.bf16 %v2223_v62, %v2222_v61 }
 0x1f6   :  { %v1963_v3 = vadd.f32 %v3722_v0, %v4358_v26  ;;  %v2162_v6 = vmul.f32 0.2, %v1952_v60  ;;  %vm2098_vm11 = vcmp.ge.f32.partialorder %v1952_v60, 0.0  ;;  %v2228_v19 = vsel %vm2100_vm12, %v1960_v63, %v2164_v9 }
 0x1f7   :  { %v1954_v5 = vpop.f32.mrf.mxu1  ;;  %3795 = vmatprep.mubr.bf16.mxu1 %v2270_v1 }
 0x1f8   :  { %vm2101_vm10 = vcmp.ge.f32.partialorder %v1963_v3, 0.0  ;;  %v2165_v7 = vmul.f32 0.2, %v1963_v3  ;;  %v1955_v8 = vadd.f32 %v4358_v26, %v1954_v5  ;;  %3796 = vmatmul.mubr.bf16.gmra.mxu1 %v2271_v4  ;;  %v2226_v15 = vsel %vm2098_vm11, %v1952_v60, %v2162_v6 }
 0x1f9   :  { %v3725_v10 = vpop.f32.mrf.mxu1 }
 0x1fa   :  { %vm2099_vm13 = vcmp.ge.f32.partialorder %v1955_v8, 0.0  ;;  %v2163_v11 = vmul.f32 0.2, %v1955_v8  ;;  %v2229_v13 = vsel %vm2101_vm10, %v1963_v3, %v2165_v7  ;;  %v1976_v17 = vadd.f32 %v3725_v10, %v4358_v26 }
 0x1fb   :  { %v1967_v12 = vpop.f32.mrf.mxu1  ;;  %v2273_v25 = vpack.c.bf16 %v2229_v13, %v2228_v19 }
 0x1fc   :  { %v1968_v14 = vadd.f32 %v4358_v26, %v1967_v12  ;;  %v2227_v16 = vsel %vm2099_vm13, %v1955_v8, %v2163_v11  ;;  %v2168_v27 = vmul.f32 0.2, %v1976_v17  ;;  %vm2104_vm0 = vcmp.ge.f32.partialorder %v1976_v17, 0.0 }
 0x1fd   :  { %v3726_v18 = vpop.f32.mrf.mxu1  ;;  %v2272_v57 = vpack.c.bf16 %v2227_v16, %v2226_v15 }
 0x1fe   :  { %v1979_v20 = vadd.f32 %v3726_v18, %v4358_v26  ;;  %v2166_v22 = vmul.f32 0.2, %v1968_v14  ;;  %vm2102_vm15 = vcmp.ge.f32.partialorder %v1968_v14, 0.0  ;;  %v2232_v38 = vsel %vm2104_vm0, %v1976_v17, %v2168_v27 }
 0x1ff   :  { %v1970_v21 = vpop.f32.mrf.mxu1  ;;  %3799 = vmatprep.mubr.bf16.mxu1 %v2272_v57 }
 0x200   :  { %vm2105_vm14 = vcmp.ge.f32.partialorder %v1979_v20, 0.0  ;;  %v2169_v23 = vmul.f32 0.2, %v1979_v20  ;;  %v1971_v24 = vadd.f32 %v4358_v26, %v1970_v21  ;;  %3800 = vmatmul.mubr.bf16.gmra.mxu1 %v2273_v25  ;;  %v2230_v33 = vsel %vm2102_vm15, %v1968_v14, %v2166_v22 }
 0x201   :  { %v3729_v28 = vpop.f32.mrf.mxu1 }
 0x202   :  { %vm2103_vm1 = vcmp.ge.f32.partialorder %v1971_v24, 0.0  ;;  %v2167_v29 = vmul.f32 0.2, %v1971_v24  ;;  %v2233_v31 = vsel %vm2105_vm14, %v1979_v20, %v2169_v23  ;;  %v1992_v35 = vadd.f32 %v3729_v28, %v4358_v26 }
 0x203   :  { %v1983_v30 = vpop.f32.mrf.mxu1  ;;  %v2275_v40 = vpack.c.bf16 %v2233_v31, %v2232_v38 }
 0x204   :  { %v1984_v32 = vadd.f32 %v4358_v26, %v1983_v30  ;;  %v2231_v34 = vsel %vm2103_vm1, %v1971_v24, %v2167_v29  ;;  %v2172_v45 = vmul.f32 0.2, %v1992_v35  ;;  %vm2108_vm4 = vcmp.ge.f32.partialorder %v1992_v35, 0.0 }
 0x205   :  { %v3730_v36 = vpop.f32.mrf.mxu1  ;;  %v2274_v37 = vpack.c.bf16 %v2231_v34, %v2230_v33 }
 0x206   :  { %v1995_v39 = vadd.f32 %v3730_v36, %v4358_v26  ;;  %v2170_v42 = vmul.f32 0.2, %v1984_v32  ;;  %vm2106_vm3 = vcmp.ge.f32.partialorder %v1984_v32, 0.0  ;;  %v2236_v48 = vsel %vm2108_vm4, %v1992_v35, %v2172_v45 }
 0x207   :  { %v1986_v41 = vpop.f32.mrf.mxu1  ;;  %3803 = vmatprep.mubr.bf16.mxu1 %v2274_v37 }
 0x208   :  { %vm2109_vm2 = vcmp.ge.f32.partialorder %v1995_v39, 0.0  ;;  %v2173_v43 = vmul.f32 0.2, %v1995_v39  ;;  %v1987_v44 = vadd.f32 %v4358_v26, %v1986_v41  ;;  %3804 = vmatmul.mubr.bf16.gmra.mxu1 %v2275_v40  ;;  %v2234_v52 = vsel %vm2106_vm3, %v1984_v32, %v2170_v42 }
 0x209   :  { %v3733_v46 = vpop.f32.mrf.mxu1 }
 0x20a   :  { %vm2107_vm5 = vcmp.ge.f32.partialorder %v1987_v44, 0.0  ;;  %v2171_v47 = vmul.f32 0.2, %v1987_v44  ;;  %v2237_v50 = vsel %vm2109_vm2, %v1995_v39, %v2173_v43  ;;  %v2008_v54 = vadd.f32 %v3733_v46, %v4358_v26 }
 0x20b   :  { %v1999_v49 = vpop.f32.mrf.mxu1  ;;  %v2277_v59 = vpack.c.bf16 %v2237_v50, %v2236_v48 }
 0x20c   :  { %v2000_v51 = vadd.f32 %v4358_v26, %v1999_v49  ;;  %v2235_v53 = vsel %vm2107_vm5, %v1987_v44, %v2171_v47  ;;  %v2176_v0 = vmul.f32 0.2, %v2008_v54  ;;  %vm2112_vm8 = vcmp.ge.f32.partialorder %v2008_v54, 0.0 }
 0x20d   :  { %v3734_v55 = vpop.f32.mrf.mxu1  ;;  %v2276_v56 = vpack.c.bf16 %v2235_v53, %v2234_v52 }
 0x20e   :  { %v2011_v58 = vadd.f32 %v3734_v55, %v4358_v26  ;;  %v2174_v61 = vmul.f32 0.2, %v2000_v51  ;;  %vm2110_vm6 = vcmp.ge.f32.partialorder %v2000_v51, 0.0  ;;  %v2240_v11 = vsel %vm2112_vm8, %v2008_v54, %v2176_v0 }
 0x20f   :  { %v2002_v60 = vpop.f32.mrf.mxu1  ;;  %3807 = vmatprep.mubr.bf16.mxu1 %v2276_v56 }
 0x210   :  { %vm2113_vm7 = vcmp.ge.f32.partialorder %v2011_v58, 0.0  ;;  %v2177_v62 = vmul.f32 0.2, %v2011_v58  ;;  %v2003_v63 = vadd.f32 %v4358_v26, %v2002_v60  ;;  %3808 = vmatmul.mubr.bf16.gmra.mxu1 %v2277_v59  ;;  %v2238_v6 = vsel %vm2110_vm6, %v2000_v51, %v2174_v61 }
 0x211   :  { %v3737_v1 = vpop.f32.mrf.mxu1 }
 0x212   :  { %vm2111_vm9 = vcmp.ge.f32.partialorder %v2003_v63, 0.0  ;;  %v2175_v2 = vmul.f32 0.2, %v2003_v63  ;;  %v2241_v4 = vsel %vm2113_vm7, %v2011_v58, %v2177_v62  ;;  %v2024_v8 = vadd.f32 %v3737_v1, %v4358_v26 }
 0x213   :  { %v2015_v3 = vpop.f32.mrf.mxu1  ;;  %v2279_v13 = vpack.c.bf16 %v2241_v4, %v2240_v11 }
 0x214   :  { %v2016_v5 = vadd.f32 %v4358_v26, %v2015_v3  ;;  %v2239_v7 = vsel %vm2111_vm9, %v2003_v63, %v2175_v2  ;;  %v2180_v18 = vmul.f32 0.2, %v2024_v8  ;;  %vm2116_vm12 = vcmp.ge.f32.partialorder %v2024_v8, 0.0  ;;  %v4427_v63 = vld [vmem:[%s4684_s6] ss:$0 sm:$0xff] }
 0x215   :  { %v3738_v9 = vpop.f32.mrf.mxu1  ;;  %v2278_v10 = vpack.c.bf16 %v2239_v7, %v2238_v6 }
 0x216   :  { %v2027_v12 = vadd.f32 %v3738_v9, %v4358_v26  ;;  %v2178_v15 = vmul.f32 0.2, %v2016_v5  ;;  %vm2114_vm11 = vcmp.ge.f32.partialorder %v2016_v5, 0.0  ;;  %v2244_v29 = vsel %vm2116_vm12, %v2024_v8, %v2180_v18 }
 0x217   :  { %v2018_v14 = vpop.f32.mrf.mxu1  ;;  %3811 = vmatprep.mubr.bf16.mxu1 %v2278_v10 }
 0x218   :  { %vm2117_vm10 = vcmp.ge.f32.partialorder %v2027_v12, 0.0  ;;  %v2181_v16 = vmul.f32 0.2, %v2027_v12  ;;  %v2019_v17 = vadd.f32 %v4358_v26, %v2018_v14  ;;  %3812 = vmatmul.mubr.bf16.gmra.mxu1 %v2279_v13  ;;  %v2242_v22 = vsel %vm2114_vm11, %v2016_v5, %v2178_v15 }
 0x219   :  { %v3741_v57 = vpop.f32.mrf.mxu1  ;;  %vm3286_vm11 = vcmask 1041409  }
 0x21a   :  { %vm2115_vm13 = vcmp.ge.f32.partialorder %v2019_v17, 0.0  ;;  %v2179_v19 = vmul.f32 0.2, %v2019_v17  ;;  %v2245_v25 = vsel %vm2117_vm10, %v2027_v12, %v2181_v16  ;;  %v2040_v24 = vadd.f32 %v3741_v57, %v4358_v26 }
 0x21b   :  { %v2031_v20 = vpop.f32.mrf.mxu1  ;;  %v2281_v31 = vpack.c.bf16 %v2245_v25, %v2244_v29 }
 0x21c   :  { %v2032_v21 = vadd.f32 %v4358_v26, %v2031_v20  ;;  %v2243_v23 = vsel %vm2115_vm13, %v2019_v17, %v2179_v19  ;;  %v2184_v36 = vmul.f32 0.2, %v2040_v24  ;;  %vm2120_vm0 = vcmp.ge.f32.partialorder %v2040_v24, 0.0 }
 0x21d   :  { %v3742_v27 = vpop.f32.mrf.mxu1  ;;  %v2280_v28 = vpack.c.bf16 %v2243_v23, %v2242_v22  ;;  %vm3288_vm13 = vcmask 1042434  }
 0x21e   :  { %v2043_v30 = vadd.f32 %v3742_v27, %v4358_v26  ;;  %v2182_v33 = vmul.f32 0.2, %v2032_v21  ;;  %vm2118_vm15 = vcmp.ge.f32.partialorder %v2032_v21, 0.0  ;;  %v2248_v47 = vsel %vm2120_vm0, %v2040_v24, %v2184_v36 }
 0x21f   :  { %v2034_v32 = vpop.f32.mrf.mxu1  ;;  %3815 = vmatprep.mubr.bf16.mxu1 %v2280_v28  ;;  %vm3292_vm0 = vcmask 1044484  }
 0x220   :  { %vm2121_vm14 = vcmp.ge.f32.partialorder %v2043_v30, 0.0  ;;  %v2185_v34 = vmul.f32 0.2, %v2043_v30  ;;  %v2035_v35 = vadd.f32 %v4358_v26, %v2034_v32  ;;  %3816 = vmatmul.mubr.bf16.gmra.mxu1 %v2281_v31  ;;  %v2246_v42 = vsel %vm2118_vm15, %v2032_v21, %v2182_v33 }
 0x221   :  { %v3745_v37 = vpop.f32.mrf.mxu1 }
 0x222   :  { %vm2119_vm1 = vcmp.ge.f32.partialorder %v2035_v35, 0.0  ;;  %v2183_v38 = vmul.f32 0.2, %v2035_v35  ;;  %v2249_v40 = vsel %vm2121_vm14, %v2043_v30, %v2185_v34  ;;  %v2056_v44 = vadd.f32 %v3745_v37, %v4358_v26 }
 0x223   :  { %v2047_v39 = vpop.f32.mrf.mxu1  ;;  %v2283_v50 = vpack.c.bf16 %v2249_v40, %v2248_v47  ;;  %vm3290_vm14 = vcmask 1043459  }
 0x224   :  { %v2048_v41 = vadd.f32 %v4358_v26, %v2047_v39  ;;  %v2247_v43 = vsel %vm2119_vm1, %v2035_v35, %v2183_v38  ;;  %v2188_v55 = vmul.f32 0.2, %v2056_v44  ;;  %vm2124_vm4 = vcmp.ge.f32.partialorder %v2056_v44, 0.0 }
 0x225   :  { %v3746_v45 = vpop.f32.mrf.mxu1  ;;  %v2282_v46 = vpack.c.bf16 %v2247_v43, %v2246_v42 }
 0x226   :  { %v2059_v49 = vadd.f32 %v3746_v45, %v4358_v26  ;;  %v2186_v52 = vmul.f32 0.2, %v2048_v41  ;;  %vm2122_vm3 = vcmp.ge.f32.partialorder %v2048_v41, 0.0  ;;  %v2252_v61 = vsel %vm2124_vm4, %v2056_v44, %v2188_v55 }
 0x227   :  { %v2050_v51 = vpop.f32.mrf.mxu1  ;;  %3819 = vmatprep.mubr.bf16.mxu1 %v2282_v46 }
 0x228   :  { %vm2125_vm2 = vcmp.ge.f32.partialorder %v2059_v49, 0.0  ;;  %v2189_v53 = vmul.f32 0.2, %v2059_v49  ;;  %v2051_v54 = vadd.f32 %v4358_v26, %v2050_v51  ;;  %3820 = vmatmul.mubr.bf16.gmra.mxu1 %v2283_v50  ;;  %v2250_v58 = vsel %vm2122_vm3, %v2048_v41, %v2186_v52 }
 0x229   :  { %vm3294_vm3 = vcmask 1045509  }
 0x22a   :  { %vm2123_vm5 = vcmp.ge.f32.partialorder %v2051_v54, 0.0  ;;  %v2187_v56 = vmul.f32 0.2, %v2051_v54  ;;  %v2253_v48 = vsel %vm2125_vm2, %v2059_v49, %v2189_v53 }
 0x22b   :  { %v2285_v62 = vpack.c.bf16 %v2253_v48, %v2252_v61 }
 0x22c   :  { %v2251_v59 = vsel %vm2123_vm5, %v2051_v54, %v2187_v56  ;;  %vm3296_vm5 = vcmask 1046534  }
 0x22d   :  { %v2284_v60 = vpack.c.bf16 %v2251_v59, %v2250_v58 }
 0x22f   :  { %3823 = vmatprep.mubr.bf16.mxu1 %v2284_v60 }
 0x230   :  { %3824 = vmatmul.mubr.bf16.gmra.mxu1 %v2285_v62 }
 0x278   :  { %v3765_v26 = vpop.f32.mrf.mxu1 }
 0x279   :  { %v2400_v0 = vadd.f32 %v3765_v26, %v4427_v63 }
 0x27a   :  { %v2391_v1 = vpop.f32.mrf.mxu1 }
 0x27b   :  { %vm2648_vm7 = vcmp.ge.f32.partialorder %v2400_v0, 0.0  ;;  %v2712_v2 = vmul.f32 0.2, %v2400_v0  ;;  %v2392_v3 = vadd.f32 %v4427_v63, %v2391_v1 }
 0x27c   :  { %v3766_v4 = vpop.f32.mrf.mxu1 }
 0x27d   :  { %v2776_v5 = vsel %vm2648_vm7, %v2400_v0, %v2712_v2  ;;  %vm2646_vm6 = vcmp.ge.f32.partialorder %v2392_v3, 0.0  ;;  %v2710_v6 = vmul.f32 0.2, %v2392_v3  ;;  %v2403_v7 = vadd.f32 %v3766_v4, %v4427_v63 }
 0x27e   :  { %v2850_v8 = vrot.slane %v2776_v5, 4  ;;  %v2394_v9 = vpop.f32.mrf.mxu1  ;;  %vm3298_vm7 = vcmask 1047559  }
 0x27f   :  { %v2774_v10 = vsel %vm2646_vm6, %v2392_v3, %v2710_v6  ;;  %vm2649_vm8 = vcmp.ge.f32.partialorder %v2403_v7, 0.0  ;;  %v2713_v11 = vmul.f32 0.2, %v2403_v7  ;;  %v2395_v12 = vadd.f32 %v4427_v63, %v2394_v9 }
 0x280   :  { %v2851_v13 = vadd.f32 %v2850_v8, %v2776_v5  ;;  %v2838_v14 = vrot.slane %v2774_v10, 4  ;;  %v3769_v15 = vpop.f32.mrf.mxu1 }
 0x281   :  { %v2777_v16 = vsel %vm2649_vm8, %v2403_v7, %v2713_v11  ;;  %vm2647_vm9 = vcmp.ge.f32.partialorder %v2395_v12, 0.0  ;;  %v2711_v17 = vmul.f32 0.2, %v2395_v12  ;;  %v2416_v18 = vadd.f32 %v3769_v15, %v4427_v63 }
 0x282   :  { %v2852_v57 = vrot.slane %v2851_v13, 2  ;;  %v2839_v19 = vadd.f32 %v2838_v14, %v2774_v10  ;;  %v2856_v20 = vrot.slane %v2777_v16, 4  ;;  %v2407_v25 = vpop.f32.mrf.mxu1 }
 0x283   :  { %v2775_v21 = vsel %vm2647_vm9, %v2395_v12, %v2711_v17  ;;  %vm2652_vm10 = vcmp.ge.f32.partialorder %v2416_v18, 0.0  ;;  %v2716_v22 = vmul.f32 0.2, %v2416_v18  ;;  %v2408_v23 = vadd.f32 %v4427_v63, %v2407_v25 }
 0x284   :  { %v2853_v24 = vadd.f32 %v2852_v57, %v2851_v13  ;;  %v2840_v27 = vrot.slane %v2839_v19, 2  ;;  %v2857_v28 = vadd.f32 %v2856_v20, %v2777_v16  ;;  %v2844_v29 = vrot.slane %v2775_v21, 4  ;;  %v3770_v30 = vpop.f32.mrf.mxu1 }
 0x285   :  { %v2780_v31 = vsel %vm2652_vm10, %v2416_v18, %v2716_v22  ;;  %vm2650_vm12 = vcmp.ge.f32.partialorder %v2408_v23, 0.0  ;;  %v2714_v32 = vmul.f32 0.2, %v2408_v23  ;;  %v2419_v33 = vadd.f32 %v3770_v30, %v4427_v63 }
 0x286   :  { %v2854_v34 = vrot.slane %v2853_v24, 1  ;;  %v2841_v35 = vadd.f32 %v2840_v27, %v2839_v19  ;;  %v2858_v36 = vrot.slane %v2857_v28, 2  ;;  %v2845_v37 = vadd.f32 %v2844_v29, %v2775_v21  ;;  %v2410_v38 = vpop.f32.mrf.mxu1 }
 0x287   :  { %v2874_v39 = vrot.slane %v2780_v31, 4  ;;  %v2778_v40 = vsel %vm2650_vm12, %v2408_v23, %v2714_v32  ;;  %vm2653_vm15 = vcmp.ge.f32.partialorder %v2419_v33, 0.0  ;;  %v2717_v41 = vmul.f32 0.2, %v2419_v33 }
 0x288   :  { %v2855_v42 = vadd.f32 %v2854_v34, %v2853_v24  ;;  %v2842_v43 = vrot.slane %v2841_v35, 1  ;;  %v2859_v44 = vadd.f32 %v2858_v36, %v2857_v28  ;;  %v2846_v45 = vrot.slane %v2845_v37, 2  ;;  %v3773_v46 = vpop.f32.mrf.mxu1 }
 0x289   :  { %v2875_v47 = vadd.f32 %v2874_v39, %v2780_v31  ;;  %v2862_v49 = vrot.slane %v2778_v40, 4  ;;  %v2781_v50 = vsel %vm2653_vm15, %v2419_v33, %v2717_v41  ;;  %v2411_v51 = vadd.f32 %v4427_v63, %v2410_v38 }
 0x28a   :  { %v2843_v52 = vadd.f32 %v2842_v43, %v2841_v35  ;;  %v2860_v53 = vrot.slane %v2859_v44, 1  ;;  %v2847_v54 = vadd.f32 %v2846_v45, %v2845_v37  ;;  %v2880_v55 = vrot.slane %v2781_v50, 4  ;;  %v2423_v56 = vpop.f32.mrf.mxu1 }
 0x28b   :  { %v2876_v48 = vrot.slane %v2875_v47, 2  ;;  %v2863_v58 = vadd.f32 %v2862_v49, %v2778_v40  ;;  %vm2651_vm1 = vcmp.ge.f32.partialorder %v2411_v51, 0.0  ;;  %v2715_v59 = vmul.f32 0.2, %v2411_v51 }
 0x28c   :  { %v2861_v60 = vadd.f32 %v2860_v53, %v2859_v44  ;;  %v2848_v61 = vrot.slane %v2847_v54, 1  ;;  %v2881_v62 = vadd.f32 %v2880_v55, %v2781_v50  ;;  %v2432_v26 = vadd.f32 %v3773_v46, %v4427_v63  ;;  %v3774_v0 = vpop.f32.mrf.mxu1 }
 0x28d   :  { %v2877_v1 = vadd.f32 %v2876_v48, %v2875_v47  ;;  %v2864_v2 = vrot.slane %v2863_v58, 2  ;;  %v2779_v3 = vsel %vm2651_vm1, %v2411_v51, %v2715_v59  ;;  %v2424_v4 = vadd.f32 %v4427_v63, %v2423_v56 }
 0x28e   :  { %v2849_v5 = vadd.f32 %v2848_v61, %v2847_v54  ;;  %v2882_v6 = vrot.slane %v2881_v62, 2  ;;  %v2868_v7 = vrot.slane %v2779_v3, 4  ;;  %vm2656_vm2 = vcmp.ge.f32.partialorder %v2432_v26, 0.0  ;;  %v2426_v8 = vpop.f32.mrf.mxu1 }
 0x28f   :  { %v2878_v9 = vrot.slane %v2877_v1, 1  ;;  %v2865_v10 = vadd.f32 %v2864_v2, %v2863_v58  ;;  %v2720_v11 = vmul.f32 0.2, %v2432_v26  ;;  %vm2654_vm4 = vcmp.ge.f32.partialorder %v2424_v4, 0.0 }
 0x290   :  { %v3287_v12 = vsel %vm3286_vm11, %v2849_v5, %v2843_v52  ;;  %v2883_v13 = vadd.f32 %v2882_v6, %v2881_v62  ;;  %v2869_v14 = vadd.f32 %v2868_v7, %v2779_v3  ;;  %v2718_v15 = vmul.f32 0.2, %v2424_v4  ;;  %v3777_v16 = vpop.f32.mrf.mxu1 }
 0x291   :  { %v3289_v17 = vsel %vm3288_vm13, %v2855_v42, %v3287_v12  ;;  %v2879_v18 = vadd.f32 %v2878_v9, %v2877_v1  ;;  %v2866_v57 = vrot.slane %v2865_v10, 1  ;;  %v2784_v19 = vsel %vm2656_vm2, %v2432_v26, %v2720_v11 }
 0x292   :  { %v3291_v20 = vsel %vm3290_vm14, %v2861_v60, %v3289_v17  ;;  %v2884_v25 = vrot.slane %v2883_v13, 1  ;;  %v2870_v21 = vrot.slane %v2869_v14, 2  ;;  %v2898_v22 = vrot.slane %v2784_v19, 4  ;;  %v2439_v23 = vpop.f32.mrf.mxu1 }
 0x293   :  { %v2867_v24 = vadd.f32 %v2866_v57, %v2865_v10  ;;  %v2782_v27 = vsel %vm2654_vm4, %v2424_v4, %v2718_v15  ;;  %v2435_v28 = vadd.f32 %v3774_v0, %v4427_v63  ;;  %v2427_v29 = vadd.f32 %v4427_v63, %v2426_v8 }
 0x294   :  { %v2885_v30 = vadd.f32 %v2884_v25, %v2883_v13  ;;  %v2871_v31 = vadd.f32 %v2870_v21, %v2869_v14  ;;  %v2899_v32 = vadd.f32 %v2898_v22, %v2784_v19  ;;  %v2886_v33 = vrot.slane %v2782_v27, 4  ;;  %v3778_v34 = vpop.f32.mrf.mxu1 }
 0x295   :  { %v3293_v35 = vsel %vm3292_vm0, %v2867_v24, %v3291_v20  ;;  %vm2657_vm6 = vcmp.ge.f32.partialorder %v2435_v28, 0.0  ;;  %v2721_v36 = vmul.f32 0.2, %v2435_v28  ;;  %vm2655_vm8 = vcmp.ge.f32.partialorder %v2427_v29, 0.0 }
 0x296   :  { %v2872_v37 = vrot.slane %v2871_v31, 1  ;;  %v2900_v38 = vrot.slane %v2899_v32, 2  ;;  %v2887_v39 = vadd.f32 %v2886_v33, %v2782_v27  ;;  %v2719_v40 = vmul.f32 0.2, %v2427_v29  ;;  %v2442_v41 = vpop.f32.mrf.mxu1 }
 0x297   :  { %v2785_v42 = vsel %vm2657_vm6, %v2435_v28, %v2721_v36  ;;  %v2448_v43 = vadd.f32 %v3777_v16, %v4427_v63  ;;  %v2440_v44 = vadd.f32 %v4427_v63, %v2439_v23  ;;  %v2451_v45 = vadd.f32 %v3778_v34, %v4427_v63 }
 0x298   :  { %v2873_v46 = vadd.f32 %v2872_v37, %v2871_v31  ;;  %v2901_v47 = vadd.f32 %v2900_v38, %v2899_v32  ;;  %v2888_v49 = vrot.slane %v2887_v39, 2  ;;  %v2904_v50 = vrot.slane %v2785_v42, 4  ;;  %v3781_v51 = vpop.f32.mrf.mxu1 }
 0x299   :  { %v2783_v52 = vsel %vm2655_vm8, %v2427_v29, %v2719_v40  ;;  %vm2660_vm9 = vcmp.ge.f32.partialorder %v2448_v43, 0.0  ;;  %v2724_v53 = vmul.f32 0.2, %v2448_v43  ;;  %vm2658_vm10 = vcmp.ge.f32.partialorder %v2440_v44, 0.0 }
 0x29a   :  { %v3295_v54 = vsel %vm3294_vm3, %v2873_v46, %v3293_v35  ;;  %v2902_v55 = vrot.slane %v2901_v47, 1  ;;  %v2889_v56 = vadd.f32 %v2888_v49, %v2887_v39  ;;  %v2905_v48 = vadd.f32 %v2904_v50, %v2785_v42  ;;  %v2455_v58 = vpop.f32.mrf.mxu1 }
 0x29b   :  { %v3297_v59 = vsel %vm3296_vm5, %v2879_v18, %v3295_v54  ;;  %v2892_v60 = vrot.slane %v2783_v52, 4  ;;  %v2788_v61 = vsel %vm2660_vm9, %v2448_v43, %v2724_v53  ;;  %v2722_v62 = vmul.f32 0.2, %v2440_v44 }
 0x29c   :  { %v3299_v26 = vsel %vm3298_vm7, %v2885_v30, %v3297_v59  ;;  %v2903_v0 = vadd.f32 %v2902_v55, %v2901_v47  ;;  %v2890_v1 = vrot.slane %v2889_v56, 1  ;;  %v2906_v2 = vrot.slane %v2905_v48, 2  ;;  %v3782_v3 = vpop.f32.mrf.mxu1 }
 0x29d   :  { %3357 = vst [vmem:[%s4685_s7] sm:$0xff] %v3299_v26  ;;  %v2893_v4 = vadd.f32 %v2892_v60, %v2783_v52  ;;  %v2922_v5 = vrot.slane %v2788_v61, 4  ;;  %v2786_v6 = vsel %vm2658_vm10, %v2440_v44, %v2722_v62  ;;  %vm2661_vm12 = vcmp.ge.f32.partialorder %v2451_v45, 0.0 }
 0x29e   :  { %v2891_v7 = vadd.f32 %v2890_v1, %v2889_v56  ;;  %v2907_v8 = vadd.f32 %v2906_v2, %v2905_v48  ;;  %v2910_v9 = vrot.slane %v2786_v6, 4  ;;  %v2725_v10 = vmul.f32 0.2, %v2451_v45  ;;  %v2458_v11 = vpop.f32.mrf.mxu1 }
 0x29f   :  { %v2894_v12 = vrot.slane %v2893_v4, 2  ;;  %v2923_v13 = vadd.f32 %v2922_v5, %v2788_v61  ;;  %v2443_v14 = vadd.f32 %v4427_v63, %v2442_v41  ;;  %v2464_v15 = vadd.f32 %v3781_v51, %v4427_v63 }
 0x2a0   :  { %v2908_v16 = vrot.slane %v2907_v8, 1  ;;  %v2911_v17 = vadd.f32 %v2910_v9, %v2786_v6  ;;  %v2789_v18 = vsel %vm2661_vm12, %v2451_v45, %v2725_v10  ;;  %v2456_v57 = vadd.f32 %v4427_v63, %v2455_v58  ;;  %v3785_v19 = vpop.f32.mrf.mxu1 }
 0x2a1   :  { %v2895_v20 = vadd.f32 %v2894_v12, %v2893_v4  ;;  %v2924_v25 = vrot.slane %v2923_v13, 2  ;;  %v2928_v21 = vrot.slane %v2789_v18, 4  ;;  %vm2659_vm15 = vcmp.ge.f32.partialorder %v2443_v14, 0.0 }
 0x2a2   :  { %v2909_v22 = vadd.f32 %v2908_v16, %v2907_v8  ;;  %v2912_v23 = vrot.slane %v2911_v17, 2  ;;  %v2723_v24 = vmul.f32 0.2, %v2443_v14  ;;  %vm2664_vm1 = vcmp.ge.f32.partialorder %v2464_v15, 0.0  ;;  %v2471_v27 = vpop.f32.mrf.mxu1 }
 0x2a3   :  { %v2896_v28 = vrot.slane %v2895_v20, 1  ;;  %v2925_v29 = vadd.f32 %v2924_v25, %v2923_v13  ;;  %v2929_v30 = vadd.f32 %v2928_v21, %v2789_v18  ;;  %v2728_v31 = vmul.f32 0.2, %v2464_v15 }
 0x2a4   :  { %v2913_v32 = vadd.f32 %v2912_v23, %v2911_v17  ;;  %v2787_v33 = vsel %vm2659_vm15, %v2443_v14, %v2723_v24  ;;  %vm2662_vm2 = vcmp.ge.f32.partialorder %v2456_v57, 0.0  ;;  %v2726_v34 = vmul.f32 0.2, %v2456_v57  ;;  %v4460_v35 = vpop.f32.mrf.mxu1 }
 0x2a5   :  { %v2897_v36 = vadd.f32 %v2896_v28, %v2895_v20  ;;  %v2926_v37 = vrot.slane %v2925_v29, 1  ;;  %v2930_v38 = vrot.slane %v2929_v30, 2  ;;  %v2916_v39 = vrot.slane %v2787_v33, 4 }
 0x2a6   :  { %v2914_v40 = vrot.slane %v2913_v32, 1  ;;  %v2792_v41 = vsel %vm2664_vm1, %v2464_v15, %v2728_v31  ;;  %v2790_v42 = vsel %vm2662_vm2, %v2456_v57, %v2726_v34  ;;  %v2467_v43 = vadd.f32 %v3782_v3, %v4427_v63  ;;  %v4464_v44 = vpop.f32.mrf.mxu1 }
 0x2a7   :  { %v3300_v45 = vsel %vm3286_vm11, %v2897_v36, %v2891_v7  ;;  %v2927_v46 = vadd.f32 %v2926_v37, %v2925_v29  ;;  %v2931_v47 = vadd.f32 %v2930_v38, %v2929_v30  ;;  %v2917_v49 = vadd.f32 %v2916_v39, %v2787_v33 }
 0x2a8   :  { %v3301_v50 = vsel %vm3288_vm13, %v2903_v0, %v3300_v45  ;;  %v2915_v51 = vadd.f32 %v2914_v40, %v2913_v32  ;;  %v2946_v52 = vrot.slane %v2792_v41, 4  ;;  %v2934_v53 = vrot.slane %v2790_v42, 4  ;;  %v3789_v54 = vpop.f32.mrf.mxu1 }
 0x2a9   :  { %v3302_v55 = vsel %vm3290_vm14, %v2909_v22, %v3301_v50  ;;  %v2932_v56 = vrot.slane %v2931_v47, 1  ;;  %v2918_v48 = vrot.slane %v2917_v49, 2  ;;  %vm2665_vm4 = vcmp.ge.f32.partialorder %v2467_v43, 0.0 }
 0x2aa   :  { %v3303_v58 = vsel %vm3292_vm0, %v2915_v51, %v3302_v55  ;;  %v2947_v59 = vadd.f32 %v2946_v52, %v2792_v41  ;;  %v2935_v60 = vadd.f32 %v2934_v53, %v2790_v42  ;;  %v2729_v61 = vmul.f32 0.2, %v2467_v43  ;;  %v2487_v62 = vpop.f32.mrf.mxu1 }
 0x2ab   :  { %v2933_v26 = vadd.f32 %v2932_v56, %v2931_v47  ;;  %v2919_v1 = vadd.f32 %v2918_v48, %v2917_v49  ;;  %v2459_v2 = vadd.f32 %v4427_v63, %v2458_v11  ;;  %v2480_v0 = vadd.f32 %v3785_v19, %v4427_v63 }
 0x2ac   :  { %v2948_v3 = vrot.slane %v2947_v59, 2  ;;  %v2936_v4 = vrot.slane %v2935_v60, 2  ;;  %v2793_v5 = vsel %vm2665_vm4, %v2467_v43, %v2729_v61  ;;  %v2472_v6 = vadd.f32 %v4427_v63, %v2471_v27  ;;  %v4473_v7 = vpop.f32.mrf.mxu1 }
 0x2ad   :  { %v2920_v8 = vrot.slane %v2919_v1, 1  ;;  %v2952_v9 = vrot.slane %v2793_v5, 4  ;;  %vm2663_vm6 = vcmp.ge.f32.partialorder %v2459_v2, 0.0  ;;  %v2727_v10 = vmul.f32 0.2, %v2459_v2 }
 0x2ae   :  { %v2949_v12 = vadd.f32 %v2948_v3, %v2947_v59  ;;  %v2937_v13 = vadd.f32 %v2936_v4, %v2935_v60  ;;  %vm2668_vm8 = vcmp.ge.f32.partialorder %v2480_v0, 0.0  ;;  %v2732_v14 = vmul.f32 0.2, %v2480_v0  ;;  %v4475_v15 = vpop.f32.mrf.mxu1 }
 0x2af   :  { %v2921_v11 = vadd.f32 %v2920_v8, %v2919_v1  ;;  %v2953_v16 = vadd.f32 %v2952_v9, %v2793_v5  ;;  %v2791_v17 = vsel %vm2663_vm6, %v2459_v2, %v2727_v10  ;;  %vm2666_vm9 = vcmp.ge.f32.partialorder %v2472_v6, 0.0 }
 0x2b0   :  { %v2950_v18 = vrot.slane %v2949_v12, 1  ;;  %v2938_v57 = vrot.slane %v2937_v13, 1  ;;  %v2940_v19 = vrot.slane %v2791_v17, 4  ;;  %v2796_v20 = vsel %vm2668_vm8, %v2480_v0, %v2732_v14  ;;  %v4477_v25 = vpop.f32.mrf.mxu1 }
 0x2b1   :  { %v3304_v21 = vsel %vm3294_vm3, %v2921_v11, %v3303_v58  ;;  %v2954_v22 = vrot.slane %v2953_v16, 2  ;;  %v2970_v23 = vrot.slane %v2796_v20, 4  ;;  %v2730_v24 = vmul.f32 0.2, %v2472_v6 }
 0x2b2   :  { %v3305_v27 = vsel %vm3296_vm5, %v2927_v46, %v3304_v21  ;;  %v2951_v28 = vadd.f32 %v2950_v18, %v2949_v12  ;;  %v2939_v29 = vadd.f32 %v2938_v57, %v2937_v13  ;;  %v2941_v30 = vadd.f32 %v2940_v19, %v2791_v17  ;;  %v4481_v31 = vpop.f32.mrf.mxu1 }
 0x2b3   :  { %v3306_v32 = vsel %vm3298_vm7, %v2933_v26, %v3305_v27  ;;  %v2955_v33 = vadd.f32 %v2954_v22, %v2953_v16  ;;  %v2971_v34 = vadd.f32 %v2970_v23, %v2796_v20  ;;  %v2794_v36 = vsel %vm2666_vm9, %v2472_v6, %v2730_v24 }
 0x2b4   :  { %3358 = vst [vmem:[%s4685_s7 + $0x8] sm:$0xff] %v3306_v32  ;;  %v2942_v37 = vrot.slane %v2941_v30, 2  ;;  %v2958_v38 = vrot.slane %v2794_v36, 4  ;;  %v2483_v39 = vadd.f32 %v4460_v35, %v4427_v63  ;;  %v2475_v40 = vadd.f32 %v4427_v63, %v4464_v44  ;;  %v4492_v41 = vpop.f32.mrf.mxu1 }
 0x2b5   :  { %v2956_v42 = vrot.slane %v2955_v33, 1  ;;  %v2972_v43 = vrot.slane %v2971_v34, 2  ;;  %v2496_v45 = vadd.f32 %v3789_v54, %v4427_v63  ;;  %v2488_v46 = vadd.f32 %v4427_v63, %v2487_v62 }
 0x2b6   :  { %v2943_v47 = vadd.f32 %v2942_v37, %v2941_v30  ;;  %v2959_v49 = vadd.f32 %v2958_v38, %v2794_v36  ;;  %vm2669_vm10 = vcmp.ge.f32.partialorder %v2483_v39, 0.0  ;;  %v2733_v50 = vmul.f32 0.2, %v2483_v39  ;;  %v4496_v51 = vpop.f32.mrf.mxu1 }
 0x2b7   :  { %v2957_v52 = vadd.f32 %v2956_v42, %v2955_v33  ;;  %v2973_v53 = vadd.f32 %v2972_v43, %v2971_v34  ;;  %vm2667_vm12 = vcmp.ge.f32.partialorder %v2475_v40, 0.0  ;;  %v2731_v35 = vmul.f32 0.2, %v2475_v40 }
 0x2b8   :  { %v2944_v55 = vrot.slane %v2943_v47, 1  ;;  %v2960_v44 = vrot.slane %v2959_v49, 2  ;;  %v2797_v56 = vsel %vm2669_vm10, %v2483_v39, %v2733_v50  ;;  %vm2672_vm15 = vcmp.ge.f32.partialorder %v2496_v45, 0.0  ;;  %v4498_v48 = vpop.f32.mrf.mxu1 }
 0x2b9   :  { %v2974_v58 = vrot.slane %v2973_v53, 1  ;;  %v2976_v54 = vrot.slane %v2797_v56, 4  ;;  %v2795_v59 = vsel %vm2667_vm12, %v2475_v40, %v2731_v35  ;;  %v2736_v60 = vmul.f32 0.2, %v2496_v45 }
 0x2ba   :  { %v2945_v61 = vadd.f32 %v2944_v55, %v2943_v47  ;;  %v2961_v62 = vadd.f32 %v2960_v44, %v2959_v49  ;;  %v2964_v26 = vrot.slane %v2795_v59, 4  ;;  %vm2670_vm1 = vcmp.ge.f32.partialorder %v2488_v46, 0.0  ;;  %v4500_v1 = vpop.f32.mrf.mxu1 }
 0x2bb   :  { %v2975_v2 = vadd.f32 %v2974_v58, %v2973_v53  ;;  %v2977_v0 = vadd.f32 %v2976_v54, %v2797_v56  ;;  %v2800_v3 = vsel %vm2672_vm15, %v2496_v45, %v2736_v60  ;;  %v2734_v4 = vmul.f32 0.2, %v2488_v46 }
 0x2bc   :  { %v3307_v5 = vsel %vm3286_vm11, %v2945_v61, %v2939_v29  ;;  %v2962_v6 = vrot.slane %v2961_v62, 1  ;;  %v2965_v8 = vadd.f32 %v2964_v26, %v2795_v59  ;;  %v2994_v9 = vrot.slane %v2800_v3, 4  ;;  %v4503_v10 = vpop.f32.mrf.mxu1 }
 0x2bd   :  { %v3308_v12 = vsel %vm3288_vm13, %v2951_v28, %v3307_v5  ;;  %v2978_v13 = vrot.slane %v2977_v0, 2  ;;  %v2798_v14 = vsel %vm2670_vm1, %v2488_v46, %v2734_v4  ;;  %v2499_v11 = vadd.f32 %v4473_v7, %v4427_v63 }
 0x2be   :  { %v2963_v16 = vadd.f32 %v2962_v6, %v2961_v62  ;;  %v3309_v17 = vsel %vm3290_vm14, %v2957_v52, %v3308_v12  ;;  %v2966_v18 = vrot.slane %v2965_v8, 2  ;;  %v2995_v57 = vadd.f32 %v2994_v9, %v2800_v3  ;;  %v4509_v19 = vpop.f32.mrf.mxu1 }
 0x2bf   :  { %v2979_v20 = vadd.f32 %v2978_v13, %v2977_v0  ;;  %v2982_v21 = vrot.slane %v2798_v14, 4  ;;  %vm2673_vm2 = vcmp.ge.f32.partialorder %v2499_v11, 0.0  ;;  %v2737_v22 = vmul.f32 0.2, %v2499_v11 }
 0x2c0   :  { %v3310_v23 = vsel %vm3292_vm0, %v2963_v16, %v3309_v17  ;;  %v2967_v24 = vadd.f32 %v2966_v18, %v2965_v8  ;;  %v2996_v27 = vrot.slane %v2995_v57, 2  ;;  %v2491_v28 = vadd.f32 %v4427_v63, %v4475_v15  ;;  %v4514_v29 = vpop.f32.mrf.mxu1 }
 0x2c1   :  { %v2980_v7 = vrot.slane %v2979_v20, 1  ;;  %v2983_v30 = vadd.f32 %v2982_v21, %v2798_v14  ;;  %v2801_v32 = vsel %vm2673_vm2, %v2499_v11, %v2737_v22  ;;  %v2512_v33 = vadd.f32 %v4477_v25, %v4427_v63 }
 0x2c2   :  { %v2968_v34 = vrot.slane %v2967_v24, 1  ;;  %v2997_v36 = vadd.f32 %v2996_v27, %v2995_v57  ;;  %v3000_v37 = vrot.slane %v2801_v32, 4  ;;  %vm2671_vm4 = vcmp.ge.f32.partialorder %v2491_v28, 0.0  ;;  %v4518_v38 = vpop.f32.mrf.mxu1 }
 0x2c3   :  { %v2981_v39 = vadd.f32 %v2980_v7, %v2979_v20  ;;  %v2984_v40 = vrot.slane %v2983_v30, 2  ;;  %v2735_v42 = vmul.f32 0.2, %v2491_v28  ;;  %vm2676_vm6 = vcmp.ge.f32.partialorder %v2512_v33, 0.0 }
 0x2c4   :  { %v2969_v43 = vadd.f32 %v2968_v34, %v2967_v24  ;;  %v2998_v15 = vrot.slane %v2997_v36, 1  ;;  %v3001_v45 = vadd.f32 %v3000_v37, %v2801_v32  ;;  %v2740_v46 = vmul.f32 0.2, %v2512_v33  ;;  %v4520_v47 = vpop.f32.mrf.mxu1 }
 0x2c5   :  { %v2985_v49 = vadd.f32 %v2984_v40, %v2983_v30  ;;  %v2799_v50 = vsel %vm2671_vm4, %v2491_v28, %v2735_v42  ;;  %v2504_v25 = vadd.f32 %v4427_v63, %v4481_v31  ;;  %v2515_v52 = vadd.f32 %v4492_v41, %v4427_v63 }
 0x2c6   :  { %v3311_v53 = vsel %vm3294_vm3, %v2969_v43, %v3310_v23  ;;  %v2999_v35 = vadd.f32 %v2998_v15, %v2997_v36  ;;  %v3002_v55 = vrot.slane %v3001_v45, 2  ;;  %v2988_v44 = vrot.slane %v2799_v50, 4  ;;  %v4527_v56 = vpop.f32.mrf.mxu1 }
 0x2c7   :  { %v3312_v58 = vsel %vm3296_vm5, %v2975_v2, %v3311_v53  ;;  %v2986_v54 = vrot.slane %v2985_v49, 1  ;;  %v2804_v59 = vsel %vm2676_vm6, %v2512_v33, %v2740_v46  ;;  %vm2674_vm8 = vcmp.ge.f32.partialorder %v2504_v25, 0.0 }
 0x2c8   :  { %v3313_v60 = vsel %vm3298_vm7, %v2981_v39, %v3312_v58  ;;  %v3003_v61 = vadd.f32 %v3002_v55, %v3001_v45  ;;  %v2989_v31 = vadd.f32 %v2988_v44, %v2799_v50  ;;  %v3018_v62 = vrot.slane %v2804_v59, 4  ;;  %v4532_v26 = vpop.f32.mrf.mxu1 }
 0x2c9   :  { %3359 = vst [vmem:[%s4685_s7 + $0x10] sm:$0xff] %v3313_v60  ;;  %v2987_v41 = vadd.f32 %v2986_v54, %v2985_v49  ;;  %v2738_v0 = vmul.f32 0.2, %v2504_v25  ;;  %vm2677_vm9 = vcmp.ge.f32.partialorder %v2515_v52, 0.0  ;;  %v2741_v3 = vmul.f32 0.2, %v2515_v52 }
 0x2ca   :  { %v3004_v2 = vrot.slane %v3003_v61, 1  ;;  %v2990_v4 = vrot.slane %v2989_v31, 2  ;;  %v3019_v5 = vadd.f32 %v3018_v62, %v2804_v59  ;;  %v2507_v6 = vadd.f32 %v4427_v63, %v4496_v51  ;;  %v4539_v8 = vpop.f32.mrf.mxu1 }
 0x2cb   :  { %v2802_v9 = vsel %vm2674_vm8, %v2504_v25, %v2738_v0  ;;  %v2805_v12 = vsel %vm2677_vm9, %v2515_v52, %v2741_v3  ;;  %v2528_v13 = vadd.f32 %v4498_v48, %v4427_v63  ;;  %v2520_v14 = vadd.f32 %v4427_v63, %v4500_v1 }
 0x2cc   :  { %v3005_v11 = vadd.f32 %v3004_v2, %v3003_v61  ;;  %v2991_v16 = vadd.f32 %v2990_v4, %v2989_v31  ;;  %v3020_v17 = vrot.slane %v3019_v5, 2  ;;  %v3006_v18 = vrot.slane %v2802_v9, 4  ;;  %v4546_v57 = vpop.f32.mrf.mxu1 }
 0x2cd   :  { %v3024_v20 = vrot.slane %v2805_v12, 4  ;;  %vm2675_vm10 = vcmp.ge.f32.partialorder %v2507_v6, 0.0  ;;  %v2739_v51 = vmul.f32 0.2, %v2507_v6  ;;  %vm2680_vm12 = vcmp.ge.f32.partialorder %v2528_v13, 0.0 }
 0x2ce   :  { %v2992_v21 = vrot.slane %v2991_v16, 1  ;;  %v3021_v22 = vadd.f32 %v3020_v17, %v3019_v5  ;;  %v3007_v23 = vadd.f32 %v3006_v18, %v2802_v9  ;;  %v2744_v24 = vmul.f32 0.2, %v2528_v13  ;;  %v4548_v27 = vpop.f32.mrf.mxu1 }
 0x2cf   :  { %v3025_v48 = vadd.f32 %v3024_v20, %v2805_v12  ;;  %v2803_v28 = vsel %vm2675_vm10, %v2507_v6, %v2739_v51  ;;  %vm2678_vm15 = vcmp.ge.f32.partialorder %v2520_v14, 0.0  ;;  %v2742_v1 = vmul.f32 0.2, %v2520_v14 }
 0x2d0   :  { %v2993_v7 = vadd.f32 %v2992_v21, %v2991_v16  ;;  %v3022_v30 = vrot.slane %v3021_v22, 1  ;;  %v3008_v32 = vrot.slane %v3007_v23, 2  ;;  %v3012_v33 = vrot.slane %v2803_v28, 4  ;;  %v4553_v45 = vpop.f32.mrf.mxu1 }
 0x2d1   :  { %v3026_v34 = vrot.slane %v3025_v48, 2  ;;  %v2808_v36 = vsel %vm2680_vm12, %v2528_v13, %v2744_v24  ;;  %v2806_v37 = vsel %vm2678_vm15, %v2520_v14, %v2742_v1  ;;  %v2531_v39 = vadd.f32 %v4503_v10, %v4427_v63 }
 0x2d2   :  { %v3314_v40 = vsel %vm3286_vm11, %v2993_v7, %v2987_v41  ;;  %v3023_v42 = vadd.f32 %v3022_v30, %v3021_v22  ;;  %v3009_v43 = vadd.f32 %v3008_v32, %v3007_v23  ;;  %v3013_v15 = vadd.f32 %v3012_v33, %v2803_v28  ;;  %v4561_v31 = vpop.f32.mrf.mxu1 }
 0x2d3   :  { %v3315_v46 = vsel %vm3288_vm13, %v2999_v35, %v3314_v40  ;;  %v3027_v49 = vadd.f32 %v3026_v34, %v3025_v48  ;;  %v3042_v50 = vrot.slane %v2808_v36, 4  ;;  %v3030_v25 = vrot.slane %v2806_v37, 4 }
 0x2d4   :  { %v3010_v52 = vrot.slane %v3009_v43, 1  ;;  %v3316_v53 = vsel %vm3290_vm14, %v3005_v11, %v3315_v46  ;;  %v3014_v55 = vrot.slane %v3013_v15, 2  ;;  %vm2681_vm1 = vcmp.ge.f32.partialorder %v2531_v39, 0.0  ;;  %v4566_v11 = vpop.f32.mrf.mxu1 }
 0x2d5   :  { %v3028_v44 = vrot.slane %v3027_v49, 1  ;;  %v3043_v58 = vadd.f32 %v3042_v50, %v2808_v36  ;;  %v3031_v10 = vadd.f32 %v3030_v25, %v2806_v37  ;;  %v2745_v54 = vmul.f32 0.2, %v2531_v39 }
 0x2d6   :  { %v3011_v59 = vadd.f32 %v3010_v52, %v3009_v43  ;;  %v3015_v60 = vadd.f32 %v3014_v55, %v3013_v15  ;;  %v2523_v61 = vadd.f32 %v4427_v63, %v4509_v19  ;;  %v2544_v35 = vadd.f32 %v4514_v29, %v4427_v63  ;;  %v4573_v30 = vpop.f32.mrf.mxu1 }
 0x2d7   :  { %v3029_v62 = vadd.f32 %v3028_v44, %v3027_v49  ;;  %v3044_v41 = vrot.slane %v3043_v58, 2  ;;  %v3032_v0 = vrot.slane %v3031_v10, 2  ;;  %v2809_v3 = vsel %vm2681_vm1, %v2531_v39, %v2745_v54 }
 0x2d8   :  { %v3317_v2 = vsel %vm3292_vm0, %v3011_v59, %v3316_v53  ;;  %v3016_v4 = vrot.slane %v3015_v60, 1  ;;  %v3048_v5 = vrot.slane %v2809_v3, 4  ;;  %vm2679_vm2 = vcmp.ge.f32.partialorder %v2523_v61, 0.0  ;;  %v4584_v52 = vpop.f32.mrf.mxu1 }
 0x2d9   :  { %v3045_v6 = vadd.f32 %v3044_v41, %v3043_v58  ;;  %v3033_v9 = vadd.f32 %v3032_v0, %v3031_v10  ;;  %v2743_v12 = vmul.f32 0.2, %v2523_v61  ;;  %vm2684_vm4 = vcmp.ge.f32.partialorder %v2544_v35, 0.0 }
 0x2da   :  { %v3017_v13 = vadd.f32 %v3016_v4, %v3015_v60  ;;  %v3049_v19 = vadd.f32 %v3048_v5, %v2809_v3  ;;  %v2748_v14 = vmul.f32 0.2, %v2544_v35  ;;  %v2536_v29 = vadd.f32 %v4427_v63, %v4518_v38 }
 0x2db   :  { %v3046_v16 = vrot.slane %v3045_v6, 1  ;;  %v3034_v17 = vrot.slane %v3033_v9, 1  ;;  %v2807_v18 = vsel %vm2679_vm2, %v2523_v61, %v2743_v12  ;;  %v2547_v20 = vadd.f32 %v4520_v47, %v4427_v63 }
 0x2dc   :  { %v3318_v51 = vsel %vm3294_vm3, %v3017_v13, %v3317_v2  ;;  %v3050_v21 = vrot.slane %v3049_v19, 2  ;;  %v3036_v22 = vrot.slane %v2807_v18, 4  ;;  %v2812_v23 = vsel %vm2684_vm4, %v2544_v35, %v2748_v14 }
 0x2dd   :  { %v3319_v24 = vsel %vm3296_vm5, %v3023_v42, %v3318_v51  ;;  %v3047_v48 = vadd.f32 %v3046_v16, %v3045_v6  ;;  %v3066_v28 = vrot.slane %v2812_v23, 4  ;;  %vm2682_vm6 = vcmp.ge.f32.partialorder %v2536_v29, 0.0 }
 0x2de   :  { %v3320_v1 = vsel %vm3298_vm7, %v3029_v62, %v3319_v24  ;;  %v3051_v38 = vadd.f32 %v3050_v21, %v3049_v19  ;;  %v3037_v7 = vadd.f32 %v3036_v22, %v2807_v18  ;;  %v2746_v32 = vmul.f32 0.2, %v2536_v29  ;;  %v4586_v62 = vpop.f32.mrf.mxu1 }
 0x2df   :  { %3360 = vst [vmem:[%s4685_s7 + $0x18] sm:$0xff] %v3320_v1  ;;  %v3067_v47 = vadd.f32 %v3066_v28, %v2812_v23  ;;  %vm2685_vm8 = vcmp.ge.f32.partialorder %v2547_v20, 0.0  ;;  %v2749_v33 = vmul.f32 0.2, %v2547_v20  ;;  %v3035_v34 = vadd.f32 %v3034_v17, %v3033_v9 }
 0x2e0   :  { %v3038_v36 = vrot.slane %v3037_v7, 2  ;;  %v2539_v37 = vadd.f32 %v4427_v63, %v4527_v56  ;;  %v2560_v39 = vadd.f32 %v4532_v26, %v4427_v63  ;;  %v2810_v42 = vsel %vm2682_vm6, %v2536_v29, %v2746_v32  ;;  %v4592_v18 = vpop.f32.mrf.mxu1 }
 0x2e1   :  { %v3068_v40 = vrot.slane %v3067_v47, 2  ;;  %v2813_v43 = vsel %vm2685_vm8, %v2547_v20, %v2749_v33  ;;  %v2552_v15 = vadd.f32 %v4427_v63, %v4539_v8  ;;  %v3052_v46 = vrot.slane %v3051_v38, 1 }
 0x2e2   :  { %v3039_v49 = vadd.f32 %v3038_v36, %v3037_v7  ;;  %v3054_v50 = vrot.slane %v2810_v42, 4  ;;  %v3072_v25 = vrot.slane %v2813_v43, 4  ;;  %vm2683_vm9 = vcmp.ge.f32.partialorder %v2539_v37, 0.0 }
 0x2e3   :  { %v3069_v53 = vadd.f32 %v3068_v40, %v3067_v47  ;;  %v2747_v55 = vmul.f32 0.2, %v2539_v37  ;;  %vm2688_vm10 = vcmp.ge.f32.partialorder %v2560_v39, 0.0  ;;  %v2752_v26 = vmul.f32 0.2, %v2560_v39 }
 0x2e4   :  { %v3040_v56 = vrot.slane %v3039_v49, 1  ;;  %v3055_v44 = vadd.f32 %v3054_v50, %v2810_v42  ;;  %v3073_v58 = vadd.f32 %v3072_v25, %v2813_v43  ;;  %vm2686_vm12 = vcmp.ge.f32.partialorder %v2552_v15, 0.0 }
 0x2e5   :  { %v3070_v10 = vrot.slane %v3069_v53, 1  ;;  %v2811_v54 = vsel %vm2683_vm9, %v2539_v37, %v2747_v55  ;;  %v2750_v59 = vmul.f32 0.2, %v2552_v15  ;;  %v3053_v41 = vadd.f32 %v3052_v46, %v3051_v38 }
 0x2e6   :  { %v3041_v60 = vadd.f32 %v3040_v56, %v3039_v49  ;;  %v3056_v8 = vrot.slane %v3055_v44, 2  ;;  %v3074_v61 = vrot.slane %v3073_v58, 2  ;;  %v3060_v35 = vrot.slane %v2811_v54, 4 }
 0x2e7   :  { %v2816_v0 = vsel %vm2688_vm10, %v2560_v39, %v2752_v26  ;;  %v2814_v3 = vsel %vm2686_vm12, %v2552_v15, %v2750_v59  ;;  %v2563_v2 = vadd.f32 %v4546_v57, %v4427_v63  ;;  %v3071_v13 = vadd.f32 %v3070_v10, %v3069_v53 }
 0x2e8   :  { %v3321_v4 = vsel %vm3286_vm11, %v3041_v60, %v3035_v34  ;;  %v3057_v5 = vadd.f32 %v3056_v8, %v3055_v44  ;;  %v3075_v6 = vadd.f32 %v3074_v61, %v3073_v58  ;;  %v3061_v9 = vadd.f32 %v3060_v35, %v2811_v54  ;;  %v4599_v34 = vpop.f32.mrf.mxu1 }
 0x2e9   :  { %v3322_v12 = vsel %vm3288_vm13, %v3047_v48, %v3321_v4  ;;  %v3090_v19 = vrot.slane %v2816_v0, 4  ;;  %v3078_v14 = vrot.slane %v2814_v3, 4  ;;  %vm2689_vm15 = vcmp.ge.f32.partialorder %v2563_v2, 0.0 }
 0x2ea   :  { %v3058_v29 = vrot.slane %v3057_v5, 1  ;;  %v3076_v16 = vrot.slane %v3075_v6, 1  ;;  %v3062_v17 = vrot.slane %v3061_v9, 2  ;;  %v2753_v21 = vmul.f32 0.2, %v2563_v2  ;;  %v4610_v56 = vpop.f32.mrf.mxu1 }
 0x2eb   :  { %v3091_v20 = vadd.f32 %v3090_v19, %v2816_v0  ;;  %v3079_v51 = vadd.f32 %v3078_v14, %v2814_v3  ;;  %v2555_v57 = vadd.f32 %v4427_v63, %v4548_v27  ;;  %v3323_v23 = vsel %vm3290_vm14, %v3053_v41, %v3322_v12 }
 0x2ec   :  { %v3059_v22 = vadd.f32 %v3058_v29, %v3057_v5  ;;  %v3063_v24 = vadd.f32 %v3062_v17, %v3061_v9  ;;  %v2576_v48 = vadd.f32 %v4553_v45, %v4427_v63  ;;  %v2817_v38 = vsel %vm2689_vm15, %v2563_v2, %v2753_v21  ;;  %v4604_v63 = vld [vmem:[%s4684_s6] ss:$0 sm:$0xff]  ;;  %v4625_v4 = vpop.f32.mrf.mxu1 }
 0x2ed   :  { %v3092_v28 = vrot.slane %v3091_v20, 2  ;;  %v3080_v1 = vrot.slane %v3079_v51, 2  ;;  %vm2687_vm1 = vcmp.ge.f32.partialorder %v2555_v57, 0.0  ;;  %v3077_v7 = vadd.f32 %v3076_v16, %v3075_v6 }
 0x2ee   :  { %v3064_v47 = vrot.slane %v3063_v24, 1  ;;  %v3096_v32 = vrot.slane %v2817_v38, 4  ;;  %v2751_v33 = vmul.f32 0.2, %v2555_v57  ;;  %vm2692_vm2 = vcmp.ge.f32.partialorder %v2576_v48, 0.0 }
 0x2ef   :  { %v3093_v36 = vadd.f32 %v3092_v28, %v3091_v20  ;;  %v3081_v37 = vadd.f32 %v3080_v1, %v3079_v51  ;;  %v2756_v27 = vmul.f32 0.2, %v2576_v48  ;;  %v2568_v45 = vadd.f32 %v4604_v63, %v4561_v31  ;;  %v4627_v20 = vpop.f32.mrf.mxu1 }
 0x2f0   :  { %v3065_v39 = vadd.f32 %v3064_v47, %v3063_v24  ;;  %v3097_v40 = vadd.f32 %v3096_v32, %v2817_v38  ;;  %v2815_v42 = vsel %vm2687_vm1, %v2555_v57, %v2751_v33  ;;  %v3324_v43 = vsel %vm3292_vm0, %v3059_v22, %v3323_v23 }
 0x2f1   :  { %v3094_v15 = vrot.slane %v3093_v36, 1  ;;  %v3084_v46 = vrot.slane %v2815_v42, 4  ;;  %v2820_v49 = vsel %vm2692_vm2, %v2576_v48, %v2756_v27  ;;  %v3082_v25 = vrot.slane %v3081_v37, 1 }
 0x2f2   :  { %v3325_v50 = vsel %vm3294_vm3, %v3065_v39, %v3324_v43  ;;  %v3098_v53 = vrot.slane %v3097_v40, 2  ;;  %v3114_v55 = vrot.slane %v2820_v49, 4  ;;  %vm2690_vm4 = vcmp.ge.f32.partialorder %v2568_v45, 0.0 }
 0x2f3   :  { %v3326_v44 = vsel %vm3296_vm5, %v3071_v13, %v3325_v50  ;;  %v3095_v58 = vadd.f32 %v3094_v15, %v3093_v36  ;;  %v3085_v26 = vadd.f32 %v3084_v46, %v2815_v42  ;;  %v2754_v59 = vmul.f32 0.2, %v2568_v45  ;;  %v2602_v36 = vpop.f32.mrf.mxu1 }
 0x2f4   :  { %v3327_v10 = vsel %vm3298_vm7, %v3077_v7, %v3326_v44  ;;  %v3099_v31 = vadd.f32 %v3098_v53, %v3097_v40  ;;  %v3115_v54 = vadd.f32 %v3114_v55, %v2820_v49  ;;  %v2579_v8 = vadd.f32 %v4604_v63, %v4566_v11 }
 0x2f5   :  { %3361 = vst [vmem:[%s4685_s7 + $0x20] sm:$0xff] %v3327_v10  ;;  %v3086_v60 = vrot.slane %v3085_v26, 2  ;;  %v2571_v61 = vadd.f32 %v4604_v63, %v4573_v30  ;;  %v2592_v35 = vadd.f32 %v4604_v63, %v4584_v52  ;;  %v2818_v3 = vsel %vm2690_vm4, %v2568_v45, %v2754_v59  ;;  %v3821_v44 = vpop.f32.mrf.mxu1 }
 0x2f6   :  { %v3100_v41 = vrot.slane %v3099_v31, 1  ;;  %v3116_v0 = vrot.slane %v3115_v54, 2  ;;  %v2584_v2 = vadd.f32 %v4604_v63, %v4586_v62  ;;  %v3102_v6 = vrot.slane %v2818_v3, 4 }
 0x2f7   :  { %v3087_v5 = vadd.f32 %v3086_v60, %v3085_v26  ;;  %vm2693_vm6 = vcmp.ge.f32.partialorder %v2579_v8, 0.0  ;;  %v2757_v9 = vmul.f32 0.2, %v2579_v8  ;;  %v3083_v12 = vadd.f32 %v3082_v25, %v3081_v37 }
 0x2f8   :  { %v3117_v11 = vadd.f32 %v3116_v0, %v3115_v54  ;;  %vm2691_vm8 = vcmp.ge.f32.partialorder %v2571_v61, 0.0  ;;  %v2755_v13 = vmul.f32 0.2, %v2571_v61  ;;  %v3103_v19 = vadd.f32 %v3102_v6, %v2818_v3  ;;  %v2615_v3 = vpop.f32.mrf.mxu1 }
 0x2f9   :  { %v3088_v30 = vrot.slane %v3087_v5, 1  ;;  %v2821_v14 = vsel %vm2693_vm6, %v2579_v8, %v2757_v9  ;;  %vm2696_vm9 = vcmp.ge.f32.partialorder %v2592_v35, 0.0  ;;  %v3101_v52 = vadd.f32 %v3100_v41, %v3099_v31 }
 0x2fa   :  { %v3120_v29 = vrot.slane %v2821_v14, 4  ;;  %v2819_v16 = vsel %vm2691_vm8, %v2571_v61, %v2755_v13  ;;  %v2760_v17 = vmul.f32 0.2, %v2592_v35  ;;  %v3104_v51 = vrot.slane %v3103_v19, 2 }
 0x2fb   :  { %v3089_v62 = vadd.f32 %v3088_v30, %v3087_v5  ;;  %v3108_v21 = vrot.slane %v2819_v16, 4  ;;  %vm2694_vm10 = vcmp.ge.f32.partialorder %v2584_v2, 0.0  ;;  %v3118_v57 = vrot.slane %v3117_v11, 1 }
 0x2fc   :  { %v3121_v22 = vadd.f32 %v3120_v29, %v2821_v14  ;;  %v2824_v23 = vsel %vm2696_vm9, %v2592_v35, %v2760_v17  ;;  %v2758_v24 = vmul.f32 0.2, %v2584_v2  ;;  %v3105_v28 = vadd.f32 %v3104_v51, %v3103_v19  ;;  %v3822_v17 = vpop.f32.mrf.mxu1 }
 0x2fd   :  { %v3328_v48 = vsel %vm3286_vm11, %v3089_v62, %v3083_v12  ;;  %v3109_v1 = vadd.f32 %v3108_v21, %v2819_v16  ;;  %v3138_v38 = vrot.slane %v2824_v23, 4  ;;  %v2595_v33 = vadd.f32 %v4604_v63, %v4592_v18 }
 0x2fe   :  { %v3329_v7 = vsel %vm3288_vm13, %v3095_v58, %v3328_v48  ;;  %v3122_v47 = vrot.slane %v3121_v22, 2  ;;  %v2822_v32 = vsel %vm2694_vm10, %v2584_v2, %v2758_v24  ;;  %v3106_v37 = vrot.slane %v3105_v28, 1 }
 0x2ff   :  { %v3330_v27 = vsel %vm3290_vm14, %v3101_v52, %v3329_v7  ;;  %v3110_v39 = vrot.slane %v3109_v1, 2  ;;  %v3139_v40 = vadd.f32 %v3138_v38, %v2824_v23  ;;  %v3126_v45 = vrot.slane %v2822_v32, 4 }
 0x300   :  { %v3123_v42 = vadd.f32 %v3122_v47, %v3121_v22  ;;  %vm2697_vm12 = vcmp.ge.f32.partialorder %v2595_v33, 0.0  ;;  %v2761_v43 = vmul.f32 0.2, %v2595_v33  ;;  %v3107_v15 = vadd.f32 %v3106_v37, %v3105_v28  ;;  %v2618_v47 = vpop.f32.mrf.mxu1 }
 0x301   :  { %v3111_v46 = vadd.f32 %v3110_v39, %v3109_v1  ;;  %v3140_v49 = vrot.slane %v3139_v40, 2  ;;  %v2587_v50 = vadd.f32 %v4604_v63, %v4599_v34  ;;  %v3119_v25 = vadd.f32 %v3118_v57, %v3117_v11 }
 0x302   :  { %v3127_v53 = vadd.f32 %v3126_v45, %v2822_v32  ;;  %v2825_v55 = vsel %vm2697_vm12, %v2595_v33, %v2761_v43  ;;  %v2608_v18 = vadd.f32 %v4604_v63, %v4610_v56  ;;  %v3124_v58 = vrot.slane %v3123_v42, 1 }
 0x303   :  { %v3112_v26 = vrot.slane %v3111_v46, 1  ;;  %v3141_v10 = vadd.f32 %v3140_v49, %v3139_v40  ;;  %v3144_v31 = vrot.slane %v2825_v55, 4  ;;  %v3331_v54 = vsel %vm3292_vm0, %v3107_v15, %v3330_v27 }
 0x304   :  { %v3128_v59 = vrot.slane %v3127_v53, 2  ;;  %vm2695_vm15 = vcmp.ge.f32.partialorder %v2587_v50, 0.0  ;;  %v2759_v60 = vmul.f32 0.2, %v2587_v50  ;;  %vm2700_vm1 = vcmp.ge.f32.partialorder %v2608_v18, 0.0 }
 0x305   :  { %v3113_v8 = vadd.f32 %v3112_v26, %v3111_v46  ;;  %v3142_v61 = vrot.slane %v3141_v10, 1  ;;  %v3145_v35 = vadd.f32 %v3144_v31, %v2825_v55  ;;  %v2764_v0 = vmul.f32 0.2, %v2608_v18 }
 0x306   :  { %v3129_v34 = vadd.f32 %v3128_v59, %v3127_v53  ;;  %v2823_v41 = vsel %vm2695_vm15, %v2587_v50, %v2759_v60  ;;  %v2600_v56 = vadd.f32 %v4604_v63, %v4625_v4  ;;  %v3125_v2 = vadd.f32 %v3124_v58, %v3123_v42  ;;  %v3825_v53 = vpop.f32.mrf.mxu1 }
 0x307   :  { %v3332_v5 = vsel %vm3294_vm3, %v3113_v8, %v3331_v54  ;;  %v3146_v6 = vrot.slane %v3145_v35, 2  ;;  %v3132_v9 = vrot.slane %v2823_v41, 4  ;;  %v2828_v13 = vsel %vm2700_vm1, %v2608_v18, %v2764_v0 }
 0x308   :  { %v3333_v12 = vsel %vm3296_vm5, %v3119_v25, %v3332_v5  ;;  %v3130_v11 = vrot.slane %v3129_v34, 1  ;;  %v3162_v14 = vrot.slane %v2828_v13, 4  ;;  %vm2698_vm2 = vcmp.ge.f32.partialorder %v2600_v56, 0.0 }
 0x309   :  { %v3334_v30 = vsel %vm3298_vm7, %v3125_v2, %v3333_v12  ;;  %v3133_v19 = vadd.f32 %v3132_v9, %v2823_v41  ;;  %v3143_v4 = vadd.f32 %v3142_v61, %v3141_v10  ;;  %v2762_v52 = vmul.f32 0.2, %v2600_v56  ;;  %v2631_v41 = vpop.f32.mrf.mxu1 }
 0x30a   :  { %3362 = vst [vmem:[%s4685_s7 + $0x28] sm:$0xff] %v3334_v30  ;;  %v2611_v29 = vadd.f32 %v4604_v63, %v4627_v20  ;;  %v2603_v16 = vadd.f32 %v4604_v63, %v2602_v36  ;;  %v3147_v62 = vadd.f32 %v3146_v6, %v3145_v35  ;;  %v3163_v21 = vadd.f32 %v3162_v14, %v2828_v13 }
 0x30b   :  { %v3134_v51 = vrot.slane %v3133_v19, 2  ;;  %v2624_v57 = vadd.f32 %v4604_v63, %v3821_v44  ;;  %v3131_v22 = vadd.f32 %v3130_v11, %v3129_v34  ;;  %v2826_v23 = vsel %vm2698_vm2, %v2600_v56, %v2762_v52 }
 0x30c   :  { %vm2701_vm4 = vcmp.ge.f32.partialorder %v2611_v29, 0.0  ;;  %v2765_v24 = vmul.f32 0.2, %v2611_v29  ;;  %v3164_v28 = vrot.slane %v3163_v21, 2  ;;  %v3150_v1 = vrot.slane %v2826_v23, 4 }
 0x30d   :  { %v3135_v48 = vadd.f32 %v3134_v51, %v3133_v19  ;;  %vm2699_vm6 = vcmp.ge.f32.partialorder %v2603_v16, 0.0  ;;  %v2763_v7 = vmul.f32 0.2, %v2603_v16  ;;  %vm2704_vm8 = vcmp.ge.f32.partialorder %v2624_v57, 0.0 }
 0x30e   :  { %v2829_v38 = vsel %vm2701_vm4, %v2611_v29, %v2765_v24  ;;  %v2768_v20 = vmul.f32 0.2, %v2624_v57  ;;  %v3148_v32 = vrot.slane %v3147_v62, 1  ;;  %v3151_v36 = vadd.f32 %v3150_v1, %v2826_v23 }
 0x30f   :  { %v3136_v33 = vrot.slane %v3135_v48, 1  ;;  %v3168_v37 = vrot.slane %v2829_v38, 4  ;;  %v3165_v27 = vadd.f32 %v3164_v28, %v3163_v21  ;;  %v2827_v39 = vsel %vm2699_vm6, %v2603_v16, %v2763_v7 }
 0x310   :  { %v2832_v40 = vsel %vm2704_vm8, %v2624_v57, %v2768_v20  ;;  %v2616_v42 = vadd.f32 %v4604_v63, %v2615_v3  ;;  %v3152_v43 = vrot.slane %v3151_v36, 2  ;;  %v2627_v46 = vadd.f32 %v4604_v63, %v3822_v17 }
 0x311   :  { %v3137_v45 = vadd.f32 %v3136_v33, %v3135_v48  ;;  %v3169_v15 = vadd.f32 %v3168_v37, %v2829_v38  ;;  %v3156_v49 = vrot.slane %v2827_v39, 4  ;;  %v3186_v50 = vrot.slane %v2832_v40, 4 }
 0x312   :  { %vm2702_vm9 = vcmp.ge.f32.partialorder %v2616_v42, 0.0  ;;  %v2766_v25 = vmul.f32 0.2, %v2616_v42  ;;  %v3153_v18 = vadd.f32 %v3152_v43, %v3151_v36  ;;  %v3149_v58 = vadd.f32 %v3148_v32, %v3147_v62 }
 0x313   :  { %v3335_v55 = vsel %vm3286_vm11, %v3137_v45, %v3131_v22  ;;  %v3170_v44 = vrot.slane %v3169_v15, 2  ;;  %v3157_v10 = vadd.f32 %v3156_v49, %v2827_v39  ;;  %v3166_v54 = vrot.slane %v3165_v27, 1 }
 0x314   :  { %v3336_v26 = vsel %vm3288_vm13, %v3143_v4, %v3335_v55  ;;  %v2830_v31 = vsel %vm2702_vm9, %v2616_v42, %v2766_v25  ;;  %v3154_v59 = vrot.slane %v3153_v18, 1  ;;  %v3187_v35 = vadd.f32 %v3186_v50, %v2832_v40  ;;  %v3826_v4 = vpop.f32.mrf.mxu1 }
 0x315   :  { %v3171_v60 = vadd.f32 %v3170_v44, %v3169_v15  ;;  %v3174_v8 = vrot.slane %v2830_v31, 4  ;;  %v3158_v61 = vrot.slane %v3157_v10, 2  ;;  %vm2705_vm10 = vcmp.ge.f32.partialorder %v2627_v46, 0.0 }
 0x316   :  { %v2769_v34 = vmul.f32 0.2, %v2627_v46  ;;  %v3155_v0 = vadd.f32 %v3154_v59, %v3153_v18  ;;  %v3337_v56 = vsel %vm3290_vm14, %v3149_v58, %v3336_v26  ;;  %v2619_v2 = vadd.f32 %v4604_v63, %v2618_v47  ;;  %v2634_v38 = vpop.f32.mrf.mxu1 }
 0x317   :  { %v3175_v3 = vadd.f32 %v3174_v8, %v2830_v31  ;;  %v3172_v5 = vrot.slane %v3171_v60, 1  ;;  %v3159_v6 = vadd.f32 %v3158_v61, %v3157_v10  ;;  %v2640_v12 = vadd.f32 %v4604_v63, %v3825_v53 }
 0x318   :  { %v2833_v9 = vsel %vm2705_vm10, %v2627_v46, %v2769_v34  ;;  %v3167_v30 = vadd.f32 %v3166_v54, %v3165_v27  ;;  %vm2703_vm12 = vcmp.ge.f32.partialorder %v2619_v2, 0.0  ;;  %v2767_v14 = vmul.f32 0.2, %v2619_v2 }
 0x319   :  { %v3176_v11 = vrot.slane %v3175_v3, 2  ;;  %v3192_v13 = vrot.slane %v2833_v9, 4  ;;  %v3160_v19 = vrot.slane %v3159_v6, 1  ;;  %v3338_v52 = vsel %vm3292_vm0, %v3155_v0, %v3337_v56 }
 0x31a   :  { %v3188_v29 = vrot.slane %v3187_v35, 2  ;;  %vm2708_vm15 = vcmp.ge.f32.partialorder %v2640_v12, 0.0  ;;  %v2772_v16 = vmul.f32 0.2, %v2640_v12  ;;  %v3173_v17 = vadd.f32 %v3172_v5, %v3171_v60 }
 0x31b   :  { %v3161_v62 = vadd.f32 %v3160_v19, %v3159_v6  ;;  %v2831_v51 = vsel %vm2703_vm12, %v2619_v2, %v2767_v14  ;;  %v2632_v21 = vadd.f32 %v4604_v63, %v2631_v41  ;;  %v3177_v57 = vadd.f32 %v3176_v11, %v3175_v3 }
 0x31c   :  { %v3193_v22 = vadd.f32 %v3192_v13, %v2833_v9  ;;  %v3180_v23 = vrot.slane %v2831_v51, 4  ;;  %v2836_v24 = vsel %vm2708_vm15, %v2640_v12, %v2772_v16  ;;  %v3189_v32 = vadd.f32 %v3188_v29, %v3187_v35 }
 0x31d   :  { %v3339_v48 = vsel %vm3294_vm3, %v3161_v62, %v3338_v52  ;;  %v3210_v28 = vrot.slane %v2836_v24, 4  ;;  %vm2706_vm1 = vcmp.ge.f32.partialorder %v2632_v21, 0.0  ;;  %v2770_v1 = vmul.f32 0.2, %v2632_v21 }
 0x31e   :  { %v3340_v7 = vsel %vm3296_vm5, %v3167_v30, %v3339_v48  ;;  %v3181_v20 = vadd.f32 %v3180_v23, %v2831_v51  ;;  %v2643_v36 = vadd.f32 %v4604_v63, %v3826_v4  ;;  %v3194_v37 = vrot.slane %v3193_v22, 2 }
 0x31f   :  { %v3341_v47 = vsel %vm3298_vm7, %v3173_v17, %v3340_v7  ;;  %v2834_v33 = vsel %vm2706_vm1, %v2632_v21, %v2770_v1  ;;  %v2635_v40 = vadd.f32 %v4604_v63, %v2634_v38  ;;  %v3178_v42 = vrot.slane %v3177_v57, 1 }
 0x320   :  { %3363 = vst [vmem:[%s4685_s7 + $0x30] sm:$0xff] %v3341_v47  ;;  %v3182_v27 = vrot.slane %v3181_v20, 2  ;;  %v3198_v39 = vrot.slane %v2834_v33, 4  ;;  %v3211_v45 = vadd.f32 %v3210_v28, %v2836_v24  ;;  %vm2709_vm2 = vcmp.ge.f32.partialorder %v2643_v36, 0.0 }
 0x321   :  { %v2773_v43 = vmul.f32 0.2, %v2643_v36  ;;  %vm2707_vm4 = vcmp.ge.f32.partialorder %v2635_v40, 0.0  ;;  %v2771_v50 = vmul.f32 0.2, %v2635_v40  ;;  %v3195_v25 = vadd.f32 %v3194_v37, %v3193_v22 }
 0x322   :  { %v3183_v15 = vadd.f32 %v3182_v27, %v3181_v20  ;;  %v3199_v46 = vadd.f32 %v3198_v39, %v2834_v33  ;;  %v3190_v44 = vrot.slane %v3189_v32, 1  ;;  %v3179_v58 = vadd.f32 %v3178_v42, %v3177_v57 }
 0x323   :  { %v2837_v49 = vsel %vm2709_vm2, %v2643_v36, %v2773_v43  ;;  %v3212_v26 = vrot.slane %v3211_v45, 2  ;;  %v2835_v10 = vsel %vm2707_vm4, %v2635_v40, %v2771_v50  ;;  %v3196_v60 = vrot.slane %v3195_v25, 1 }
 0x324   :  { %v3184_v53 = vrot.slane %v3183_v15, 1  ;;  %v3200_v55 = vrot.slane %v3199_v46, 2  ;;  %v3216_v18 = vrot.slane %v2837_v49, 4  ;;  %v3204_v59 = vrot.slane %v2835_v10, 4 }
 0x325   :  { %v3191_v34 = vadd.f32 %v3190_v44, %v3189_v32  ;;  %v3213_v41 = vadd.f32 %v3212_v26, %v3211_v45  ;;  %v3197_v5 = vadd.f32 %v3196_v60, %v3195_v25 }
 0x326   :  { %v3185_v31 = vadd.f32 %v3184_v53, %v3183_v15  ;;  %v3201_v54 = vadd.f32 %v3200_v55, %v3199_v46  ;;  %v3217_v63 = vadd.f32 %v3216_v18, %v2837_v49  ;;  %v3205_v35 = vadd.f32 %v3204_v59, %v2835_v10 }
 0x327   :  { %v3214_v9 = vrot.slane %v3213_v41, 1 }
 0x328   :  { %v3342_v8 = vsel %vm3286_vm11, %v3185_v31, %v3179_v58  ;;  %v3218_v61 = vrot.slane %v3217_v63, 2  ;;  %v3202_v0 = vrot.slane %v3201_v54, 1  ;;  %v3206_v3 = vrot.slane %v3205_v35, 2 }
 0x329   :  { %v3343_v2 = vsel %vm3288_vm13, %v3191_v34, %v3342_v8  ;;  %v3215_v14 = vadd.f32 %v3214_v9, %v3213_v41 }
 0x32a   :  { %v3219_v56 = vadd.f32 %v3218_v61, %v3217_v63  ;;  %v3207_v6 = vadd.f32 %v3206_v3, %v3205_v35  ;;  %v3203_v12 = vadd.f32 %v3202_v0, %v3201_v54  ;;  %v3344_v11 = vsel %vm3290_vm14, %v3197_v5, %v3343_v2 }
 0x32c   :  { %v3220_v13 = vrot.slane %v3219_v56, 1  ;;  %v3208_v30 = vrot.slane %v3207_v6, 1  ;;  %v3345_v4 = vsel %vm3292_vm0, %v3203_v12, %v3344_v11 }
 0x32e   :  { %v3209_v19 = vadd.f32 %v3208_v30, %v3207_v6  ;;  %v3221_v52 = vadd.f32 %v3220_v13, %v3219_v56 }
 0x330   :  { %v3346_v29 = vsel %vm3294_vm3, %v3209_v19, %v3345_v4 }
 0x331   :  { %v3347_v16 = vsel %vm3296_vm5, %v3215_v14, %v3346_v29 }
 0x332   :  { %v3348_v17 = vsel %vm3298_vm7, %v3221_v52, %v3347_v16 }
 0x333   :  { %3364 = vst [vmem:[%s4685_s7 + $0x38] sm:$0xff] %v3348_v17 }

</bundles_post_ra>
